<compile_context>
chip_gen: v7x
topology: tpu7x:2x2x1
jax: 0.10.0
libtpu: 0.0.40
codegen_flags: <defaults>
</compile_context>

<pallas_src>
import functools

import jax
import jax.numpy as jnp
from jax.experimental import pallas as pl
from jax.experimental.pallas import tpu as pltpu

EPS = 1e-5


def _layer_norm(v, g, b):
    # v: (..., C) f32, g/b: (1, C) f32 — statistics always in f32.
    mu = jnp.mean(v, axis=-1, keepdims=True)
    var = jnp.mean((v - mu) ** 2, axis=-1, keepdims=True)
    return (v - mu) * jax.lax.rsqrt(var + EPS) * g + b


# --------------------------------------------------------------------------
# Kernel
# --------------------------------------------------------------------------
def block_kernel(x_ref,
                 ln1_g_ref, ln1_b_ref,
                 wqkv_ref, bqkv_ref, wp_ref, bp_ref,
                 ln2_g_ref, ln2_b_ref,
                 w1_ref, b1_ref, w3_ref, b3_ref, w2_ref, b2_ref,
                 o_ref,
                 qkv_scr, attn_scr,
                 *, num_heads, block_b, seq_len, hidden_tile):
    x = x_ref[...].astype(jnp.float32)                 # (rows, C)
    C = x.shape[-1]
    dh = C // num_heads
    scale = dh ** (-0.5)
    cdt = wqkv_ref.dtype                               # matmul-input dtype (f32/bf16)

    # ---------------- attention branch ----------------
    xn = _layer_norm(x, ln1_g_ref[...], ln1_b_ref[...])

    # Fused QKV: one (rows, C) x (C, 3C) MXU contraction, f32 accumulation.
    qkv = jnp.dot(xn.astype(cdt), wqkv_ref[...],
                  preferred_element_type=jnp.float32) + bqkv_ref[...]
    # Fold the attention scale into Q once; stage qkv into VMEM (matmul dtype).
    qkv_scr[:, 0:C] = (qkv[:, 0:C] * scale).astype(qkv_scr.dtype)
    qkv_scr[:, C:3 * C] = qkv[:, C:3 * C].astype(qkv_scr.dtype)

    align = seq_len & -seq_len                          # largest pow2 dividing N

    def _attend_one(b, carry):
        r0 = b * seq_len
        if align > 1:
            r0 = pl.multiple_of(r0, align)
        qkv_b = qkv_scr[pl.ds(r0, seq_len), :]          # (N, 3C), matmul dtype
        heads = []
        for h in range(num_heads):                      # small static unroll
            c0 = h * dh
            qh = qkv_b[:, c0:c0 + dh]
            kh = qkv_b[:, C + c0:C + c0 + dh]
            vh = qkv_b[:, 2 * C + c0:2 * C + c0 + dh]
            # q @ k^T without materializing the transpose.
            s = jax.lax.dot_general(qh, kh, (((1,), (1,)), ((), ())),
                                    preferred_element_type=jnp.float32)
            s = s - jnp.max(s, axis=-1, keepdims=True)
            p = jnp.exp(s)
            p = p * pl.reciprocal(jnp.sum(p, axis=-1, keepdims=True), approx=True)
            heads.append(jnp.dot(p.astype(qkv_b.dtype), vh,
                                 preferred_element_type=jnp.float32))
        # One lane-dense (N, C) store per batch row (no per-head masked stores).
        attn_scr[pl.ds(r0, seq_len), :] = (
            jnp.concatenate(heads, axis=-1).astype(attn_scr.dtype))
        return carry

    jax.lax.fori_loop(0, block_b, _attend_one, 0, unroll=min(2, max(block_b, 1)))

    attn = jnp.dot(attn_scr[...], wp_ref[...],
                   preferred_element_type=jnp.float32) + bp_ref[...]
    x1 = x + attn                                       # residual 1

    # ---------------- SwiGLU MLP branch ----------------
    xn2 = _layer_norm(x1, ln2_g_ref[...], ln2_b_ref[...]).astype(cdt)
    hidden = w1_ref.shape[-1]
    acc = None
    for c0 in range(0, hidden, hidden_tile):            # bounded (rows, tile) temps
        cw = min(hidden_tile, hidden - c0)
        h1 = jnp.dot(xn2, w1_ref[:, c0:c0 + cw],
                     preferred_element_type=jnp.float32) + b1_ref[:, c0:c0 + cw]
        h3 = jnp.dot(xn2, w3_ref[:, c0:c0 + cw],
                     preferred_element_type=jnp.float32) + b3_ref[:, c0:c0 + cw]
        # SiLU: divide moved to the EUP (approx reciprocal), exp already EUP.
        silu = h1 * pl.reciprocal(1.0 + jnp.exp(-h1), approx=True)
        part = jnp.dot((silu * h3).astype(cdt), w2_ref[c0:c0 + cw, :],
                       preferred_element_type=jnp.float32)
        acc = part if acc is None else acc + part
    mlp = acc + b2_ref[...]

    o_ref[...] = (x1 + mlp).astype(o_ref.dtype)         # residual 2


# --------------------------------------------------------------------------
# Wrapper helpers
# --------------------------------------------------------------------------
def _const_spec(shape, single_buffer):
    """Whole-array spec for weights; single-buffered when supported."""
    idx = lambda i: (0, 0)
    if single_buffer and hasattr(pl, "Buffered"):
        try:
            return pl.BlockSpec(shape, idx, pipeline_mode=pl.Buffered(1))
        except Exception:
            pass
    return pl.BlockSpec(shape, idx)


def _pick_vmem_limit_bytes():
    try:
        kind = jax.devices()[0].device_kind.lower()
    except Exception:
        return None
    if "v7" in kind:
        return 56 * 1024 * 1024      # v7x: 64 MiB/TC physical; leave headroom.
    if any(t in kind for t in ("v4", "v5", "v6")):
        return 96 * 1024 * 1024      # 128 MiB physical VMEM.
    return None


def _vmem_footprint_bytes(rows, C, hidden_tile, param_bytes, cdt_itemsize):
    io = 2 * 2 * rows * C * 4                       # double-buffered x + out slabs
    scratch = rows * 4 * C * cdt_itemsize           # qkv (3C) + attn (C) scratch
    temps = rows * (8 * C + 3 * hidden_tile) * 4    # rough f32 live temporaries
    return param_bytes + io + scratch + temps


def _pick_block_b(B, N, *, max_rows=1024, fits=lambda rows: True):
    divisors = [c for c in range(1, B + 1) if B % c == 0]
    cands = [c for c in divisors
             if (c * N) % 8 == 0 and c * N <= max_rows and fits(c * N)]
    if not cands:
        cands = [c for c in divisors if (c * N) % 8 == 0] or [B]
    multi_grid = [c for c in cands if B // c >= 2]   # keep both v7x TCs busy.
    pool = multi_grid or cands
    return max(pool, key=lambda c: ((c * N) % 256 == 0, c * N))


def _block_forward_impl(x, params, num_heads, *, block_b, single_buffer_weights):
    B, N, C = x.shape
    assert C % num_heads == 0
    hidden = params["w1"].shape[1]
    cdt = jnp.dtype(params["wqkv"].dtype)
    hidden_tile = max(1, min(hidden, 512))

    vmem_limit = _pick_vmem_limit_bytes()
    param_bytes = sum(int(v.size) * jnp.dtype(v.dtype).itemsize
                      for v in params.values())

    if block_b is None:
        if vmem_limit is None:
            fits = lambda rows: True
        else:
            budget = int(0.8 * vmem_limit)
            fits = lambda rows: _vmem_footprint_bytes(
                rows, C, hidden_tile, param_bytes, cdt.itemsize) <= budget
        block_b = _pick_block_b(B, N, fits=fits)
    rows = block_b * N
    assert B % block_b == 0, "block_b must divide the batch"
    assert rows % 8 == 0 or rows == B * N, \
        "block_b*N must be a multiple of 8 (sublanes) or cover the full batch"
    grid_b = B // block_b

    # Fold (B, N) onto the sublane axis: each grid step sees a (rows, C) slab.
    x2 = x.reshape(B * N, C)
    sb = single_buffer_weights

    in_specs = [
        pl.BlockSpec((rows, C), lambda i: (i, 0)),          # x slab (pipelined)
        _const_spec((1, C), sb), _const_spec((1, C), sb),   # ln1 gamma / beta
        _const_spec((C, 3 * C), sb),                        # fused Wqkv
        _const_spec((1, 3 * C), sb),                        # fused qkv bias
        _const_spec((C, C), sb), _const_spec((1, C), sb),   # Wproj, bproj
        _const_spec((1, C), sb), _const_spec((1, C), sb),   # ln2 gamma / beta
        _const_spec((C, hidden), sb), _const_spec((1, hidden), sb),   # W1, b1
        _const_spec((C, hidden), sb), _const_spec((1, hidden), sb),   # W3, b3
        _const_spec((hidden, C), sb), _const_spec((1, C), sb),        # W2, b2
    ]

    # Advisory cost estimate (weights counted once — constant block index).
    dh = C // num_heads
    flops = (2 * B * N * C * 3 * C
             + 2 * B * num_heads * N * N * dh * 2
             + 2 * B * N * C * C
             + 2 * B * N * C * hidden * 2
             + 2 * B * N * hidden * C)
    transcendentals = B * num_heads * N * N + B * N * hidden
    bytes_accessed = 2 * x.size * x.dtype.itemsize + param_bytes

    cp_kwargs = dict(dimension_semantics=("parallel",))
    if vmem_limit is not None:
        cp_kwargs["vmem_limit_bytes"] = vmem_limit

    kernel = functools.partial(block_kernel, num_heads=num_heads,
                               block_b=block_b, seq_len=N,
                               hidden_tile=hidden_tile)
    out2 = pl.pallas_call(
        kernel,
        out_shape=jax.ShapeDtypeStruct((B * N, C), x.dtype),
        grid_spec=pltpu.PrefetchScalarGridSpec(
            num_scalar_prefetch=0,
            grid=(grid_b,),
            in_specs=in_specs,
            out_specs=pl.BlockSpec((rows, C), lambda i: (i, 0)),
            scratch_shapes=[pltpu.VMEM((rows, 3 * C), cdt),   # staged qkv
                            pltpu.VMEM((rows, C), cdt)],      # attention output
        ),
        compiler_params=pltpu.CompilerParams(**cp_kwargs),
        cost_estimate=pl.CostEstimate(
            flops=int(flops),
            transcendentals=int(transcendentals),
            bytes_accessed=int(bytes_accessed)),
    )(x2,
      params["ln1_g"], params["ln1_b"],
      params["wqkv"], params["bqkv"], params["wp"], params["bp"],
      params["ln2_g"], params["ln2_b"],
      params["w1"], params["b1"], params["w3"], params["b3"],
      params["w2"], params["b2"])
    return out2.reshape(B, N, C)


def block_forward(x, params, num_heads, *, block_b=None):
    """Fused transformer Block. x: (B, N, C) f32. Matmul weights f32 or bf16."""
    try:
        return _block_forward_impl(x, params, num_heads, block_b=block_b,
                                   single_buffer_weights=True)
    except Exception:
        # Fallback for JAX builds where pipeline_mode=pl.Buffered(1) is not
        # supported by the Mosaic pipeline (weights get double-buffered).
        return _block_forward_impl(x, params, num_heads, block_b=block_b,
                                   single_buffer_weights=False)


# --------------------------------------------------------------------------
# Pure-JAX reference (matches the PyTorch Block semantics, f32)
# --------------------------------------------------------------------------
def block_reference(x, params, num_heads):
    B, N, C = x.shape
    dh = C // num_heads
    scale = dh ** (-0.5)
    wqkv = params["wqkv"].astype(jnp.float32)
    bqkv = params["bqkv"]
    wq, wk, wv = wqkv[:, :C], wqkv[:, C:2 * C], wqkv[:, 2 * C:]
    bq, bk, bv = bqkv[:, :C], bqkv[:, C:2 * C], bqkv[:, 2 * C:]

    xn = _layer_norm(x, params["ln1_g"], params["ln1_b"])
    q = (xn @ wq + bq).reshape(B, N, num_heads, dh).transpose(0, 2, 1, 3)
    k = (xn @ wk + bk).reshape(B, N, num_heads, dh).transpose(0, 2, 1, 3)
    v = (xn @ wv + bv).reshape(B, N, num_heads, dh).transpose(0, 2, 1, 3)
    attn = jnp.einsum("bhqd,bhkd->bhqk", q, k) * scale
    attn = jax.nn.softmax(attn, axis=-1)
    o = jnp.einsum("bhqk,bhkd->bhqd", attn, v).transpose(0, 2, 1, 3).reshape(B, N, C)
    o = o @ params["wp"].astype(jnp.float32) + params["bp"]
    x1 = x + o

    xn2 = _layer_norm(x1, params["ln2_g"], params["ln2_b"])
    h1 = xn2 @ params["w1"].astype(jnp.float32) + params["b1"]
    h3 = xn2 @ params["w3"].astype(jnp.float32) + params["b3"]
    mlp = (jax.nn.silu(h1) * h3) @ params["w2"].astype(jnp.float32) + params["b2"]
    return x1 + mlp


def make_params(key, dim, mlp_ratio=4.0):
    # SwiGLU hidden dim, exactly as in the PyTorch module.
    mlp_hidden_dim = int(dim * mlp_ratio)
    multiple_of = int(mlp_ratio)
    hidden = int(multiple_of * ((2 * mlp_hidden_dim // 3 + multiple_of - 1) // multiple_of))

    ks = jax.random.split(key, 11)
    s = 0.05
    wq = s * jax.random.normal(ks[0], (dim, dim), jnp.float32)
    wk = s * jax.random.normal(ks[1], (dim, dim), jnp.float32)
    wv = s * jax.random.normal(ks[2], (dim, dim), jnp.float32)
    return {
        "ln1_g": jnp.ones((1, dim), jnp.float32),
        "ln1_b": jnp.zeros((1, dim), jnp.float32),
        "wqkv": jnp.concatenate([wq, wk, wv], axis=1),           # (C, 3C)
        "bqkv": s * jax.random.normal(ks[3], (1, 3 * dim), jnp.float32),
        "wp": s * jax.random.normal(ks[4], (dim, dim), jnp.float32),
        "bp": s * jax.random.normal(ks[5], (1, dim), jnp.float32),
        "ln2_g": jnp.ones((1, dim), jnp.float32),
        "ln2_b": jnp.zeros((1, dim), jnp.float32),
        "w1": s * jax.random.normal(ks[6], (dim, hidden), jnp.float32),
        "b1": s * jax.random.normal(ks[7], (1, hidden), jnp.float32),
        "w3": s * jax.random.normal(ks[8], (dim, hidden), jnp.float32),
        "b3": s * jax.random.normal(ks[9], (1, hidden), jnp.float32),
        "w2": s * jax.random.normal(ks[10], (hidden, dim), jnp.float32),
        "b2": jnp.zeros((1, dim), jnp.float32),
    }


def cast_matmul_weights(params, dtype):
    """Cast only the large matmul weights (biases / LN params stay f32)."""
    out = dict(params)
    for k in ("wqkv", "wp", "w1", "w3", "w2"):
        out[k] = params[k].astype(dtype)
    return out


if __name__ == "__main__":
    B, N, C = 4, 8, 32          # batch, sequence length, embed dim (small demo)
    num_heads = 4

    key = jax.random.PRNGKey(0)
    k_x, k_p = jax.random.split(key)
    x = jax.random.normal(k_x, (B, N, C), jnp.float32)
    params = make_params(k_p, C, mlp_ratio=4.0)

    ref = block_reference(x, params, num_heads)

    # f32 weights (auto block_b -> 2 batch rows per grid step, 2 grid steps).
    out = jax.block_until_ready(block_forward(x, params, num_heads))
    assert out.shape == (B, N, C)
    assert jnp.allclose(out, ref, rtol=5e-3, atol=5e-3), \
        f"f32 mismatch vs reference (max |diff| = {jnp.max(jnp.abs(out - ref))})"

    # bf16 matmul weights / bf16 MXU inputs; f32 accumulation, LN and softmax.
    params_bf16 = cast_matmul_weights(params, jnp.bfloat16)
    out_bf16 = jax.block_until_ready(block_forward(x, params_bf16, num_heads))
    assert jnp.allclose(out_bf16, ref, rtol=3e-2, atol=3e-2), \
        f"bf16 mismatch vs reference (max |diff| = {jnp.max(jnp.abs(out_bf16 - ref))})"

    print("KERNEL_OK")
</pallas_src>

<mosaic_0001>
module attributes {stable_mosaic.version = 11 : i64} {
  func.func @block_kernel(%arg0: i32, %arg1: memref<16x32xf32, #tpu.memory_space<vmem>>, %arg2: memref<1x32xf32, #tpu.memory_space<vmem>>, %arg3: memref<1x32xf32, #tpu.memory_space<vmem>>, %arg4: memref<32x96xf32, #tpu.memory_space<vmem>>, %arg5: memref<1x96xf32, #tpu.memory_space<vmem>>, %arg6: memref<32x32xf32, #tpu.memory_space<vmem>>, %arg7: memref<1x32xf32, #tpu.memory_space<vmem>>, %arg8: memref<1x32xf32, #tpu.memory_space<vmem>>, %arg9: memref<1x32xf32, #tpu.memory_space<vmem>>, %arg10: memref<32x88xf32, #tpu.memory_space<vmem>>, %arg11: memref<1x88xf32, #tpu.memory_space<vmem>>, %arg12: memref<32x88xf32, #tpu.memory_space<vmem>>, %arg13: memref<1x88xf32, #tpu.memory_space<vmem>>, %arg14: memref<88x32xf32, #tpu.memory_space<vmem>>, %arg15: memref<1x32xf32, #tpu.memory_space<vmem>>, %arg16: memref<16x32xf32, #tpu.memory_space<vmem>>, %arg17: memref<16x96xf32, #tpu.memory_space<vmem>>, %arg18: memref<16x32xf32, #tpu.memory_space<vmem>>) attributes {dimension_semantics = [#tpu.dimension_semantics<parallel>], iteration_bounds = array<i64: 2>, scalar_prefetch = 0 : i64, scratch_operands = 2 : i64, tpu.core_type = #tpu.core_type<tc>, window_params = [{transform_indices = @transform_0, window_bounds = array<i64: 16, 32>}, {pipeline_mode = #tpu.pipeline_mode<synchronous>, transform_indices = @transform_1, window_bounds = array<i64: 1, 32>}, {pipeline_mode = #tpu.pipeline_mode<synchronous>, transform_indices = @transform_2, window_bounds = array<i64: 1, 32>}, {pipeline_mode = #tpu.pipeline_mode<synchronous>, transform_indices = @transform_3, window_bounds = array<i64: 32, 96>}, {pipeline_mode = #tpu.pipeline_mode<synchronous>, transform_indices = @transform_4, window_bounds = array<i64: 1, 96>}, {pipeline_mode = #tpu.pipeline_mode<synchronous>, transform_indices = @transform_5, window_bounds = array<i64: 32, 32>}, {pipeline_mode = #tpu.pipeline_mode<synchronous>, transform_indices = @transform_6, window_bounds = array<i64: 1, 32>}, {pipeline_mode = #tpu.pipeline_mode<synchronous>, transform_indices = @transform_7, window_bounds = array<i64: 1, 32>}, {pipeline_mode = #tpu.pipeline_mode<synchronous>, transform_indices = @transform_8, window_bounds = array<i64: 1, 32>}, {pipeline_mode = #tpu.pipeline_mode<synchronous>, transform_indices = @transform_9, window_bounds = array<i64: 32, 88>}, {pipeline_mode = #tpu.pipeline_mode<synchronous>, transform_indices = @transform_10, window_bounds = array<i64: 1, 88>}, {pipeline_mode = #tpu.pipeline_mode<synchronous>, transform_indices = @transform_11, window_bounds = array<i64: 32, 88>}, {pipeline_mode = #tpu.pipeline_mode<synchronous>, transform_indices = @transform_12, window_bounds = array<i64: 1, 88>}, {pipeline_mode = #tpu.pipeline_mode<synchronous>, transform_indices = @transform_13, window_bounds = array<i64: 88, 32>}, {pipeline_mode = #tpu.pipeline_mode<synchronous>, transform_indices = @transform_14, window_bounds = array<i64: 1, 32>}, {transform_indices = @transform_15, window_bounds = array<i64: 16, 32>}]} {
    %c0 = arith.constant 0 : index
    %c0_0 = arith.constant 0 : index
    %0 = vector.load %arg1[%c0, %c0_0] : memref<16x32xf32, #tpu.memory_space<vmem>>, vector<16x32xf32>
    %c0_1 = arith.constant 0 : index
    %c0_2 = arith.constant 0 : index
    %1 = vector.load %arg2[%c0_1, %c0_2] : memref<1x32xf32, #tpu.memory_space<vmem>>, vector<1x32xf32>
    %c0_3 = arith.constant 0 : index
    %c0_4 = arith.constant 0 : index
    %2 = vector.load %arg3[%c0_3, %c0_4] : memref<1x32xf32, #tpu.memory_space<vmem>>, vector<1x32xf32>
    %cst = arith.constant dense<0.000000e+00> : vector<16xf32>
    %3 = vector.multi_reduction <add>, %0, %cst [1] : vector<16x32xf32> to vector<16xf32>
    %4 = vector.shape_cast %3 : vector<16xf32> to vector<16x1xf32>
    %cst_5 = arith.constant 3.200000e+01 : f32
    %5 = vector.broadcast %cst_5 : f32 to vector<16x1xf32>
    %6 = arith.divf %4, %5 : vector<16x1xf32>
    %7 = vector.broadcast %6 : vector<16x1xf32> to vector<16x32xf32>
    %8 = arith.subf %0, %7 : vector<16x32xf32>
    %9 = arith.mulf %8, %8 : vector<16x32xf32>
    %cst_6 = arith.constant dense<0.000000e+00> : vector<16xf32>
    %10 = vector.multi_reduction <add>, %9, %cst_6 [1] : vector<16x32xf32> to vector<16xf32>
    %11 = vector.shape_cast %10 : vector<16xf32> to vector<16x1xf32>
    %cst_7 = arith.constant 3.200000e+01 : f32
    %12 = vector.broadcast %cst_7 : f32 to vector<16x1xf32>
    %13 = arith.divf %11, %12 : vector<16x1xf32>
    %14 = vector.broadcast %6 : vector<16x1xf32> to vector<16x32xf32>
    %15 = arith.subf %0, %14 : vector<16x32xf32>
    %cst_8 = arith.constant 9.99999974E-6 : f32
    %16 = vector.broadcast %cst_8 : f32 to vector<16x1xf32>
    %17 = arith.addf %13, %16 : vector<16x1xf32>
    %18 = math.rsqrt %17 : vector<16x1xf32>
    %19 = vector.broadcast %18 : vector<16x1xf32> to vector<16x32xf32>
    %20 = arith.mulf %15, %19 : vector<16x32xf32>
    %21 = vector.broadcast %1 : vector<1x32xf32> to vector<16x32xf32>
    %22 = arith.mulf %20, %21 : vector<16x32xf32>
    %23 = vector.broadcast %2 : vector<1x32xf32> to vector<16x32xf32>
    %24 = arith.addf %22, %23 : vector<16x32xf32>
    %c0_9 = arith.constant 0 : index
    %c0_10 = arith.constant 0 : index
    %25 = vector.load %arg4[%c0_9, %c0_10] : memref<32x96xf32, #tpu.memory_space<vmem>>, vector<32x96xf32>
    %cst_11 = arith.constant dense<0.000000e+00> : vector<16x96xf32>
    %26 = tpu.matmul %24, %25, %cst_11 {dimension_numbers = #tpu.dot_dimension_numbers<[1], [0], [0], [1], [0, 0, 1, 1], [], []>} : vector<16x32xf32>, vector<32x96xf32>, vector<16x96xf32> -> vector<16x96xf32>
    %c0_12 = arith.constant 0 : index
    %c0_13 = arith.constant 0 : index
    %27 = vector.load %arg5[%c0_12, %c0_13] : memref<1x96xf32, #tpu.memory_space<vmem>>, vector<1x96xf32>
    %28 = vector.broadcast %27 : vector<1x96xf32> to vector<16x96xf32>
    %29 = arith.addf %26, %28 : vector<16x96xf32>
    %30 = vector.extract_strided_slice %29 {offsets = [0, 0], sizes = [16, 32], strides = [1, 1]} : vector<16x96xf32> to vector<16x32xf32>
    %cst_14 = arith.constant 0.353553385 : f32
    %31 = vector.broadcast %cst_14 : f32 to vector<16x32xf32>
    %32 = arith.mulf %30, %31 : vector<16x32xf32>
    %c0_15 = arith.constant 0 : index
    %c0_16 = arith.constant 0 : index
    %33 = vector.load %arg17[%c0_15, %c0_16] : memref<16x96xf32, #tpu.memory_space<vmem>>, vector<16x32xf32>
    tpu.vector_store %arg17[%c0_15, %c0_16], %32 {strides = array<i32>} : memref<16x96xf32, #tpu.memory_space<vmem>>, vector<16x32xf32>,
    %34 = vector.extract_strided_slice %29 {offsets = [0, 32], sizes = [16, 64], strides = [1, 1]} : vector<16x96xf32> to vector<16x64xf32>
    %c0_17 = arith.constant 0 : index
    %c32 = arith.constant 32 : index
    %35 = vector.load %arg17[%c0_17, %c32] : memref<16x96xf32, #tpu.memory_space<vmem>>, vector<16x64xf32>
    tpu.vector_store %arg17[%c0_17, %c32], %34 {strides = array<i32>} : memref<16x96xf32, #tpu.memory_space<vmem>>, vector<16x64xf32>,
    %c0_i32 = arith.constant 0 : i32
    %c8_i32 = arith.constant 8 : i32
    %36 = arith.muli %c0_i32, %c8_i32 : i32
    %37 = tpu.assume_multiple %36, 8 : i32
    %38 = arith.index_cast %37 : i32 to index
    %c0_18 = arith.constant 0 : index
    %39 = vector.load %arg17[%38, %c0_18] : memref<16x96xf32, #tpu.memory_space<vmem>>, vector<8x96xf32>
    %40 = vector.extract_strided_slice %39 {offsets = [0, 0], sizes = [8, 8], strides = [1, 1]} : vector<8x96xf32> to vector<8x8xf32>
    %41 = vector.extract_strided_slice %39 {offsets = [0, 32], sizes = [8, 8], strides = [1, 1]} : vector<8x96xf32> to vector<8x8xf32>
    %42 = vector.extract_strided_slice %39 {offsets = [0, 64], sizes = [8, 8], strides = [1, 1]} : vector<8x96xf32> to vector<8x8xf32>
    %cst_19 = arith.constant dense<0.000000e+00> : vector<8x8xf32>
    %43 = tpu.matmul %40, %41, %cst_19 {dimension_numbers = #tpu.dot_dimension_numbers<[1], [1], [0], [0], [0, 0, 1, 0], [], []>} : vector<8x8xf32>, vector<8x8xf32>, vector<8x8xf32> -> vector<8x8xf32>
    %cst_20 = arith.constant dense<0xFF800000> : vector<8xf32>
    %44 = vector.multi_reduction <maximumf>, %43, %cst_20 [1] : vector<8x8xf32> to vector<8xf32>
    %45 = vector.shape_cast %44 : vector<8xf32> to vector<8x1xf32>
    %46 = vector.broadcast %45 : vector<8x1xf32> to vector<8x8xf32>
    %47 = arith.subf %43, %46 : vector<8x8xf32>
    %48 = math.exp %47 : vector<8x8xf32>
    %cst_21 = arith.constant dense<0.000000e+00> : vector<8xf32>
    %49 = vector.multi_reduction <add>, %48, %cst_21 [1] : vector<8x8xf32> to vector<8xf32>
    %50 = vector.shape_cast %49 : vector<8xf32> to vector<8x1xf32>
    %51 = tpu.reciprocal %50 {approx = true} : vector<8x1xf32> -> vector<8x1xf32>
    %52 = vector.broadcast %51 : vector<8x1xf32> to vector<8x8xf32>
    %53 = arith.mulf %48, %52 : vector<8x8xf32>
    %cst_22 = arith.constant dense<0.000000e+00> : vector<8x8xf32>
    %54 = tpu.matmul %53, %42, %cst_22 {dimension_numbers = #tpu.dot_dimension_numbers<[1], [0], [0], [1], [0, 0, 1, 1], [], []>} : vector<8x8xf32>, vector<8x8xf32>, vector<8x8xf32> -> vector<8x8xf32>
    %55 = vector.extract_strided_slice %39 {offsets = [0, 8], sizes = [8, 8], strides = [1, 1]} : vector<8x96xf32> to vector<8x8xf32>
    %56 = vector.extract_strided_slice %39 {offsets = [0, 40], sizes = [8, 8], strides = [1, 1]} : vector<8x96xf32> to vector<8x8xf32>
    %57 = vector.extract_strided_slice %39 {offsets = [0, 72], sizes = [8, 8], strides = [1, 1]} : vector<8x96xf32> to vector<8x8xf32>
    %cst_23 = arith.constant dense<0.000000e+00> : vector<8x8xf32>
    %58 = tpu.matmul %55, %56, %cst_23 {dimension_numbers = #tpu.dot_dimension_numbers<[1], [1], [0], [0], [0, 0, 1, 0], [], []>} : vector<8x8xf32>, vector<8x8xf32>, vector<8x8xf32> -> vector<8x8xf32>
    %cst_24 = arith.constant dense<0xFF800000> : vector<8xf32>
    %59 = vector.multi_reduction <maximumf>, %58, %cst_24 [1] : vector<8x8xf32> to vector<8xf32>
    %60 = vector.shape_cast %59 : vector<8xf32> to vector<8x1xf32>
    %61 = vector.broadcast %60 : vector<8x1xf32> to vector<8x8xf32>
    %62 = arith.subf %58, %61 : vector<8x8xf32>
    %63 = math.exp %62 : vector<8x8xf32>
    %cst_25 = arith.constant dense<0.000000e+00> : vector<8xf32>
    %64 = vector.multi_reduction <add>, %63, %cst_25 [1] : vector<8x8xf32> to vector<8xf32>
    %65 = vector.shape_cast %64 : vector<8xf32> to vector<8x1xf32>
    %66 = tpu.reciprocal %65 {approx = true} : vector<8x1xf32> -> vector<8x1xf32>
    %67 = vector.broadcast %66 : vector<8x1xf32> to vector<8x8xf32>
    %68 = arith.mulf %63, %67 : vector<8x8xf32>
    %cst_26 = arith.constant dense<0.000000e+00> : vector<8x8xf32>
    %69 = tpu.matmul %68, %57, %cst_26 {dimension_numbers = #tpu.dot_dimension_numbers<[1], [0], [0], [1], [0, 0, 1, 1], [], []>} : vector<8x8xf32>, vector<8x8xf32>, vector<8x8xf32> -> vector<8x8xf32>
    %70 = vector.extract_strided_slice %39 {offsets = [0, 16], sizes = [8, 8], strides = [1, 1]} : vector<8x96xf32> to vector<8x8xf32>
    %71 = vector.extract_strided_slice %39 {offsets = [0, 48], sizes = [8, 8], strides = [1, 1]} : vector<8x96xf32> to vector<8x8xf32>
    %72 = vector.extract_strided_slice %39 {offsets = [0, 80], sizes = [8, 8], strides = [1, 1]} : vector<8x96xf32> to vector<8x8xf32>
    %cst_27 = arith.constant dense<0.000000e+00> : vector<8x8xf32>
    %73 = tpu.matmul %70, %71, %cst_27 {dimension_numbers = #tpu.dot_dimension_numbers<[1], [1], [0], [0], [0, 0, 1, 0], [], []>} : vector<8x8xf32>, vector<8x8xf32>, vector<8x8xf32> -> vector<8x8xf32>
    %cst_28 = arith.constant dense<0xFF800000> : vector<8xf32>
    %74 = vector.multi_reduction <maximumf>, %73, %cst_28 [1] : vector<8x8xf32> to vector<8xf32>
    %75 = vector.shape_cast %74 : vector<8xf32> to vector<8x1xf32>
    %76 = vector.broadcast %75 : vector<8x1xf32> to vector<8x8xf32>
    %77 = arith.subf %73, %76 : vector<8x8xf32>
    %78 = math.exp %77 : vector<8x8xf32>
    %cst_29 = arith.constant dense<0.000000e+00> : vector<8xf32>
    %79 = vector.multi_reduction <add>, %78, %cst_29 [1] : vector<8x8xf32> to vector<8xf32>
    %80 = vector.shape_cast %79 : vector<8xf32> to vector<8x1xf32>
    %81 = tpu.reciprocal %80 {approx = true} : vector<8x1xf32> -> vector<8x1xf32>
    %82 = vector.broadcast %81 : vector<8x1xf32> to vector<8x8xf32>
    %83 = arith.mulf %78, %82 : vector<8x8xf32>
    %cst_30 = arith.constant dense<0.000000e+00> : vector<8x8xf32>
    %84 = tpu.matmul %83, %72, %cst_30 {dimension_numbers = #tpu.dot_dimension_numbers<[1], [0], [0], [1], [0, 0, 1, 1], [], []>} : vector<8x8xf32>, vector<8x8xf32>, vector<8x8xf32> -> vector<8x8xf32>
    %85 = vector.extract_strided_slice %39 {offsets = [0, 24], sizes = [8, 8], strides = [1, 1]} : vector<8x96xf32> to vector<8x8xf32>
    %86 = vector.extract_strided_slice %39 {offsets = [0, 56], sizes = [8, 8], strides = [1, 1]} : vector<8x96xf32> to vector<8x8xf32>
    %87 = vector.extract_strided_slice %39 {offsets = [0, 88], sizes = [8, 8], strides = [1, 1]} : vector<8x96xf32> to vector<8x8xf32>
    %cst_31 = arith.constant dense<0.000000e+00> : vector<8x8xf32>
    %88 = tpu.matmul %85, %86, %cst_31 {dimension_numbers = #tpu.dot_dimension_numbers<[1], [1], [0], [0], [0, 0, 1, 0], [], []>} : vector<8x8xf32>, vector<8x8xf32>, vector<8x8xf32> -> vector<8x8xf32>
    %cst_32 = arith.constant dense<0xFF800000> : vector<8xf32>
    %89 = vector.multi_reduction <maximumf>, %88, %cst_32 [1] : vector<8x8xf32> to vector<8xf32>
    %90 = vector.shape_cast %89 : vector<8xf32> to vector<8x1xf32>
    %91 = vector.broadcast %90 : vector<8x1xf32> to vector<8x8xf32>
    %92 = arith.subf %88, %91 : vector<8x8xf32>
    %93 = math.exp %92 : vector<8x8xf32>
    %cst_33 = arith.constant dense<0.000000e+00> : vector<8xf32>
    %94 = vector.multi_reduction <add>, %93, %cst_33 [1] : vector<8x8xf32> to vector<8xf32>
    %95 = vector.shape_cast %94 : vector<8xf32> to vector<8x1xf32>
    %96 = tpu.reciprocal %95 {approx = true} : vector<8x1xf32> -> vector<8x1xf32>
    %97 = vector.broadcast %96 : vector<8x1xf32> to vector<8x8xf32>
    %98 = arith.mulf %93, %97 : vector<8x8xf32>
    %cst_34 = arith.constant dense<0.000000e+00> : vector<8x8xf32>
    %99 = tpu.matmul %98, %87, %cst_34 {dimension_numbers = #tpu.dot_dimension_numbers<[1], [0], [0], [1], [0, 0, 1, 1], [], []>} : vector<8x8xf32>, vector<8x8xf32>, vector<8x8xf32> -> vector<8x8xf32>
    %100 = tpu.concatenate %54, %69, %84, %99 in 1 : vector<8x8xf32>, vector<8x8xf32>, vector<8x8xf32>, vector<8x8xf32> -> vector<8x32xf32>
    %101 = arith.index_cast %37 : i32 to index
    %c0_35 = arith.constant 0 : index
    %102 = vector.load %arg18[%101, %c0_35] : memref<16x32xf32, #tpu.memory_space<vmem>>, vector<8x32xf32>
    tpu.vector_store %arg18[%101, %c0_35], %100 {strides = array<i32>} : memref<16x32xf32, #tpu.memory_space<vmem>>, vector<8x32xf32>,
    %c1_i32 = arith.constant 1 : i32
    %c8_i32_36 = arith.constant 8 : i32
    %103 = arith.muli %c1_i32, %c8_i32_36 : i32
    %104 = tpu.assume_multiple %103, 8 : i32
    %105 = arith.index_cast %104 : i32 to index
    %c0_37 = arith.constant 0 : index
    %106 = vector.load %arg17[%105, %c0_37] : memref<16x96xf32, #tpu.memory_space<vmem>>, vector<8x96xf32>
    %107 = vector.extract_strided_slice %106 {offsets = [0, 0], sizes = [8, 8], strides = [1, 1]} : vector<8x96xf32> to vector<8x8xf32>
    %108 = vector.extract_strided_slice %106 {offsets = [0, 32], sizes = [8, 8], strides = [1, 1]} : vector<8x96xf32> to vector<8x8xf32>
    %109 = vector.extract_strided_slice %106 {offsets = [0, 64], sizes = [8, 8], strides = [1, 1]} : vector<8x96xf32> to vector<8x8xf32>
    %cst_38 = arith.constant dense<0.000000e+00> : vector<8x8xf32>
    %110 = tpu.matmul %107, %108, %cst_38 {dimension_numbers = #tpu.dot_dimension_numbers<[1], [1], [0], [0], [0, 0, 1, 0], [], []>} : vector<8x8xf32>, vector<8x8xf32>, vector<8x8xf32> -> vector<8x8xf32>
    %cst_39 = arith.constant dense<0xFF800000> : vector<8xf32>
    %111 = vector.multi_reduction <maximumf>, %110, %cst_39 [1] : vector<8x8xf32> to vector<8xf32>
    %112 = vector.shape_cast %111 : vector<8xf32> to vector<8x1xf32>
    %113 = vector.broadcast %112 : vector<8x1xf32> to vector<8x8xf32>
    %114 = arith.subf %110, %113 : vector<8x8xf32>
    %115 = math.exp %114 : vector<8x8xf32>
    %cst_40 = arith.constant dense<0.000000e+00> : vector<8xf32>
    %116 = vector.multi_reduction <add>, %115, %cst_40 [1] : vector<8x8xf32> to vector<8xf32>
    %117 = vector.shape_cast %116 : vector<8xf32> to vector<8x1xf32>
    %118 = tpu.reciprocal %117 {approx = true} : vector<8x1xf32> -> vector<8x1xf32>
    %119 = vector.broadcast %118 : vector<8x1xf32> to vector<8x8xf32>
    %120 = arith.mulf %115, %119 : vector<8x8xf32>
    %cst_41 = arith.constant dense<0.000000e+00> : vector<8x8xf32>
    %121 = tpu.matmul %120, %109, %cst_41 {dimension_numbers = #tpu.dot_dimension_numbers<[1], [0], [0], [1], [0, 0, 1, 1], [], []>} : vector<8x8xf32>, vector<8x8xf32>, vector<8x8xf32> -> vector<8x8xf32>
    %122 = vector.extract_strided_slice %106 {offsets = [0, 8], sizes = [8, 8], strides = [1, 1]} : vector<8x96xf32> to vector<8x8xf32>
    %123 = vector.extract_strided_slice %106 {offsets = [0, 40], sizes = [8, 8], strides = [1, 1]} : vector<8x96xf32> to vector<8x8xf32>
    %124 = vector.extract_strided_slice %106 {offsets = [0, 72], sizes = [8, 8], strides = [1, 1]} : vector<8x96xf32> to vector<8x8xf32>
    %cst_42 = arith.constant dense<0.000000e+00> : vector<8x8xf32>
    %125 = tpu.matmul %122, %123, %cst_42 {dimension_numbers = #tpu.dot_dimension_numbers<[1], [1], [0], [0], [0, 0, 1, 0], [], []>} : vector<8x8xf32>, vector<8x8xf32>, vector<8x8xf32> -> vector<8x8xf32>
    %cst_43 = arith.constant dense<0xFF800000> : vector<8xf32>
    %126 = vector.multi_reduction <maximumf>, %125, %cst_43 [1] : vector<8x8xf32> to vector<8xf32>
    %127 = vector.shape_cast %126 : vector<8xf32> to vector<8x1xf32>
    %128 = vector.broadcast %127 : vector<8x1xf32> to vector<8x8xf32>
    %129 = arith.subf %125, %128 : vector<8x8xf32>
    %130 = math.exp %129 : vector<8x8xf32>
    %cst_44 = arith.constant dense<0.000000e+00> : vector<8xf32>
    %131 = vector.multi_reduction <add>, %130, %cst_44 [1] : vector<8x8xf32> to vector<8xf32>
    %132 = vector.shape_cast %131 : vector<8xf32> to vector<8x1xf32>
    %133 = tpu.reciprocal %132 {approx = true} : vector<8x1xf32> -> vector<8x1xf32>
    %134 = vector.broadcast %133 : vector<8x1xf32> to vector<8x8xf32>
    %135 = arith.mulf %130, %134 : vector<8x8xf32>
    %cst_45 = arith.constant dense<0.000000e+00> : vector<8x8xf32>
    %136 = tpu.matmul %135, %124, %cst_45 {dimension_numbers = #tpu.dot_dimension_numbers<[1], [0], [0], [1], [0, 0, 1, 1], [], []>} : vector<8x8xf32>, vector<8x8xf32>, vector<8x8xf32> -> vector<8x8xf32>
    %137 = vector.extract_strided_slice %106 {offsets = [0, 16], sizes = [8, 8], strides = [1, 1]} : vector<8x96xf32> to vector<8x8xf32>
    %138 = vector.extract_strided_slice %106 {offsets = [0, 48], sizes = [8, 8], strides = [1, 1]} : vector<8x96xf32> to vector<8x8xf32>
    %139 = vector.extract_strided_slice %106 {offsets = [0, 80], sizes = [8, 8], strides = [1, 1]} : vector<8x96xf32> to vector<8x8xf32>
    %cst_46 = arith.constant dense<0.000000e+00> : vector<8x8xf32>
    %140 = tpu.matmul %137, %138, %cst_46 {dimension_numbers = #tpu.dot_dimension_numbers<[1], [1], [0], [0], [0, 0, 1, 0], [], []>} : vector<8x8xf32>, vector<8x8xf32>, vector<8x8xf32> -> vector<8x8xf32>
    %cst_47 = arith.constant dense<0xFF800000> : vector<8xf32>
    %141 = vector.multi_reduction <maximumf>, %140, %cst_47 [1] : vector<8x8xf32> to vector<8xf32>
    %142 = vector.shape_cast %141 : vector<8xf32> to vector<8x1xf32>
    %143 = vector.broadcast %142 : vector<8x1xf32> to vector<8x8xf32>
    %144 = arith.subf %140, %143 : vector<8x8xf32>
    %145 = math.exp %144 : vector<8x8xf32>
    %cst_48 = arith.constant dense<0.000000e+00> : vector<8xf32>
    %146 = vector.multi_reduction <add>, %145, %cst_48 [1] : vector<8x8xf32> to vector<8xf32>
    %147 = vector.shape_cast %146 : vector<8xf32> to vector<8x1xf32>
    %148 = tpu.reciprocal %147 {approx = true} : vector<8x1xf32> -> vector<8x1xf32>
    %149 = vector.broadcast %148 : vector<8x1xf32> to vector<8x8xf32>
    %150 = arith.mulf %145, %149 : vector<8x8xf32>
    %cst_49 = arith.constant dense<0.000000e+00> : vector<8x8xf32>
    %151 = tpu.matmul %150, %139, %cst_49 {dimension_numbers = #tpu.dot_dimension_numbers<[1], [0], [0], [1], [0, 0, 1, 1], [], []>} : vector<8x8xf32>, vector<8x8xf32>, vector<8x8xf32> -> vector<8x8xf32>
    %152 = vector.extract_strided_slice %106 {offsets = [0, 24], sizes = [8, 8], strides = [1, 1]} : vector<8x96xf32> to vector<8x8xf32>
    %153 = vector.extract_strided_slice %106 {offsets = [0, 56], sizes = [8, 8], strides = [1, 1]} : vector<8x96xf32> to vector<8x8xf32>
    %154 = vector.extract_strided_slice %106 {offsets = [0, 88], sizes = [8, 8], strides = [1, 1]} : vector<8x96xf32> to vector<8x8xf32>
    %cst_50 = arith.constant dense<0.000000e+00> : vector<8x8xf32>
    %155 = tpu.matmul %152, %153, %cst_50 {dimension_numbers = #tpu.dot_dimension_numbers<[1], [1], [0], [0], [0, 0, 1, 0], [], []>} : vector<8x8xf32>, vector<8x8xf32>, vector<8x8xf32> -> vector<8x8xf32>
    %cst_51 = arith.constant dense<0xFF800000> : vector<8xf32>
    %156 = vector.multi_reduction <maximumf>, %155, %cst_51 [1] : vector<8x8xf32> to vector<8xf32>
    %157 = vector.shape_cast %156 : vector<8xf32> to vector<8x1xf32>
    %158 = vector.broadcast %157 : vector<8x1xf32> to vector<8x8xf32>
    %159 = arith.subf %155, %158 : vector<8x8xf32>
    %160 = math.exp %159 : vector<8x8xf32>
    %cst_52 = arith.constant dense<0.000000e+00> : vector<8xf32>
    %161 = vector.multi_reduction <add>, %160, %cst_52 [1] : vector<8x8xf32> to vector<8xf32>
    %162 = vector.shape_cast %161 : vector<8xf32> to vector<8x1xf32>
    %163 = tpu.reciprocal %162 {approx = true} : vector<8x1xf32> -> vector<8x1xf32>
    %164 = vector.broadcast %163 : vector<8x1xf32> to vector<8x8xf32>
    %165 = arith.mulf %160, %164 : vector<8x8xf32>
    %cst_53 = arith.constant dense<0.000000e+00> : vector<8x8xf32>
    %166 = tpu.matmul %165, %154, %cst_53 {dimension_numbers = #tpu.dot_dimension_numbers<[1], [0], [0], [1], [0, 0, 1, 1], [], []>} : vector<8x8xf32>, vector<8x8xf32>, vector<8x8xf32> -> vector<8x8xf32>
    %167 = tpu.concatenate %121, %136, %151, %166 in 1 : vector<8x8xf32>, vector<8x8xf32>, vector<8x8xf32>, vector<8x8xf32> -> vector<8x32xf32>
    %168 = arith.index_cast %104 : i32 to index
    %c0_54 = arith.constant 0 : index
    %169 = vector.load %arg18[%168, %c0_54] : memref<16x32xf32, #tpu.memory_space<vmem>>, vector<8x32xf32>
    tpu.vector_store %arg18[%168, %c0_54], %167 {strides = array<i32>} : memref<16x32xf32, #tpu.memory_space<vmem>>, vector<8x32xf32>,
    %c2_i32 = arith.constant 2 : i32
    %c0_55 = arith.constant 0 : index
    %c0_56 = arith.constant 0 : index
    %170 = vector.load %arg18[%c0_55, %c0_56] : memref<16x32xf32, #tpu.memory_space<vmem>>, vector<16x32xf32>
    %c0_57 = arith.constant 0 : index
    %c0_58 = arith.constant 0 : index
    %171 = vector.load %arg6[%c0_57, %c0_58] : memref<32x32xf32, #tpu.memory_space<vmem>>, vector<32x32xf32>
    %cst_59 = arith.constant dense<0.000000e+00> : vector<16x32xf32>
    %172 = tpu.matmul %170, %171, %cst_59 {dimension_numbers = #tpu.dot_dimension_numbers<[1], [0], [0], [1], [0, 0, 1, 1], [], []>} : vector<16x32xf32>, vector<32x32xf32>, vector<16x32xf32> -> vector<16x32xf32>
    %c0_60 = arith.constant 0 : index
    %c0_61 = arith.constant 0 : index
    %173 = vector.load %arg7[%c0_60, %c0_61] : memref<1x32xf32, #tpu.memory_space<vmem>>, vector<1x32xf32>
    %174 = vector.broadcast %173 : vector<1x32xf32> to vector<16x32xf32>
    %175 = arith.addf %172, %174 : vector<16x32xf32>
    %176 = arith.addf %0, %175 : vector<16x32xf32>
    %c0_62 = arith.constant 0 : index
    %c0_63 = arith.constant 0 : index
    %177 = vector.load %arg8[%c0_62, %c0_63] : memref<1x32xf32, #tpu.memory_space<vmem>>, vector<1x32xf32>
    %c0_64 = arith.constant 0 : index
    %c0_65 = arith.constant 0 : index
    %178 = vector.load %arg9[%c0_64, %c0_65] : memref<1x32xf32, #tpu.memory_space<vmem>>, vector<1x32xf32>
    %cst_66 = arith.constant dense<0.000000e+00> : vector<16xf32>
    %179 = vector.multi_reduction <add>, %176, %cst_66 [1] : vector<16x32xf32> to vector<16xf32>
    %180 = vector.shape_cast %179 : vector<16xf32> to vector<16x1xf32>
    %cst_67 = arith.constant 3.200000e+01 : f32
    %181 = vector.broadcast %cst_67 : f32 to vector<16x1xf32>
    %182 = arith.divf %180, %181 : vector<16x1xf32>
    %183 = vector.broadcast %182 : vector<16x1xf32> to vector<16x32xf32>
    %184 = arith.subf %176, %183 : vector<16x32xf32>
    %185 = arith.mulf %184, %184 : vector<16x32xf32>
    %cst_68 = arith.constant dense<0.000000e+00> : vector<16xf32>
    %186 = vector.multi_reduction <add>, %185, %cst_68 [1] : vector<16x32xf32> to vector<16xf32>
    %187 = vector.shape_cast %186 : vector<16xf32> to vector<16x1xf32>
    %cst_69 = arith.constant 3.200000e+01 : f32
    %188 = vector.broadcast %cst_69 : f32 to vector<16x1xf32>
    %189 = arith.divf %187, %188 : vector<16x1xf32>
    %190 = vector.broadcast %182 : vector<16x1xf32> to vector<16x32xf32>
    %191 = arith.subf %176, %190 : vector<16x32xf32>
    %cst_70 = arith.constant 9.99999974E-6 : f32
    %192 = vector.broadcast %cst_70 : f32 to vector<16x1xf32>
    %193 = arith.addf %189, %192 : vector<16x1xf32>
    %194 = math.rsqrt %193 : vector<16x1xf32>
    %195 = vector.broadcast %194 : vector<16x1xf32> to vector<16x32xf32>
    %196 = arith.mulf %191, %195 : vector<16x32xf32>
    %197 = vector.broadcast %177 : vector<1x32xf32> to vector<16x32xf32>
    %198 = arith.mulf %196, %197 : vector<16x32xf32>
    %199 = vector.broadcast %178 : vector<1x32xf32> to vector<16x32xf32>
    %200 = arith.addf %198, %199 : vector<16x32xf32>
    %c0_71 = arith.constant 0 : index
    %c0_72 = arith.constant 0 : index
    %201 = vector.load %arg10[%c0_71, %c0_72] : memref<32x88xf32, #tpu.memory_space<vmem>>, vector<32x88xf32>
    %cst_73 = arith.constant dense<0.000000e+00> : vector<16x88xf32>
    %202 = tpu.matmul %200, %201, %cst_73 {dimension_numbers = #tpu.dot_dimension_numbers<[1], [0], [0], [1], [0, 0, 1, 1], [], []>} : vector<16x32xf32>, vector<32x88xf32>, vector<16x88xf32> -> vector<16x88xf32>
    %c0_74 = arith.constant 0 : index
    %c0_75 = arith.constant 0 : index
    %203 = vector.load %arg11[%c0_74, %c0_75] : memref<1x88xf32, #tpu.memory_space<vmem>>, vector<1x88xf32>
    %204 = vector.broadcast %203 : vector<1x88xf32> to vector<16x88xf32>
    %205 = arith.addf %202, %204 : vector<16x88xf32>
    %c0_76 = arith.constant 0 : index
    %c0_77 = arith.constant 0 : index
    %206 = vector.load %arg12[%c0_76, %c0_77] : memref<32x88xf32, #tpu.memory_space<vmem>>, vector<32x88xf32>
    %cst_78 = arith.constant dense<0.000000e+00> : vector<16x88xf32>
    %207 = tpu.matmul %200, %206, %cst_78 {dimension_numbers = #tpu.dot_dimension_numbers<[1], [0], [0], [1], [0, 0, 1, 1], [], []>} : vector<16x32xf32>, vector<32x88xf32>, vector<16x88xf32> -> vector<16x88xf32>
    %c0_79 = arith.constant 0 : index
    %c0_80 = arith.constant 0 : index
    %208 = vector.load %arg13[%c0_79, %c0_80] : memref<1x88xf32, #tpu.memory_space<vmem>>, vector<1x88xf32>
    %209 = vector.broadcast %208 : vector<1x88xf32> to vector<16x88xf32>
    %210 = arith.addf %207, %209 : vector<16x88xf32>
    %cst_81 = arith.constant 0.000000e+00 : f32
    %211 = vector.broadcast %cst_81 : f32 to vector<16x88xf32>
    %212 = arith.subf %211, %205 : vector<16x88xf32>
    %213 = math.exp %212 : vector<16x88xf32>
    %cst_82 = arith.constant 1.000000e+00 : f32
    %214 = vector.broadcast %cst_82 : f32 to vector<16x88xf32>
    %215 = arith.addf %214, %213 : vector<16x88xf32>
    %216 = tpu.reciprocal %215 {approx = true} : vector<16x88xf32> -> vector<16x88xf32>
    %217 = arith.mulf %205, %216 : vector<16x88xf32>
    %218 = arith.mulf %217, %210 : vector<16x88xf32>
    %c0_83 = arith.constant 0 : index
    %c0_84 = arith.constant 0 : index
    %219 = vector.load %arg14[%c0_83, %c0_84] : memref<88x32xf32, #tpu.memory_space<vmem>>, vector<88x32xf32>
    %cst_85 = arith.constant dense<0.000000e+00> : vector<16x32xf32>
    %220 = tpu.matmul %218, %219, %cst_85 {dimension_numbers = #tpu.dot_dimension_numbers<[1], [0], [0], [1], [0, 0, 1, 1], [], []>} : vector<16x88xf32>, vector<88x32xf32>, vector<16x32xf32> -> vector<16x32xf32>
    %c0_86 = arith.constant 0 : index
    %c0_87 = arith.constant 0 : index
    %221 = vector.load %arg15[%c0_86, %c0_87] : memref<1x32xf32, #tpu.memory_space<vmem>>, vector<1x32xf32>
    %222 = vector.broadcast %221 : vector<1x32xf32> to vector<16x32xf32>
    %223 = arith.addf %220, %222 : vector<16x32xf32>
    %224 = arith.addf %176, %223 : vector<16x32xf32>
    %c0_88 = arith.constant 0 : index
    %c0_89 = arith.constant 0 : index
    %225 = vector.load %arg16[%c0_88, %c0_89] : memref<16x32xf32, #tpu.memory_space<vmem>>, vector<16x32xf32>
    tpu.vector_store %arg16[%c0_88, %c0_89], %224 {strides = array<i32>} : memref<16x32xf32, #tpu.memory_space<vmem>>, vector<16x32xf32>,
    return
  }
  func.func @transform_0(%arg0: i32) -> (i32, i32) {
    %c0_i32 = arith.constant 0 : i32
    %c0_i32_0 = arith.constant 0 : i32
    return %arg0, %c0_i32 : i32, i32
  }
  func.func @transform_1(%arg0: i32) -> (i32, i32) {
    %c0_i32 = arith.constant 0 : i32
    %c0_i32_0 = arith.constant 0 : i32
    %c0_i32_1 = arith.constant 0 : i32
    return %c0_i32, %c0_i32_0 : i32, i32
  }
  func.func @transform_2(%arg0: i32) -> (i32, i32) {
    %c0_i32 = arith.constant 0 : i32
    %c0_i32_0 = arith.constant 0 : i32
    %c0_i32_1 = arith.constant 0 : i32
    return %c0_i32, %c0_i32_0 : i32, i32
  }
  func.func @transform_3(%arg0: i32) -> (i32, i32) {
    %c0_i32 = arith.constant 0 : i32
    %c0_i32_0 = arith.constant 0 : i32
    %c0_i32_1 = arith.constant 0 : i32
    return %c0_i32, %c0_i32_0 : i32, i32
  }
  func.func @transform_4(%arg0: i32) -> (i32, i32) {
    %c0_i32 = arith.constant 0 : i32
    %c0_i32_0 = arith.constant 0 : i32
    %c0_i32_1 = arith.constant 0 : i32
    return %c0_i32, %c0_i32_0 : i32, i32
  }
  func.func @transform_5(%arg0: i32) -> (i32, i32) {
    %c0_i32 = arith.constant 0 : i32
    %c0_i32_0 = arith.constant 0 : i32
    %c0_i32_1 = arith.constant 0 : i32
    return %c0_i32, %c0_i32_0 : i32, i32
  }
  func.func @transform_6(%arg0: i32) -> (i32, i32) {
    %c0_i32 = arith.constant 0 : i32
    %c0_i32_0 = arith.constant 0 : i32
    %c0_i32_1 = arith.constant 0 : i32
    return %c0_i32, %c0_i32_0 : i32, i32
  }
  func.func @transform_7(%arg0: i32) -> (i32, i32) {
    %c0_i32 = arith.constant 0 : i32
    %c0_i32_0 = arith.constant 0 : i32
    %c0_i32_1 = arith.constant 0 : i32
    return %c0_i32, %c0_i32_0 : i32, i32
  }
  func.func @transform_8(%arg0: i32) -> (i32, i32) {
    %c0_i32 = arith.constant 0 : i32
    %c0_i32_0 = arith.constant 0 : i32
    %c0_i32_1 = arith.constant 0 : i32
    return %c0_i32, %c0_i32_0 : i32, i32
  }
  func.func @transform_9(%arg0: i32) -> (i32, i32) {
    %c0_i32 = arith.constant 0 : i32
    %c0_i32_0 = arith.constant 0 : i32
    %c0_i32_1 = arith.constant 0 : i32
    return %c0_i32, %c0_i32_0 : i32, i32
  }
  func.func @transform_10(%arg0: i32) -> (i32, i32) {
    %c0_i32 = arith.constant 0 : i32
    %c0_i32_0 = arith.constant 0 : i32
    %c0_i32_1 = arith.constant 0 : i32
    return %c0_i32, %c0_i32_0 : i32, i32
  }
  func.func @transform_11(%arg0: i32) -> (i32, i32) {
    %c0_i32 = arith.constant 0 : i32
    %c0_i32_0 = arith.constant 0 : i32
    %c0_i32_1 = arith.constant 0 : i32
    return %c0_i32, %c0_i32_0 : i32, i32
  }
  func.func @transform_12(%arg0: i32) -> (i32, i32) {
    %c0_i32 = arith.constant 0 : i32
    %c0_i32_0 = arith.constant 0 : i32
    %c0_i32_1 = arith.constant 0 : i32
    return %c0_i32, %c0_i32_0 : i32, i32
  }
  func.func @transform_13(%arg0: i32) -> (i32, i32) {
    %c0_i32 = arith.constant 0 : i32
    %c0_i32_0 = arith.constant 0 : i32
    %c0_i32_1 = arith.constant 0 : i32
    return %c0_i32, %c0_i32_0 : i32, i32
  }
  func.func @transform_14(%arg0: i32) -> (i32, i32) {
    %c0_i32 = arith.constant 0 : i32
    %c0_i32_0 = arith.constant 0 : i32
    %c0_i32_1 = arith.constant 0 : i32
    return %c0_i32, %c0_i32_0 : i32, i32
  }
  func.func @transform_15(%arg0: i32) -> (i32, i32) {
    %c0_i32 = arith.constant 0 : i32
    %c0_i32_0 = arith.constant 0 : i32
    return %arg0, %c0_i32 : i32, i32
  }
}

module attributes {stable_mosaic.version = 11 : i64} {
  func.func @block_kernel(%arg0: i32, %arg1: memref<16x32xf32, #tpu.memory_space<vmem>>, %arg2: memref<1x32xf32, #tpu.memory_space<vmem>>, %arg3: memref<1x32xf32, #tpu.memory_space<vmem>>, %arg4: memref<32x96xf32, #tpu.memory_space<vmem>>, %arg5: memref<1x96xf32, #tpu.memory_space<vmem>>, %arg6: memref<32x32xf32, #tpu.memory_space<vmem>>, %arg7: memref<1x32xf32, #tpu.memory_space<vmem>>, %arg8: memref<1x32xf32, #tpu.memory_space<vmem>>, %arg9: memref<1x32xf32, #tpu.memory_space<vmem>>, %arg10: memref<32x88xf32, #tpu.memory_space<vmem>>, %arg11: memref<1x88xf32, #tpu.memory_space<vmem>>, %arg12: memref<32x88xf32, #tpu.memory_space<vmem>>, %arg13: memref<1x88xf32, #tpu.memory_space<vmem>>, %arg14: memref<88x32xf32, #tpu.memory_space<vmem>>, %arg15: memref<1x32xf32, #tpu.memory_space<vmem>>, %arg16: memref<16x32xf32, #tpu.memory_space<vmem>>, %arg17: memref<16x96xf32, #tpu.memory_space<vmem>>, %arg18: memref<16x32xf32, #tpu.memory_space<vmem>>) attributes {dimension_semantics = [#tpu.dimension_semantics<parallel>], iteration_bounds = array<i64: 2>, scalar_prefetch = 0 : i64, scratch_operands = 2 : i64, tpu.core_type = #tpu.core_type<tc>, window_params = [{transform_indices = @transform_0, window_bounds = array<i64: 16, 32>}, {pipeline_mode = #tpu.pipeline_mode<synchronous>, transform_indices = @transform_1, window_bounds = array<i64: 1, 32>}, {pipeline_mode = #tpu.pipeline_mode<synchronous>, transform_indices = @transform_2, window_bounds = array<i64: 1, 32>}, {pipeline_mode = #tpu.pipeline_mode<synchronous>, transform_indices = @transform_3, window_bounds = array<i64: 32, 96>}, {pipeline_mode = #tpu.pipeline_mode<synchronous>, transform_indices = @transform_4, window_bounds = array<i64: 1, 96>}, {pipeline_mode = #tpu.pipeline_mode<synchronous>, transform_indices = @transform_5, window_bounds = array<i64: 32, 32>}, {pipeline_mode = #tpu.pipeline_mode<synchronous>, transform_indices = @transform_6, window_bounds = array<i64: 1, 32>}, {pipeline_mode = #tpu.pipeline_mode<synchronous>, transform_indices = @transform_7, window_bounds = array<i64: 1, 32>}, {pipeline_mode = #tpu.pipeline_mode<synchronous>, transform_indices = @transform_8, window_bounds = array<i64: 1, 32>}, {pipeline_mode = #tpu.pipeline_mode<synchronous>, transform_indices = @transform_9, window_bounds = array<i64: 32, 88>}, {pipeline_mode = #tpu.pipeline_mode<synchronous>, transform_indices = @transform_10, window_bounds = array<i64: 1, 88>}, {pipeline_mode = #tpu.pipeline_mode<synchronous>, transform_indices = @transform_11, window_bounds = array<i64: 32, 88>}, {pipeline_mode = #tpu.pipeline_mode<synchronous>, transform_indices = @transform_12, window_bounds = array<i64: 1, 88>}, {pipeline_mode = #tpu.pipeline_mode<synchronous>, transform_indices = @transform_13, window_bounds = array<i64: 88, 32>}, {pipeline_mode = #tpu.pipeline_mode<synchronous>, transform_indices = @transform_14, window_bounds = array<i64: 1, 32>}, {transform_indices = @transform_15, window_bounds = array<i64: 16, 32>}]} {
    %c0 = arith.constant 0 : index
    %c0_0 = arith.constant 0 : index
    %0 = vector.load %arg1[%c0, %c0_0] : memref<16x32xf32, #tpu.memory_space<vmem>>, vector<16x32xf32>
    %c0_1 = arith.constant 0 : index
    %c0_2 = arith.constant 0 : index
    %1 = vector.load %arg2[%c0_1, %c0_2] : memref<1x32xf32, #tpu.memory_space<vmem>>, vector<1x32xf32>
    %c0_3 = arith.constant 0 : index
    %c0_4 = arith.constant 0 : index
    %2 = vector.load %arg3[%c0_3, %c0_4] : memref<1x32xf32, #tpu.memory_space<vmem>>, vector<1x32xf32>
    %cst = arith.constant dense<0.000000e+00> : vector<16xf32>
    %3 = vector.multi_reduction <add>, %0, %cst [1] : vector<16x32xf32> to vector<16xf32>
    %4 = vector.shape_cast %3 : vector<16xf32> to vector<16x1xf32>
    %cst_5 = arith.constant 3.200000e+01 : f32
    %5 = vector.broadcast %cst_5 : f32 to vector<16x1xf32>
    %6 = arith.divf %4, %5 : vector<16x1xf32>
    %7 = vector.broadcast %6 : vector<16x1xf32> to vector<16x32xf32>
    %8 = arith.subf %0, %7 : vector<16x32xf32>
    %9 = arith.mulf %8, %8 : vector<16x32xf32>
    %cst_6 = arith.constant dense<0.000000e+00> : vector<16xf32>
    %10 = vector.multi_reduction <add>, %9, %cst_6 [1] : vector<16x32xf32> to vector<16xf32>
    %11 = vector.shape_cast %10 : vector<16xf32> to vector<16x1xf32>
    %cst_7 = arith.constant 3.200000e+01 : f32
    %12 = vector.broadcast %cst_7 : f32 to vector<16x1xf32>
    %13 = arith.divf %11, %12 : vector<16x1xf32>
    %14 = vector.broadcast %6 : vector<16x1xf32> to vector<16x32xf32>
    %15 = arith.subf %0, %14 : vector<16x32xf32>
    %cst_8 = arith.constant 9.99999974E-6 : f32
    %16 = vector.broadcast %cst_8 : f32 to vector<16x1xf32>
    %17 = arith.addf %13, %16 : vector<16x1xf32>
    %18 = math.rsqrt %17 : vector<16x1xf32>
    %19 = vector.broadcast %18 : vector<16x1xf32> to vector<16x32xf32>
    %20 = arith.mulf %15, %19 : vector<16x32xf32>
    %21 = vector.broadcast %1 : vector<1x32xf32> to vector<16x32xf32>
    %22 = arith.mulf %20, %21 : vector<16x32xf32>
    %23 = vector.broadcast %2 : vector<1x32xf32> to vector<16x32xf32>
    %24 = arith.addf %22, %23 : vector<16x32xf32>
    %c0_9 = arith.constant 0 : index
    %c0_10 = arith.constant 0 : index
    %25 = vector.load %arg4[%c0_9, %c0_10] : memref<32x96xf32, #tpu.memory_space<vmem>>, vector<32x96xf32>
    %cst_11 = arith.constant dense<0.000000e+00> : vector<16x96xf32>
    %26 = tpu.matmul %24, %25, %cst_11 {dimension_numbers = #tpu.dot_dimension_numbers<[1], [0], [0], [1], [0, 0, 1, 1], [], []>} : vector<16x32xf32>, vector<32x96xf32>, vector<16x96xf32> -> vector<16x96xf32>
    %c0_12 = arith.constant 0 : index
    %c0_13 = arith.constant 0 : index
    %27 = vector.load %arg5[%c0_12, %c0_13] : memref<1x96xf32, #tpu.memory_space<vmem>>, vector<1x96xf32>
    %28 = vector.broadcast %27 : vector<1x96xf32> to vector<16x96xf32>
    %29 = arith.addf %26, %28 : vector<16x96xf32>
    %30 = vector.extract_strided_slice %29 {offsets = [0, 0], sizes = [16, 32], strides = [1, 1]} : vector<16x96xf32> to vector<16x32xf32>
    %cst_14 = arith.constant 0.353553385 : f32
    %31 = vector.broadcast %cst_14 : f32 to vector<16x32xf32>
    %32 = arith.mulf %30, %31 : vector<16x32xf32>
    %c0_15 = arith.constant 0 : index
    %c0_16 = arith.constant 0 : index
    %33 = vector.load %arg17[%c0_15, %c0_16] : memref<16x96xf32, #tpu.memory_space<vmem>>, vector<16x32xf32>
    tpu.vector_store %arg17[%c0_15, %c0_16], %32 {strides = array<i32>} : memref<16x96xf32, #tpu.memory_space<vmem>>, vector<16x32xf32>,
    %34 = vector.extract_strided_slice %29 {offsets = [0, 32], sizes = [16, 64], strides = [1, 1]} : vector<16x96xf32> to vector<16x64xf32>
    %c0_17 = arith.constant 0 : index
    %c32 = arith.constant 32 : index
    %35 = vector.load %arg17[%c0_17, %c32] : memref<16x96xf32, #tpu.memory_space<vmem>>, vector<16x64xf32>
    tpu.vector_store %arg17[%c0_17, %c32], %34 {strides = array<i32>} : memref<16x96xf32, #tpu.memory_space<vmem>>, vector<16x64xf32>,
    %c0_i32 = arith.constant 0 : i32
    %c8_i32 = arith.constant 8 : i32
    %36 = arith.muli %c0_i32, %c8_i32 : i32
    %37 = tpu.assume_multiple %36, 8 : i32
    %38 = arith.index_cast %37 : i32 to index
    %c0_18 = arith.constant 0 : index
    %39 = vector.load %arg17[%38, %c0_18] : memref<16x96xf32, #tpu.memory_space<vmem>>, vector<8x96xf32>
    %40 = vector.extract_strided_slice %39 {offsets = [0, 0], sizes = [8, 8], strides = [1, 1]} : vector<8x96xf32> to vector<8x8xf32>
    %41 = vector.extract_strided_slice %39 {offsets = [0, 32], sizes = [8, 8], strides = [1, 1]} : vector<8x96xf32> to vector<8x8xf32>
    %42 = vector.extract_strided_slice %39 {offsets = [0, 64], sizes = [8, 8], strides = [1, 1]} : vector<8x96xf32> to vector<8x8xf32>
    %cst_19 = arith.constant dense<0.000000e+00> : vector<8x8xf32>
    %43 = tpu.matmul %40, %41, %cst_19 {dimension_numbers = #tpu.dot_dimension_numbers<[1], [1], [0], [0], [0, 0, 1, 0], [], []>} : vector<8x8xf32>, vector<8x8xf32>, vector<8x8xf32> -> vector<8x8xf32>
    %cst_20 = arith.constant dense<0xFF800000> : vector<8xf32>
    %44 = vector.multi_reduction <maximumf>, %43, %cst_20 [1] : vector<8x8xf32> to vector<8xf32>
    %45 = vector.shape_cast %44 : vector<8xf32> to vector<8x1xf32>
    %46 = vector.broadcast %45 : vector<8x1xf32> to vector<8x8xf32>
    %47 = arith.subf %43, %46 : vector<8x8xf32>
    %48 = math.exp %47 : vector<8x8xf32>
    %cst_21 = arith.constant dense<0.000000e+00> : vector<8xf32>
    %49 = vector.multi_reduction <add>, %48, %cst_21 [1] : vector<8x8xf32> to vector<8xf32>
    %50 = vector.shape_cast %49 : vector<8xf32> to vector<8x1xf32>
    %51 = tpu.reciprocal %50 {approx = true} : vector<8x1xf32> -> vector<8x1xf32>
    %52 = vector.broadcast %51 : vector<8x1xf32> to vector<8x8xf32>
    %53 = arith.mulf %48, %52 : vector<8x8xf32>
    %cst_22 = arith.constant dense<0.000000e+00> : vector<8x8xf32>
    %54 = tpu.matmul %53, %42, %cst_22 {dimension_numbers = #tpu.dot_dimension_numbers<[1], [0], [0], [1], [0, 0, 1, 1], [], []>} : vector<8x8xf32>, vector<8x8xf32>, vector<8x8xf32> -> vector<8x8xf32>
    %55 = vector.extract_strided_slice %39 {offsets = [0, 8], sizes = [8, 8], strides = [1, 1]} : vector<8x96xf32> to vector<8x8xf32>
    %56 = vector.extract_strided_slice %39 {offsets = [0, 40], sizes = [8, 8], strides = [1, 1]} : vector<8x96xf32> to vector<8x8xf32>
    %57 = vector.extract_strided_slice %39 {offsets = [0, 72], sizes = [8, 8], strides = [1, 1]} : vector<8x96xf32> to vector<8x8xf32>
    %cst_23 = arith.constant dense<0.000000e+00> : vector<8x8xf32>
    %58 = tpu.matmul %55, %56, %cst_23 {dimension_numbers = #tpu.dot_dimension_numbers<[1], [1], [0], [0], [0, 0, 1, 0], [], []>} : vector<8x8xf32>, vector<8x8xf32>, vector<8x8xf32> -> vector<8x8xf32>
    %cst_24 = arith.constant dense<0xFF800000> : vector<8xf32>
    %59 = vector.multi_reduction <maximumf>, %58, %cst_24 [1] : vector<8x8xf32> to vector<8xf32>
    %60 = vector.shape_cast %59 : vector<8xf32> to vector<8x1xf32>
    %61 = vector.broadcast %60 : vector<8x1xf32> to vector<8x8xf32>
    %62 = arith.subf %58, %61 : vector<8x8xf32>
    %63 = math.exp %62 : vector<8x8xf32>
    %cst_25 = arith.constant dense<0.000000e+00> : vector<8xf32>
    %64 = vector.multi_reduction <add>, %63, %cst_25 [1] : vector<8x8xf32> to vector<8xf32>
    %65 = vector.shape_cast %64 : vector<8xf32> to vector<8x1xf32>
    %66 = tpu.reciprocal %65 {approx = true} : vector<8x1xf32> -> vector<8x1xf32>
    %67 = vector.broadcast %66 : vector<8x1xf32> to vector<8x8xf32>
    %68 = arith.mulf %63, %67 : vector<8x8xf32>
    %cst_26 = arith.constant dense<0.000000e+00> : vector<8x8xf32>
    %69 = tpu.matmul %68, %57, %cst_26 {dimension_numbers = #tpu.dot_dimension_numbers<[1], [0], [0], [1], [0, 0, 1, 1], [], []>} : vector<8x8xf32>, vector<8x8xf32>, vector<8x8xf32> -> vector<8x8xf32>
    %70 = vector.extract_strided_slice %39 {offsets = [0, 16], sizes = [8, 8], strides = [1, 1]} : vector<8x96xf32> to vector<8x8xf32>
    %71 = vector.extract_strided_slice %39 {offsets = [0, 48], sizes = [8, 8], strides = [1, 1]} : vector<8x96xf32> to vector<8x8xf32>
    %72 = vector.extract_strided_slice %39 {offsets = [0, 80], sizes = [8, 8], strides = [1, 1]} : vector<8x96xf32> to vector<8x8xf32>
    %cst_27 = arith.constant dense<0.000000e+00> : vector<8x8xf32>
    %73 = tpu.matmul %70, %71, %cst_27 {dimension_numbers = #tpu.dot_dimension_numbers<[1], [1], [0], [0], [0, 0, 1, 0], [], []>} : vector<8x8xf32>, vector<8x8xf32>, vector<8x8xf32> -> vector<8x8xf32>
    %cst_28 = arith.constant dense<0xFF800000> : vector<8xf32>
    %74 = vector.multi_reduction <maximumf>, %73, %cst_28 [1] : vector<8x8xf32> to vector<8xf32>
    %75 = vector.shape_cast %74 : vector<8xf32> to vector<8x1xf32>
    %76 = vector.broadcast %75 : vector<8x1xf32> to vector<8x8xf32>
    %77 = arith.subf %73, %76 : vector<8x8xf32>
    %78 = math.exp %77 : vector<8x8xf32>
    %cst_29 = arith.constant dense<0.000000e+00> : vector<8xf32>
    %79 = vector.multi_reduction <add>, %78, %cst_29 [1] : vector<8x8xf32> to vector<8xf32>
    %80 = vector.shape_cast %79 : vector<8xf32> to vector<8x1xf32>
    %81 = tpu.reciprocal %80 {approx = true} : vector<8x1xf32> -> vector<8x1xf32>
    %82 = vector.broadcast %81 : vector<8x1xf32> to vector<8x8xf32>
    %83 = arith.mulf %78, %82 : vector<8x8xf32>
    %cst_30 = arith.constant dense<0.000000e+00> : vector<8x8xf32>
    %84 = tpu.matmul %83, %72, %cst_30 {dimension_numbers = #tpu.dot_dimension_numbers<[1], [0], [0], [1], [0, 0, 1, 1], [], []>} : vector<8x8xf32>, vector<8x8xf32>, vector<8x8xf32> -> vector<8x8xf32>
    %85 = vector.extract_strided_slice %39 {offsets = [0, 24], sizes = [8, 8], strides = [1, 1]} : vector<8x96xf32> to vector<8x8xf32>
    %86 = vector.extract_strided_slice %39 {offsets = [0, 56], sizes = [8, 8], strides = [1, 1]} : vector<8x96xf32> to vector<8x8xf32>
    %87 = vector.extract_strided_slice %39 {offsets = [0, 88], sizes = [8, 8], strides = [1, 1]} : vector<8x96xf32> to vector<8x8xf32>
    %cst_31 = arith.constant dense<0.000000e+00> : vector<8x8xf32>
    %88 = tpu.matmul %85, %86, %cst_31 {dimension_numbers = #tpu.dot_dimension_numbers<[1], [1], [0], [0], [0, 0, 1, 0], [], []>} : vector<8x8xf32>, vector<8x8xf32>, vector<8x8xf32> -> vector<8x8xf32>
    %cst_32 = arith.constant dense<0xFF800000> : vector<8xf32>
    %89 = vector.multi_reduction <maximumf>, %88, %cst_32 [1] : vector<8x8xf32> to vector<8xf32>
    %90 = vector.shape_cast %89 : vector<8xf32> to vector<8x1xf32>
    %91 = vector.broadcast %90 : vector<8x1xf32> to vector<8x8xf32>
    %92 = arith.subf %88, %91 : vector<8x8xf32>
    %93 = math.exp %92 : vector<8x8xf32>
    %cst_33 = arith.constant dense<0.000000e+00> : vector<8xf32>
    %94 = vector.multi_reduction <add>, %93, %cst_33 [1] : vector<8x8xf32> to vector<8xf32>
    %95 = vector.shape_cast %94 : vector<8xf32> to vector<8x1xf32>
    %96 = tpu.reciprocal %95 {approx = true} : vector<8x1xf32> -> vector<8x1xf32>
    %97 = vector.broadcast %96 : vector<8x1xf32> to vector<8x8xf32>
    %98 = arith.mulf %93, %97 : vector<8x8xf32>
    %cst_34 = arith.constant dense<0.000000e+00> : vector<8x8xf32>
    %99 = tpu.matmul %98, %87, %cst_34 {dimension_numbers = #tpu.dot_dimension_numbers<[1], [0], [0], [1], [0, 0, 1, 1], [], []>} : vector<8x8xf32>, vector<8x8xf32>, vector<8x8xf32> -> vector<8x8xf32>
    %100 = tpu.concatenate %54, %69, %84, %99 in 1 : vector<8x8xf32>, vector<8x8xf32>, vector<8x8xf32>, vector<8x8xf32> -> vector<8x32xf32>
    %101 = arith.index_cast %37 : i32 to index
    %c0_35 = arith.constant 0 : index
    %102 = vector.load %arg18[%101, %c0_35] : memref<16x32xf32, #tpu.memory_space<vmem>>, vector<8x32xf32>
    tpu.vector_store %arg18[%101, %c0_35], %100 {strides = array<i32>} : memref<16x32xf32, #tpu.memory_space<vmem>>, vector<8x32xf32>,
    %c1_i32 = arith.constant 1 : i32
    %c8_i32_36 = arith.constant 8 : i32
    %103 = arith.muli %c1_i32, %c8_i32_36 : i32
    %104 = tpu.assume_multiple %103, 8 : i32
    %105 = arith.index_cast %104 : i32 to index
    %c0_37 = arith.constant 0 : index
    %106 = vector.load %arg17[%105, %c0_37] : memref<16x96xf32, #tpu.memory_space<vmem>>, vector<8x96xf32>
    %107 = vector.extract_strided_slice %106 {offsets = [0, 0], sizes = [8, 8], strides = [1, 1]} : vector<8x96xf32> to vector<8x8xf32>
    %108 = vector.extract_strided_slice %106 {offsets = [0, 32], sizes = [8, 8], strides = [1, 1]} : vector<8x96xf32> to vector<8x8xf32>
    %109 = vector.extract_strided_slice %106 {offsets = [0, 64], sizes = [8, 8], strides = [1, 1]} : vector<8x96xf32> to vector<8x8xf32>
    %cst_38 = arith.constant dense<0.000000e+00> : vector<8x8xf32>
    %110 = tpu.matmul %107, %108, %cst_38 {dimension_numbers = #tpu.dot_dimension_numbers<[1], [1], [0], [0], [0, 0, 1, 0], [], []>} : vector<8x8xf32>, vector<8x8xf32>, vector<8x8xf32> -> vector<8x8xf32>
    %cst_39 = arith.constant dense<0xFF800000> : vector<8xf32>
    %111 = vector.multi_reduction <maximumf>, %110, %cst_39 [1] : vector<8x8xf32> to vector<8xf32>
    %112 = vector.shape_cast %111 : vector<8xf32> to vector<8x1xf32>
    %113 = vector.broadcast %112 : vector<8x1xf32> to vector<8x8xf32>
    %114 = arith.subf %110, %113 : vector<8x8xf32>
    %115 = math.exp %114 : vector<8x8xf32>
    %cst_40 = arith.constant dense<0.000000e+00> : vector<8xf32>
    %116 = vector.multi_reduction <add>, %115, %cst_40 [1] : vector<8x8xf32> to vector<8xf32>
    %117 = vector.shape_cast %116 : vector<8xf32> to vector<8x1xf32>
    %118 = tpu.reciprocal %117 {approx = true} : vector<8x1xf32> -> vector<8x1xf32>
    %119 = vector.broadcast %118 : vector<8x1xf32> to vector<8x8xf32>
    %120 = arith.mulf %115, %119 : vector<8x8xf32>
    %cst_41 = arith.constant dense<0.000000e+00> : vector<8x8xf32>
    %121 = tpu.matmul %120, %109, %cst_41 {dimension_numbers = #tpu.dot_dimension_numbers<[1], [0], [0], [1], [0, 0, 1, 1], [], []>} : vector<8x8xf32>, vector<8x8xf32>, vector<8x8xf32> -> vector<8x8xf32>
    %122 = vector.extract_strided_slice %106 {offsets = [0, 8], sizes = [8, 8], strides = [1, 1]} : vector<8x96xf32> to vector<8x8xf32>
    %123 = vector.extract_strided_slice %106 {offsets = [0, 40], sizes = [8, 8], strides = [1, 1]} : vector<8x96xf32> to vector<8x8xf32>
    %124 = vector.extract_strided_slice %106 {offsets = [0, 72], sizes = [8, 8], strides = [1, 1]} : vector<8x96xf32> to vector<8x8xf32>
    %cst_42 = arith.constant dense<0.000000e+00> : vector<8x8xf32>
    %125 = tpu.matmul %122, %123, %cst_42 {dimension_numbers = #tpu.dot_dimension_numbers<[1], [1], [0], [0], [0, 0, 1, 0], [], []>} : vector<8x8xf32>, vector<8x8xf32>, vector<8x8xf32> -> vector<8x8xf32>
    %cst_43 = arith.constant dense<0xFF800000> : vector<8xf32>
    %126 = vector.multi_reduction <maximumf>, %125, %cst_43 [1] : vector<8x8xf32> to vector<8xf32>
    %127 = vector.shape_cast %126 : vector<8xf32> to vector<8x1xf32>
    %128 = vector.broadcast %127 : vector<8x1xf32> to vector<8x8xf32>
    %129 = arith.subf %125, %128 : vector<8x8xf32>
    %130 = math.exp %129 : vector<8x8xf32>
    %cst_44 = arith.constant dense<0.000000e+00> : vector<8xf32>
    %131 = vector.multi_reduction <add>, %130, %cst_44 [1] : vector<8x8xf32> to vector<8xf32>
    %132 = vector.shape_cast %131 : vector<8xf32> to vector<8x1xf32>
    %133 = tpu.reciprocal %132 {approx = true} : vector<8x1xf32> -> vector<8x1xf32>
    %134 = vector.broadcast %133 : vector<8x1xf32> to vector<8x8xf32>
    %135 = arith.mulf %130, %134 : vector<8x8xf32>
    %cst_45 = arith.constant dense<0.000000e+00> : vector<8x8xf32>
    %136 = tpu.matmul %135, %124, %cst_45 {dimension_numbers = #tpu.dot_dimension_numbers<[1], [0], [0], [1], [0, 0, 1, 1], [], []>} : vector<8x8xf32>, vector<8x8xf32>, vector<8x8xf32> -> vector<8x8xf32>
    %137 = vector.extract_strided_slice %106 {offsets = [0, 16], sizes = [8, 8], strides = [1, 1]} : vector<8x96xf32> to vector<8x8xf32>
    %138 = vector.extract_strided_slice %106 {offsets = [0, 48], sizes = [8, 8], strides = [1, 1]} : vector<8x96xf32> to vector<8x8xf32>
    %139 = vector.extract_strided_slice %106 {offsets = [0, 80], sizes = [8, 8], strides = [1, 1]} : vector<8x96xf32> to vector<8x8xf32>
    %cst_46 = arith.constant dense<0.000000e+00> : vector<8x8xf32>
    %140 = tpu.matmul %137, %138, %cst_46 {dimension_numbers = #tpu.dot_dimension_numbers<[1], [1], [0], [0], [0, 0, 1, 0], [], []>} : vector<8x8xf32>, vector<8x8xf32>, vector<8x8xf32> -> vector<8x8xf32>
    %cst_47 = arith.constant dense<0xFF800000> : vector<8xf32>
    %141 = vector.multi_reduction <maximumf>, %140, %cst_47 [1] : vector<8x8xf32> to vector<8xf32>
    %142 = vector.shape_cast %141 : vector<8xf32> to vector<8x1xf32>
    %143 = vector.broadcast %142 : vector<8x1xf32> to vector<8x8xf32>
    %144 = arith.subf %140, %143 : vector<8x8xf32>
    %145 = math.exp %144 : vector<8x8xf32>
    %cst_48 = arith.constant dense<0.000000e+00> : vector<8xf32>
    %146 = vector.multi_reduction <add>, %145, %cst_48 [1] : vector<8x8xf32> to vector<8xf32>
    %147 = vector.shape_cast %146 : vector<8xf32> to vector<8x1xf32>
    %148 = tpu.reciprocal %147 {approx = true} : vector<8x1xf32> -> vector<8x1xf32>
    %149 = vector.broadcast %148 : vector<8x1xf32> to vector<8x8xf32>
    %150 = arith.mulf %145, %149 : vector<8x8xf32>
    %cst_49 = arith.constant dense<0.000000e+00> : vector<8x8xf32>
    %151 = tpu.matmul %150, %139, %cst_49 {dimension_numbers = #tpu.dot_dimension_numbers<[1], [0], [0], [1], [0, 0, 1, 1], [], []>} : vector<8x8xf32>, vector<8x8xf32>, vector<8x8xf32> -> vector<8x8xf32>
    %152 = vector.extract_strided_slice %106 {offsets = [0, 24], sizes = [8, 8], strides = [1, 1]} : vector<8x96xf32> to vector<8x8xf32>
    %153 = vector.extract_strided_slice %106 {offsets = [0, 56], sizes = [8, 8], strides = [1, 1]} : vector<8x96xf32> to vector<8x8xf32>
    %154 = vector.extract_strided_slice %106 {offsets = [0, 88], sizes = [8, 8], strides = [1, 1]} : vector<8x96xf32> to vector<8x8xf32>
    %cst_50 = arith.constant dense<0.000000e+00> : vector<8x8xf32>
    %155 = tpu.matmul %152, %153, %cst_50 {dimension_numbers = #tpu.dot_dimension_numbers<[1], [1], [0], [0], [0, 0, 1, 0], [], []>} : vector<8x8xf32>, vector<8x8xf32>, vector<8x8xf32> -> vector<8x8xf32>
    %cst_51 = arith.constant dense<0xFF800000> : vector<8xf32>
    %156 = vector.multi_reduction <maximumf>, %155, %cst_51 [1] : vector<8x8xf32> to vector<8xf32>
    %157 = vector.shape_cast %156 : vector<8xf32> to vector<8x1xf32>
    %158 = vector.broadcast %157 : vector<8x1xf32> to vector<8x8xf32>
    %159 = arith.subf %155, %158 : vector<8x8xf32>
    %160 = math.exp %159 : vector<8x8xf32>
    %cst_52 = arith.constant dense<0.000000e+00> : vector<8xf32>
    %161 = vector.multi_reduction <add>, %160, %cst_52 [1] : vector<8x8xf32> to vector<8xf32>
    %162 = vector.shape_cast %161 : vector<8xf32> to vector<8x1xf32>
    %163 = tpu.reciprocal %162 {approx = true} : vector<8x1xf32> -> vector<8x1xf32>
    %164 = vector.broadcast %163 : vector<8x1xf32> to vector<8x8xf32>
    %165 = arith.mulf %160, %164 : vector<8x8xf32>
    %cst_53 = arith.constant dense<0.000000e+00> : vector<8x8xf32>
    %166 = tpu.matmul %165, %154, %cst_53 {dimension_numbers = #tpu.dot_dimension_numbers<[1], [0], [0], [1], [0, 0, 1, 1], [], []>} : vector<8x8xf32>, vector<8x8xf32>, vector<8x8xf32> -> vector<8x8xf32>
    %167 = tpu.concatenate %121, %136, %151, %166 in 1 : vector<8x8xf32>, vector<8x8xf32>, vector<8x8xf32>, vector<8x8xf32> -> vector<8x32xf32>
    %168 = arith.index_cast %104 : i32 to index
    %c0_54 = arith.constant 0 : index
    %169 = vector.load %arg18[%168, %c0_54] : memref<16x32xf32, #tpu.memory_space<vmem>>, vector<8x32xf32>
    tpu.vector_store %arg18[%168, %c0_54], %167 {strides = array<i32>} : memref<16x32xf32, #tpu.memory_space<vmem>>, vector<8x32xf32>,
    %c2_i32 = arith.constant 2 : i32
    %c0_55 = arith.constant 0 : index
    %c0_56 = arith.constant 0 : index
    %170 = vector.load %arg18[%c0_55, %c0_56] : memref<16x32xf32, #tpu.memory_space<vmem>>, vector<16x32xf32>
    %c0_57 = arith.constant 0 : index
    %c0_58 = arith.constant 0 : index
    %171 = vector.load %arg6[%c0_57, %c0_58] : memref<32x32xf32, #tpu.memory_space<vmem>>, vector<32x32xf32>
    %cst_59 = arith.constant dense<0.000000e+00> : vector<16x32xf32>
    %172 = tpu.matmul %170, %171, %cst_59 {dimension_numbers = #tpu.dot_dimension_numbers<[1], [0], [0], [1], [0, 0, 1, 1], [], []>} : vector<16x32xf32>, vector<32x32xf32>, vector<16x32xf32> -> vector<16x32xf32>
    %c0_60 = arith.constant 0 : index
    %c0_61 = arith.constant 0 : index
    %173 = vector.load %arg7[%c0_60, %c0_61] : memref<1x32xf32, #tpu.memory_space<vmem>>, vector<1x32xf32>
    %174 = vector.broadcast %173 : vector<1x32xf32> to vector<16x32xf32>
    %175 = arith.addf %172, %174 : vector<16x32xf32>
    %176 = arith.addf %0, %175 : vector<16x32xf32>
    %c0_62 = arith.constant 0 : index
    %c0_63 = arith.constant 0 : index
    %177 = vector.load %arg8[%c0_62, %c0_63] : memref<1x32xf32, #tpu.memory_space<vmem>>, vector<1x32xf32>
    %c0_64 = arith.constant 0 : index
    %c0_65 = arith.constant 0 : index
    %178 = vector.load %arg9[%c0_64, %c0_65] : memref<1x32xf32, #tpu.memory_space<vmem>>, vector<1x32xf32>
    %cst_66 = arith.constant dense<0.000000e+00> : vector<16xf32>
    %179 = vector.multi_reduction <add>, %176, %cst_66 [1] : vector<16x32xf32> to vector<16xf32>
    %180 = vector.shape_cast %179 : vector<16xf32> to vector<16x1xf32>
    %cst_67 = arith.constant 3.200000e+01 : f32
    %181 = vector.broadcast %cst_67 : f32 to vector<16x1xf32>
    %182 = arith.divf %180, %181 : vector<16x1xf32>
    %183 = vector.broadcast %182 : vector<16x1xf32> to vector<16x32xf32>
    %184 = arith.subf %176, %183 : vector<16x32xf32>
    %185 = arith.mulf %184, %184 : vector<16x32xf32>
    %cst_68 = arith.constant dense<0.000000e+00> : vector<16xf32>
    %186 = vector.multi_reduction <add>, %185, %cst_68 [1] : vector<16x32xf32> to vector<16xf32>
    %187 = vector.shape_cast %186 : vector<16xf32> to vector<16x1xf32>
    %cst_69 = arith.constant 3.200000e+01 : f32
    %188 = vector.broadcast %cst_69 : f32 to vector<16x1xf32>
    %189 = arith.divf %187, %188 : vector<16x1xf32>
    %190 = vector.broadcast %182 : vector<16x1xf32> to vector<16x32xf32>
    %191 = arith.subf %176, %190 : vector<16x32xf32>
    %cst_70 = arith.constant 9.99999974E-6 : f32
    %192 = vector.broadcast %cst_70 : f32 to vector<16x1xf32>
    %193 = arith.addf %189, %192 : vector<16x1xf32>
    %194 = math.rsqrt %193 : vector<16x1xf32>
    %195 = vector.broadcast %194 : vector<16x1xf32> to vector<16x32xf32>
    %196 = arith.mulf %191, %195 : vector<16x32xf32>
    %197 = vector.broadcast %177 : vector<1x32xf32> to vector<16x32xf32>
    %198 = arith.mulf %196, %197 : vector<16x32xf32>
    %199 = vector.broadcast %178 : vector<1x32xf32> to vector<16x32xf32>
    %200 = arith.addf %198, %199 : vector<16x32xf32>
    %c0_71 = arith.constant 0 : index
    %c0_72 = arith.constant 0 : index
    %201 = vector.load %arg10[%c0_71, %c0_72] : memref<32x88xf32, #tpu.memory_space<vmem>>, vector<32x88xf32>
    %cst_73 = arith.constant dense<0.000000e+00> : vector<16x88xf32>
    %202 = tpu.matmul %200, %201, %cst_73 {dimension_numbers = #tpu.dot_dimension_numbers<[1], [0], [0], [1], [0, 0, 1, 1], [], []>} : vector<16x32xf32>, vector<32x88xf32>, vector<16x88xf32> -> vector<16x88xf32>
    %c0_74 = arith.constant 0 : index
    %c0_75 = arith.constant 0 : index
    %203 = vector.load %arg11[%c0_74, %c0_75] : memref<1x88xf32, #tpu.memory_space<vmem>>, vector<1x88xf32>
    %204 = vector.broadcast %203 : vector<1x88xf32> to vector<16x88xf32>
    %205 = arith.addf %202, %204 : vector<16x88xf32>
    %c0_76 = arith.constant 0 : index
    %c0_77 = arith.constant 0 : index
    %206 = vector.load %arg12[%c0_76, %c0_77] : memref<32x88xf32, #tpu.memory_space<vmem>>, vector<32x88xf32>
    %cst_78 = arith.constant dense<0.000000e+00> : vector<16x88xf32>
    %207 = tpu.matmul %200, %206, %cst_78 {dimension_numbers = #tpu.dot_dimension_numbers<[1], [0], [0], [1], [0, 0, 1, 1], [], []>} : vector<16x32xf32>, vector<32x88xf32>, vector<16x88xf32> -> vector<16x88xf32>
    %c0_79 = arith.constant 0 : index
    %c0_80 = arith.constant 0 : index
    %208 = vector.load %arg13[%c0_79, %c0_80] : memref<1x88xf32, #tpu.memory_space<vmem>>, vector<1x88xf32>
    %209 = vector.broadcast %208 : vector<1x88xf32> to vector<16x88xf32>
    %210 = arith.addf %207, %209 : vector<16x88xf32>
    %cst_81 = arith.constant 0.000000e+00 : f32
    %211 = vector.broadcast %cst_81 : f32 to vector<16x88xf32>
    %212 = arith.subf %211, %205 : vector<16x88xf32>
    %213 = math.exp %212 : vector<16x88xf32>
    %cst_82 = arith.constant 1.000000e+00 : f32
    %214 = vector.broadcast %cst_82 : f32 to vector<16x88xf32>
    %215 = arith.addf %214, %213 : vector<16x88xf32>
    %216 = tpu.reciprocal %215 {approx = true} : vector<16x88xf32> -> vector<16x88xf32>
    %217 = arith.mulf %205, %216 : vector<16x88xf32>
    %218 = arith.mulf %217, %210 : vector<16x88xf32>
    %c0_83 = arith.constant 0 : index
    %c0_84 = arith.constant 0 : index
    %219 = vector.load %arg14[%c0_83, %c0_84] : memref<88x32xf32, #tpu.memory_space<vmem>>, vector<88x32xf32>
    %cst_85 = arith.constant dense<0.000000e+00> : vector<16x32xf32>
    %220 = tpu.matmul %218, %219, %cst_85 {dimension_numbers = #tpu.dot_dimension_numbers<[1], [0], [0], [1], [0, 0, 1, 1], [], []>} : vector<16x88xf32>, vector<88x32xf32>, vector<16x32xf32> -> vector<16x32xf32>
    %c0_86 = arith.constant 0 : index
    %c0_87 = arith.constant 0 : index
    %221 = vector.load %arg15[%c0_86, %c0_87] : memref<1x32xf32, #tpu.memory_space<vmem>>, vector<1x32xf32>
    %222 = vector.broadcast %221 : vector<1x32xf32> to vector<16x32xf32>
    %223 = arith.addf %220, %222 : vector<16x32xf32>
    %224 = arith.addf %176, %223 : vector<16x32xf32>
    %c0_88 = arith.constant 0 : index
    %c0_89 = arith.constant 0 : index
    %225 = vector.load %arg16[%c0_88, %c0_89] : memref<16x32xf32, #tpu.memory_space<vmem>>, vector<16x32xf32>
    tpu.vector_store %arg16[%c0_88, %c0_89], %224 {strides = array<i32>} : memref<16x32xf32, #tpu.memory_space<vmem>>, vector<16x32xf32>,
    return
  }
  func.func @transform_0(%arg0: i32) -> (i32, i32) {
    %c0_i32 = arith.constant 0 : i32
    %c0_i32_0 = arith.constant 0 : i32
    return %arg0, %c0_i32 : i32, i32
  }
  func.func @transform_1(%arg0: i32) -> (i32, i32) {
    %c0_i32 = arith.constant 0 : i32
    %c0_i32_0 = arith.constant 0 : i32
    %c0_i32_1 = arith.constant 0 : i32
    return %c0_i32, %c0_i32_0 : i32, i32
  }
  func.func @transform_2(%arg0: i32) -> (i32, i32) {
    %c0_i32 = arith.constant 0 : i32
    %c0_i32_0 = arith.constant 0 : i32
    %c0_i32_1 = arith.constant 0 : i32
    return %c0_i32, %c0_i32_0 : i32, i32
  }
  func.func @transform_3(%arg0: i32) -> (i32, i32) {
    %c0_i32 = arith.constant 0 : i32
    %c0_i32_0 = arith.constant 0 : i32
    %c0_i32_1 = arith.constant 0 : i32
    return %c0_i32, %c0_i32_0 : i32, i32
  }
  func.func @transform_4(%arg0: i32) -> (i32, i32) {
    %c0_i32 = arith.constant 0 : i32
    %c0_i32_0 = arith.constant 0 : i32
    %c0_i32_1 = arith.constant 0 : i32
    return %c0_i32, %c0_i32_0 : i32, i32
  }
  func.func @transform_5(%arg0: i32) -> (i32, i32) {
    %c0_i32 = arith.constant 0 : i32
    %c0_i32_0 = arith.constant 0 : i32
    %c0_i32_1 = arith.constant 0 : i32
    return %c0_i32, %c0_i32_0 : i32, i32
  }
  func.func @transform_6(%arg0: i32) -> (i32, i32) {
    %c0_i32 = arith.constant 0 : i32
    %c0_i32_0 = arith.constant 0 : i32
    %c0_i32_1 = arith.constant 0 : i32
    return %c0_i32, %c0_i32_0 : i32, i32
  }
  func.func @transform_7(%arg0: i32) -> (i32, i32) {
    %c0_i32 = arith.constant 0 : i32
    %c0_i32_0 = arith.constant 0 : i32
    %c0_i32_1 = arith.constant 0 : i32
    return %c0_i32, %c0_i32_0 : i32, i32
  }
  func.func @transform_8(%arg0: i32) -> (i32, i32) {
    %c0_i32 = arith.constant 0 : i32
    %c0_i32_0 = arith.constant 0 : i32
    %c0_i32_1 = arith.constant 0 : i32
    return %c0_i32, %c0_i32_0 : i32, i32
  }
  func.func @transform_9(%arg0: i32) -> (i32, i32) {
    %c0_i32 = arith.constant 0 : i32
    %c0_i32_0 = arith.constant 0 : i32
    %c0_i32_1 = arith.constant 0 : i32
    return %c0_i32, %c0_i32_0 : i32, i32
  }
  func.func @transform_10(%arg0: i32) -> (i32, i32) {
    %c0_i32 = arith.constant 0 : i32
    %c0_i32_0 = arith.constant 0 : i32
    %c0_i32_1 = arith.constant 0 : i32
    return %c0_i32, %c0_i32_0 : i32, i32
  }
  func.func @transform_11(%arg0: i32) -> (i32, i32) {
    %c0_i32 = arith.constant 0 : i32
    %c0_i32_0 = arith.constant 0 : i32
    %c0_i32_1 = arith.constant 0 : i32
    return %c0_i32, %c0_i32_0 : i32, i32
  }
  func.func @transform_12(%arg0: i32) -> (i32, i32) {
    %c0_i32 = arith.constant 0 : i32
    %c0_i32_0 = arith.constant 0 : i32
    %c0_i32_1 = arith.constant 0 : i32
    return %c0_i32, %c0_i32_0 : i32, i32
  }
  func.func @transform_13(%arg0: i32) -> (i32, i32) {
    %c0_i32 = arith.constant 0 : i32
    %c0_i32_0 = arith.constant 0 : i32
    %c0_i32_1 = arith.constant 0 : i32
    return %c0_i32, %c0_i32_0 : i32, i32
  }
  func.func @transform_14(%arg0: i32) -> (i32, i32) {
    %c0_i32 = arith.constant 0 : i32
    %c0_i32_0 = arith.constant 0 : i32
    %c0_i32_1 = arith.constant 0 : i32
    return %c0_i32, %c0_i32_0 : i32, i32
  }
  func.func @transform_15(%arg0: i32) -> (i32, i32) {
    %c0_i32 = arith.constant 0 : i32
    %c0_i32_0 = arith.constant 0 : i32
    return %arg0, %c0_i32 : i32, i32
  }
}

</mosaic_0001>

<bundles_post_ra>
// kernel: tpu_custom_call.1
= control target key start
LH: loop header
LB: loop body
LE: loop exit
PB: predicated region body
PF: predicated region fallthrough
CT: control target
= control target key end

     0   :  { %s4039_s0 = inlined_call_operand.vmem [shape: f32[32,32], index: 0, kind: input, shape index: {}]   ;;  %s4040_s1 = inlined_call_operand.vmem [shape: f32[1,32], index: 1, kind: input, shape index: {}]   ;;  %s4041_s2 = inlined_call_operand.hbm [shape: f32[1,32], index: 2, kind: input, shape index: {}]   ;;  %s4042_s3 = inlined_call_operand.vmem [shape: f32[32,96], index: 3, kind: input, shape index: {}]   ;;  %s4043_s4 = inlined_call_operand.hbm [shape: f32[1,96], index: 4, kind: input, shape index: {}]   ;;  %s4044_s5 = inlined_call_operand.vmem [shape: f32[32,32], index: 5, kind: input, shape index: {}]   ;;  %s4045_s6 = inlined_call_operand.hbm [shape: f32[1,32], index: 6, kind: input, shape index: {}]   ;;  %s4046_s7 = inlined_call_operand.hbm [shape: f32[1,32], index: 7, kind: input, shape index: {}]   ;;  %s4047_s8 = inlined_call_operand.hbm [shape: f32[1,32], index: 8, kind: input, shape index: {}]   ;;  %s4048_s9 = inlined_call_operand.vmem [shape: f32[32,88], index: 9, kind: input, shape index: {}]   ;;  %s4049_s10 = inlined_call_operand.hbm [shape: f32[1,88], index: 10, kind: input, shape index: {}]   ;;  %s4050_s11 = inlined_call_operand.vmem [shape: f32[32,88], index: 11, kind: input, shape index: {}]   ;;  %s4051_s12 = inlined_call_operand.vmem [shape: f32[1,88], index: 12, kind: input, shape index: {}]   ;;  %s4052_s13 = inlined_call_operand.vmem [shape: f32[88,32], index: 13, kind: input, shape index: {}]   ;;  %s4053_s14 = inlined_call_operand.vmem [shape: f32[1,32], index: 14, kind: input, shape index: {}]   ;;  %s4054_s15 = inlined_call_operand.hbm [shape: f32[32,32], index: 15, kind: output, shape index: {}]  }
   0x1   :  { %4067 = sst [smem:[#allocation28_spill]] %s4043_s4 }
   0x2   :  { %4068 = sst [smem:[#allocation29_spill]] %s4053_s14 }
   0x3   :  { %4069 = sst [smem:[#allocation30_spill]] %s4054_s15 }
   0x4   :  { %20 = vsyncpa [#allocation5], 0 }
   0x5   :  { %21 = vsyncpa [#allocation8], 0 }
   0x6   :  { %22 = vsyncpa [#allocation11], 0 }
   0x7   :  { %23 = vsyncpa [#allocation14], 0 }
   0x8   :  { %24 = vsyncpa [#allocation6], 0 }
   0x9   :  { %26 = vsyncpa [#allocation6 + $0x1], 0  ;;  %s3503_s18 = smov 0   ;;  %s3505_s19 = smov 0  }
   0xa   :  { %s3507_s20 = smov 0   ;;  %s3509_s21 = smov 0  }
   0xb LB: > { %4070 = sst [smem:[#allocation21_spill]] %s3385_s18  ;;  %s3524_s22 = sadd.s32 4294967295, %s3397_s21   ;;  %s3397_s21 = sphi %s3509_s21, %s4100_s21   ;;  %s3393_s20 = sphi %s3507_s20, %s4102_s20   ;;  %s3389_s19 = sphi %s3505_s19, %s4104_s19   ;;  %s3385_s18 = sphi %s3503_s18, %s4103_s18  }
   0xc   : > { %4071 = sst [smem:[#allocation22_spill]] %s3393_s20  ;;  %s2648_s23 = sadd.s32 4294967294, %s3397_s21  }
   0xd   : > { %4072 = sst [smem:[#allocation23_spill]] %s3397_s21  ;;  %s3528_s24 = sadd.s32 1, %s3397_s21  }
   0xe   : > { %4073 = sst [smem:[#allocation24_spill]] %s3528_s24  ;;  %s359_s25 = sadd.s32 1, %s3393_s20 }
   0xf   : > { %s356_s26 = ssub.s32 %s3397_s21, %s3528_s24  ;;  %p369_p0 = scmp.ne.s32.totalorder %s3393_s20, %s3389_s19 }
  0x10   : > { %p357_p1 = scmp.eq.s32.totalorder %s356_s26, 0  ;;  %p370_p2 = scmp.eq.s32.totalorder %s3524_s22, 1 }
  0x11   : > { %p375_p3 = scmp.ne.s32.totalorder %s3389_s19, %s3385_s18  ;;  %p376_p4 = scmp.eq.s32.totalorder %s2648_s23, 1 }
  0x12   : > { %s3539_s27 = scalar_select %p357_p1, %s3393_s20, %s359_s25  }
  0x13   : > { %p3541_p5 = por %p370_p2, %p369_p0  ;;  %p3545_p6 = por %p376_p4, %p375_p3 }
  0x14   : > { %4074 = sst [smem:[#allocation25_spill]] %s3539_s27  ;;  %p2649_p7 = scmp.ge.s32.totalorder %s3397_s21, 1 }
  0x15   : > { %s4075_s28 = scalar_select %p3541_p5, 1, 0 }
  0x16   : > { %s4077_s29 = scalar_select %p3545_p6, 1, 0 }
  0x17   : > { %4076 = sst [smem:[#allocation26_spill]] %s4075_s28  ;;  %p383_p8 = scmp.lt.s32.totalorder %s3397_s21, 3 }
  0x18   : > { %4078 = sst [smem:[#allocation27_spill]] %s4077_s29  ;;  %p4062_p9 = scmp.eq.s32.totalorder %s3524_s22, 0 }
  0x19   : > { %p3552_p10 = pnand %p2649_p7, %p383_p8  ;;  %s3399_s16 = smov [#allocation7]  }
  0x1a   : > { %s413_s17 = sshll.u32 %s3399_s16, 4  ;;  %s3400_s23 = smov [#allocation10]   ;;  %s414_s17 = int_to_ptr.vmem [resolvable:$true] %s413_s17 }
  0x1b   : > { %s4079_s30 = scalar_select %p3552_p10, 1, 0 }
  0x1c   : > { %p3012_p11 = pneg %p3552_p10  ;;  %s438_s25 = sshll.u32 %s3400_s23, 4  ;;  %s3564_s25 = int_to_ptr.vmem [resolvable:$true] %s438_s25 }
  0x1d   : > { %s3401_s27 = smov [#allocation4]   ;;  %s4081_s4 = sld [smem:[#allocation28_spill]] }
  0x1e   : > { %p3560_p12 = pnand %p4062_p9, %p3012_p11  ;;  %s399_s20 = sshll.u32 %s3401_s27, 4  ;;  %s3566_s20 = int_to_ptr.vmem [resolvable:$true] %s399_s20 }
  0x20   : > { %p3576_p0 = pneg %p3560_p12 }
  0x23   : > { %s3151_s16 = scalar_lea.hbm %s4081_s4, 16 }
  0x24   : > { %p3152_p13 = scmp.ne.s32.totalorder %s4081_s4, %s3151_s16  ;;  %p3158_p3 = scmp.lt.u32.totalorder %s3151_s16, %s4081_s4 }
  0x26   : > { %p3154_p1 = pnand %p3576_p0, %p3152_p13 }
  0x28   : > { %p3155_p2 = pneg %p3154_p1 }
  0x2a   : > { %p3160_p4 = pnand %p3158_p3, %p3155_p2 }
  0x2c   : > { %3163 = shalt.err (!%p3160_p4)
}
  0x2d   : > { %s3164_s24 = scalar_lea.vmem %s414_s17, 16  ;;  %s3171_s18 = scalar_lea.vmem %s414_s17, 32 }
  0x2e   : > { %p3165_p7 = scmp.ne.s32.totalorder %s414_s17, %s3164_s24  ;;  %p3172_p9 = scmp.lt.s32.totalorder %s414_s17, %s414_s17 }
  0x2f   : > { %p3173_p6 = scmp.lt.s32.totalorder %s3171_s18, %s3164_s24 }
  0x30   : > { %p3167_p8 = pnand %p3165_p7, %p3576_p0 }
  0x31   : > { %p3174_p5 = por %p3173_p6, %p3172_p9 }
  0x32   : > { %p3168_p11 = pneg %p3167_p8 }
  0x34   : > { %p3175_p10 = pnand %p3174_p5, %p3168_p11 }
  0x36   : > { %3178 = shalt.err (!%p3175_p10)
}
  0x37   : > { %3018 = dma.hbm_to_vmem [thread:$0]  (!%p3560_p12), %s4081_s4, 16, %s414_s17, [#allocation8]  }
  0x38   : > { %s3179_s27 = scalar_lea.hbm %s4046_s7, 16 }
  0x39   : > { %p3180_p13 = scmp.ne.s32.totalorder %s4046_s7, %s3179_s27  ;;  %p3186_p5 = scmp.lt.u32.totalorder %s3179_s27, %s4046_s7 }
  0x3b   : > { %p3182_p1 = pnand %p3180_p13, %p3576_p0 }
  0x3d   : > { %p3183_p6 = pneg %p3182_p1 }
  0x3f   : > { %p3188_p9 = pnand %p3186_p5, %p3183_p6 }
  0x41   : > { %3191 = shalt.err (!%p3188_p9)
}
  0x42   : > { %s3192_s17 = scalar_lea.vmem %s3564_s25, 16  ;;  %s3199_s14 = scalar_lea.vmem %s3564_s25, 32 }
  0x43   : > { %p3193_p10 = scmp.ne.s32.totalorder %s3564_s25, %s3192_s17  ;;  %p3200_p4 = scmp.lt.s32.totalorder %s3564_s25, %s3564_s25 }
  0x44   : > { %p3201_p7 = scmp.lt.s32.totalorder %s3199_s14, %s3192_s17 }
  0x45   : > { %p3195_p2 = pnand %p3193_p10, %p3576_p0 }
  0x46   : > { %p3202_p8 = por %p3201_p7, %p3200_p4 }
  0x47   : > { %p3196_p3 = pneg %p3195_p2 }
  0x49   : > { %p3203_p11 = pnand %p3202_p8, %p3196_p3 }
  0x4b   : > { %3206 = shalt.err (!%p3203_p11)
}
  0x4c   : > { %3024 = dma.hbm_to_vmem [thread:$0]  (!%p3560_p12), %s4046_s7, 16, %s3564_s25, [#allocation11]  }
  0x4d   : > { %s3207_s16 = scalar_lea.hbm %s4041_s2, 16 }
  0x4e   : > { %p3208_p13 = scmp.ne.s32.totalorder %s4041_s2, %s3207_s16  ;;  %p3214_p5 = scmp.lt.u32.totalorder %s3207_s16, %s4041_s2 }
  0x50   : > { %p3210_p1 = pnand %p3208_p13, %p3576_p0 }
  0x52   : > { %p3211_p6 = pneg %p3210_p1 }
  0x54   : > { %p3216_p9 = pnand %p3214_p5, %p3211_p6 }
  0x56   : > { %3219 = shalt.err (!%p3216_p9)
}
  0x57   : > { %s3220_s25 = scalar_lea.vmem %s3566_s20, 16  ;;  %s3227_s14 = scalar_lea.vmem %s3566_s20, 32 }
  0x58   : > { %p3221_p10 = scmp.ne.s32.totalorder %s3566_s20, %s3220_s25  ;;  %p3228_p4 = scmp.lt.s32.totalorder %s3566_s20, %s3566_s20 }
  0x59   : > { %p3229_p7 = scmp.lt.s32.totalorder %s3227_s14, %s3220_s25 }
  0x5a   : > { %p3223_p2 = pnand %p3221_p10, %p3576_p0 }
  0x5b   : > { %p3230_p8 = por %p3229_p7, %p3228_p4 }
  0x5c   : > { %p3224_p3 = pneg %p3223_p2 }
  0x5e   : > { %p3231_p11 = pnand %p3230_p8, %p3224_p3 }
  0x60   : > { %3234 = shalt.err (!%p3231_p11)
}
  0x61   : > { %3015 = dma.hbm_to_vmem [thread:$0]  (!%p3560_p12), %s4041_s2, 16, %s3566_s20, [#allocation5]  }
  0x62   : > { %s3402_s29 = smov [#allocation9]   ;;  %s3403_s16 = smov [#allocation12]  }
  0x63   : > { %s427_s15 = sshll.u32 %s3402_s29, 4  ;;  %s449_s27 = sshll.u32 %s3403_s16, 4  ;;  %s428_s15 = int_to_ptr.vmem [resolvable:$true] %s427_s15  ;;  %s450_s27 = int_to_ptr.vmem [resolvable:$true] %s449_s27 }
  0x64   : > { %s3235_s17 = scalar_lea.hbm %s4045_s6, 16 }
  0x65   : > { %p3236_p13 = scmp.ne.s32.totalorder %s4045_s6, %s3235_s17  ;;  %p3242_p5 = scmp.lt.u32.totalorder %s3235_s17, %s4045_s6 }
  0x67   : > { %p3238_p1 = pnand %p3236_p13, %p3576_p0 }
  0x69   : > { %p3239_p6 = pneg %p3238_p1 }
  0x6b   : > { %p3244_p9 = pnand %p3242_p5, %p3239_p6 }
  0x6d   : > { %3247 = shalt.err (!%p3244_p9)
}
  0x6e   : > { %s3248_s20 = scalar_lea.vmem %s428_s15, 16  ;;  %s3255_s21 = scalar_lea.vmem %s428_s15, 32 }
  0x6f   : > { %p3249_p10 = scmp.ne.s32.totalorder %s428_s15, %s3248_s20  ;;  %p3256_p4 = scmp.lt.s32.totalorder %s428_s15, %s428_s15 }
  0x70   : > { %p3257_p7 = scmp.lt.s32.totalorder %s3255_s21, %s3248_s20 }
  0x71   : > { %p3251_p2 = pnand %p3249_p10, %p3576_p0 }
  0x72   : > { %p3258_p8 = por %p3257_p7, %p3256_p4 }
  0x73   : > { %p3252_p3 = pneg %p3251_p2 }
  0x75   : > { %p3259_p11 = pnand %p3258_p8, %p3252_p3 }
  0x77   : > { %3262 = shalt.err (!%p3259_p11)
}
  0x78   : > { %3021 = dma.hbm_to_vmem [thread:$0]  (!%p3560_p12), %s4045_s6, 16, %s428_s15, [#allocation8]  }
  0x79   : > { %s3263_s18 = scalar_lea.hbm %s4047_s8, 16 }
  0x7a   : > { %p3264_p13 = scmp.ne.s32.totalorder %s4047_s8, %s3263_s18  ;;  %p3270_p5 = scmp.lt.u32.totalorder %s3263_s18, %s4047_s8 }
  0x7c   : > { %p3266_p1 = pnand %p3264_p13, %p3576_p0 }
  0x7e   : > { %p3267_p6 = pneg %p3266_p1 }
  0x80   : > { %p3272_p9 = pnand %p3270_p5, %p3267_p6 }
  0x82   : > { %3275 = shalt.err (!%p3272_p9)
}
  0x83   : > { %s3276_s20 = scalar_lea.vmem %s450_s27, 16  ;;  %s3283_s15 = scalar_lea.vmem %s450_s27, 32 }
  0x84   : > { %p3277_p10 = scmp.ne.s32.totalorder %s450_s27, %s3276_s20  ;;  %p3284_p4 = scmp.lt.s32.totalorder %s450_s27, %s450_s27 }
  0x85   : > { %p3285_p7 = scmp.lt.s32.totalorder %s3283_s15, %s3276_s20 }
  0x86   : > { %p3279_p2 = pnand %p3277_p10, %p3576_p0 }
  0x87   : > { %p3286_p8 = por %p3285_p7, %p3284_p4 }
  0x88   : > { %p3280_p3 = pneg %p3279_p2 }
  0x8a   : > { %p3287_p11 = pnand %p3286_p8, %p3280_p3 }
  0x8c   : > { %3290 = shalt.err (!%p3287_p11)
}
  0x8d   : > { %3027 = dma.hbm_to_vmem [thread:$0]  (!%p3560_p12), %s4047_s8, 16, %s450_s27, [#allocation11]  }
  0x8e   : > { %s3404_s16 = smov [#allocation13]   ;;  %s3291_s17 = scalar_lea.hbm %s4049_s10, 16 }
  0x8f   : > { %s463_s4 = sshll.u32 %s3404_s16, 4  ;;  %p3292_p13 = scmp.ne.s32.totalorder %s4049_s10, %s3291_s17  ;;  %s464_s4 = int_to_ptr.vmem [resolvable:$true] %s463_s4 }
  0x90   : > { %p3298_p5 = scmp.lt.u32.totalorder %s3291_s17, %s4049_s10 }
  0x91   : > { %p3294_p1 = pnand %p3292_p13, %p3576_p0 }
  0x93   : > { %p3295_p6 = pneg %p3294_p1 }
  0x95   : > { %p3300_p9 = pnand %p3298_p5, %p3295_p6 }
  0x97   : > { %3303 = shalt.err (!%p3300_p9)
}
  0x98   : > { %s3304_s27 = scalar_lea.vmem %s464_s4, 16  ;;  %s3311_s15 = scalar_lea.vmem %s464_s4, 32 }
  0x99   : > { %p3305_p10 = scmp.ne.s32.totalorder %s464_s4, %s3304_s27  ;;  %p3312_p4 = scmp.lt.s32.totalorder %s464_s4, %s464_s4 }
  0x9a   : > { %p3313_p7 = scmp.lt.s32.totalorder %s3311_s15, %s3304_s27 }
  0x9b   : > { %p3307_p2 = pnand %p3305_p10, %p3576_p0 }
  0x9c   : > { %p3314_p8 = por %p3313_p7, %p3312_p4 }
  0x9d   : > { %p3308_p3 = pneg %p3307_p2 }
  0x9f   : > { %p3315_p11 = pnand %p3314_p8, %p3308_p3 }
  0xa1   : > { %3318 = shalt.err (!%p3315_p11)
}
  0xa2   : > { %3030 = dma.hbm_to_vmem [thread:$0]  (!%p3560_p12), %s4049_s10, 16, %s464_s4, [#allocation14]  }
  0xa3   : > { %p4083_p13 = scmp.ne.s32.totalorder %s4079_s30, 0 }
  0xa4   : > { %p4084_p1 = scmp.eq.s32.totalorder (!%p4083_p13), %s3524_s22, 0 }
  0xa5   : > { %497 = sbr.rel (%p4083_p13) target bundleno = 2801 (0xaf1), region = 80 }
  0xac   : > { %3364 = dma.done.wait (%p4084_p1), [#allocation5], 16   ;;  %p4085_p0 = pmov %p4084_p1 }
  0xae   : > { %3366 = vsyncadd (%p4085_p0), [#allocation5], 4294967280  ;;  %p4086_p6 = pmov %p4085_p0 }
  0xaf   : > { %p4087_p5 = pmov %p4085_p0 }
  0xb0   : > { %3368 = dma.done.wait (%p4086_p6), [#allocation8], 32  }
  0xb1   : > { %3370 = vsyncadd (%p4087_p5), [#allocation8], 4294967264  ;;  %p4088_p9 = pmov %p4085_p0 }
  0xb2   : > { %p4089_p12 = pmov %p4085_p0 }
  0xb3   : > { %3372 = dma.done.wait (%p4088_p9), [#allocation11], 32  }
  0xb4   : > { %3374 = vsyncadd (%p4089_p12), [#allocation11], 4294967264  ;;  %p4090_p10 = pmov %p4085_p0 }
  0xb5   : > { %p4091_p2 = pmov %p4085_p0 }
  0xb6   : > { %3376 = dma.done.wait (%p4090_p10), [#allocation14], 16  }
  0xb7   : > { %3378 = vsyncadd (%p4091_p2), [#allocation14], 4294967280  ;;  %s2665_s30 = sshll.u32 %s3524_s22, 1  ;;  %vm576_vm0 = vcmask 261120   ;;  %v620_v14 = vld [vmem:[%s4042_s3] sm:$0xff]  ;;  %v621_v15 = vld [vmem:[%s4042_s3 + $0x8] sm:$0xff] }
  0xb8   : > { %p566_p3 = scmp.lt.s32.totalorder %s2665_s30, 3  ;;  %v622_v16 = vld [vmem:[%s4042_s3 + $0x10] sm:$0xff]  ;;  %v2934_v17 = vpack.c.bf16 %v621_v15, %v620_v14  ;;  %v623_v18 = vld [vmem:[%s4042_s3 + $0x18] sm:$0xff]  ;;  %v2667_v27 = vld [vmem:[%s4040_s1] ss:$0 sm:$0xff]  ;;  %v3405_v36 = vmov 0.0  }
  0xb9   : > { %v2938_v19 = vpack.c.bf16 %v623_v18, %v622_v16  ;;  %v2668_v29 = vld [vmem:[#allocation4] ss:$0 sm:$0xff]  ;;  %2801 = vmatprep.subr.mxu1 %v3405_v36  ;;  %v2669_v37 = vld [vmem:[#allocation7] ss:$0 sm:$0xff]  ;;  %vm716_vm1 = vcmask 785664   ;;  %vm3406_vm2 = vmmov 0  }
  0xba   : > { %s4106_s30 = smov (!%p566_p3, %s2665_s30), 3  ;;  %2935 = vmatprep.subr.bf16.mxu0 %v2934_v17  ;;  %2803 = vmatprep.mubr.msk.f32.mxu1 %vm3406_vm2, %v3405_v36  ;;  %s3407_s29 = smov 88   ;;  %vm723_vm3 = vcmask 64512   ;;  %vm1393_vm4 = vcmask 130048   ;;  %vm1395_vm5 = vcmask 195584   ;;  %vm2426_vm6 = vcmask 719872  }
  0xbb   : > { %s2666_s26 = sshll.u32 %s4106_s30, 3  ;;  %2937 = vmatpush3.bf16.msra.mxu0 %v2934_v17  ;;  %s3408_s30 = smov 96  }
  0xbc   : > { %s569_s4 = scalar_lea.vmem %s4039_s0, %s2666_s26  ;;  %2939 = vmatprep.subr.bf16.mxu0 %v2938_v19  ;;  %s3409_s26 = smov 120  }
  0xbd   : > { %v3716_v0 = vld [vmem:[%s569_s4] sm:$0xff]  ;;  %v3718_v1 = vld [vmem:[%s569_s4 + $0x8] sm:$0xff]  ;;  %s3410_s23 = smov 112   ;;  %s3411_s16 = smov 80  }
  0xbe   : > { %v577_v2 = vsel %vm576_vm0, %v3716_v0, 0.0  ;;  %v580_v3 = vsel %vm576_vm0, %v3718_v1, 0.0  ;;  %s3412_s4 = smov 104   ;;  %s3413_s24 = smov 72  }
  0xbf   : > { %578 = vadd.xlane.f32.xlu0 %v577_v2  ;;  %2941 = vmatpush3.bf16.msra.mxu0 %v2938_v19  ;;  %s3414_s18 = smov 64   ;;  %s3415_s17 = smov 48  }
  0xc0   : > { %2796 = vmatprep.subr.mxu0 %v3405_v36  ;;  %s3416_s25 = smov 40   ;;  %s3417_s14 = smov 56  }
  0xc1   : > { %s3418_s28 = smov 8   ;;  %s3419_s20 = smov 16  }
  0xc2   : > { %s3420_s27 = smov 24  }
  0xc3   : > { %581 = vadd.xlane.f32.xlu0 %v580_v3 }
 0x14c   : > { %v579_v4 = vpop.xlane.xlu0 %578 }
 0x14d   : > { %v584_v5 = vmul.f32 0.03125, %v579_v4 }
 0x14f   : > { %v586_v6 = vsub.f32 %v3716_v0, %v584_v5 }
 0x150   : > { %v582_v7 = vpop.xlane.xlu0 %581 }
 0x151   : > { %v585_v8 = vmul.f32 0.03125, %v582_v7  ;;  %v588_v9 = vmul.f32 %v586_v6, %v586_v6 }
 0x153   : > { %v587_v10 = vsub.f32 %v3718_v1, %v585_v8  ;;  %v590_v11 = vsel %vm576_vm0, %v588_v9, 0.0 }
 0x154   : > { %591 = vadd.xlane.f32.xlu1 %v590_v11 }
 0x155   : > { %v589_v12 = vmul.f32 %v587_v10, %v587_v10 }
 0x157   : > { %v593_v13 = vsel %vm576_vm0, %v589_v12, 0.0 }
 0x158   : > { %594 = vadd.xlane.f32.xlu1 %v593_v13 }
 0x1e1   : > { %v592_v20 = vpop.xlane.xlu1 %591 }
 0x1e2   : > { %v596_v21 = vmul.f32 0.03125, %v592_v20 }
 0x1e4   : > { %v598_v22 = vadd.f32 1e-05, %v596_v21 }
 0x1e5   : > { %v595_v23 = vpop.xlane.xlu1 %594 }
 0x1e6   : > { %3103 = vrsqrt.f32 %v598_v22  ;;  %v597_v24 = vmul.f32 0.03125, %v595_v23 }
 0x1e8   : > { %v599_v25 = vadd.f32 1e-05, %v597_v24 }
 0x1ea   : > { %3105 = vrsqrt.f32 %v599_v25 }
 0x1f0   : > { %v3104_v26 = vpop.eup %3103 }
 0x1f1   : > { %v602_v28 = vmul.f32 %v3104_v26, %v586_v6 }
 0x1f3   : > { %v610_v30 = vmul.f32 %v2667_v27, %v602_v28 }
 0x1f4   : > { %v3106_v31 = vpop.eup %3105 }
 0x1f5   : > { %v603_v32 = vmul.f32 %v3106_v31, %v587_v10  ;;  %v618_v33 = vadd.f32 %v2668_v29, %v610_v30 }
 0x1f7   : > { %v611_v34 = vmul.f32 %v2667_v27, %v603_v32  ;;  %2793 = vmatprep.mubr.msk.f32.mxu0 %vm576_vm0, %v618_v33 }
 0x1f9   : > { %v619_v35 = vadd.f32 %v2668_v29, %v611_v34 }
 0x1fb   : > { %2794 = vmatmul.mubr.msk.f32.vlgmr.msra.gmra.mrb[0].mxu0 %vm576_vm0, %v619_v35 }
 0x1fc   : > { %2798 = vmatprep.mubr.msk.f32.mxu0 %vm3406_vm2, %v3405_v36 }
 0x2ce   : > { %v2795_v38 = vpop.f32.mrb[0].mxu0 }
 0x2cf   : > { %v709_v39 = vadd.f32 %v2795_v38, %v2669_v37  ;;  %v703_v40 = vpop.f32.mrb[1].mxu0 }
 0x2d0   : > { %v704_v41 = vadd.f32 %v2669_v37, %v703_v40 }
 0x2d1   : > { %v713_v42 = vmul.f32 0.35355338, %v709_v39 }
 0x2d2   : > { %v712_v43 = vmul.f32 0.35355338, %v704_v41 }
 0x2d3   : > { %715 = vst.msk [vmem:[#allocation2 + $0x8] sm:$0xff] %vm576_vm0, %v713_v42 }
 0x2d4   : > { %718 = vst.msk [vmem:[#allocation2 + $0x8] sm:$0xff] %vm716_vm1, %v709_v39 }
 0x2d5   : > { %714 = vst.msk [vmem:[#allocation2] sm:$0xff] %vm576_vm0, %v712_v43 }
 0x2d6   : > { %717 = vst.msk [vmem:[#allocation2] sm:$0xff] %vm716_vm1, %v704_v41 }
 0x2db   : > { %v3761_v45 = vld [vmem:[#allocation2 + $0x8] sm:$0xff] }
 0x2dd   : > { %v3753_v44 = vld [vmem:[#allocation2] sm:$0xff] }
 0x2de   : > { %887 = vrot.lane.b32.xlu1 %v3753_v44, %s3407_s29  ;;  %721 = vrot.lane.b32.xlu0 %v3753_v44, %s3408_s30 }
 0x2e2   : > { %885 = vrot.lane.b32.xlu1 %v3753_v44, %s3409_s26  ;;  %1050 = vrot.lane.b32.xlu0 %v3753_v44, %s3410_s23 }
 0x2e6   : > { %1052 = vrot.lane.b32.xlu1 %v3753_v44, %s3411_s16  ;;  %1215 = vrot.lane.b32.xlu0 %v3753_v44, %s3412_s4 }
 0x2ea   : > { %1217 = vrot.lane.b32.xlu1 %v3753_v44, %s3413_s24  ;;  %1566 = vrot.lane.b32.xlu0 %v3761_v45, %s3407_s29  ;;  %s3421_s29 = smov [#allocation15]  }
 0x2ee   : > { %1401 = vrot.lane.b32.xlu1 %v3761_v45, %s3408_s30  ;;  %1731 = vrot.lane.b32.xlu0 %v3761_v45, %s3411_s16  ;;  %s562_s30 = sand.u32 1, %s3389_s19  }
 0x2f2   : > { %1564 = vrot.lane.b32.xlu1 %v3761_v45, %s3409_s26  ;;  %1896 = vrot.lane.b32.xlu0 %v3761_v45, %s3413_s24  ;;  %s2664_s26 = sshll.u32 %s562_s30, 4  ;;  %s4093_s24 = sld [smem:[#allocation26_spill]] }
 0x2f6   : > { %1729 = vrot.lane.b32.xlu1 %v3761_v45, %s3410_s23 }
 0x2f8   : > { %p4095_p7 = scmp.ne.s32.totalorder %s4093_s24, 0 }
 0x2fa   : > { %1894 = vrot.lane.b32.xlu1 %v3761_v45, %s3412_s4  ;;  %s4092_s4 = sld [smem:[#allocation29_spill]] }
 0x350   : > { %v888_v46 = vpop.permute.xlu1 %887  ;;  %v722_v47 = vpop.permute.xlu0 %721 }
 0x351   : > { %2797 = vmatpush3.xpose.msk.msra.mxu0 %vm723_vm3, %v722_v47 }
 0x352   : > { %2806 = vmatprep.subr.mxu0 %v3405_v36 }
 0x354   : > { %v886_v48 = vpop.permute.xlu1 %885  ;;  %2799 = vmatmul.mubr.msk.f32.vlgmr.msra.gmra.mrb[2].mxu0 %vm723_vm3, %v3753_v44  ;;  %v1051_v49 = vpop.permute.xlu0 %1050 }
 0x355   : > { %2807 = vmatpush3.xpose.msk.msra.mxu0 %vm723_vm3, %v888_v46  ;;  %2808 = vmatprep.mubr.msk.f32.mxu0 %vm3406_vm2, %v3405_v36 }
 0x356   : > { %2816 = vmatprep.subr.mxu0 %v3405_v36 }
 0x358   : > { %v1053_v50 = vpop.permute.xlu1 %1052  ;;  %2809 = vmatmul.mubr.msk.f32.vlgmr.msra.gmra.mrb[4].mxu0 %vm723_vm3, %v886_v48  ;;  %v1216_v51 = vpop.permute.xlu0 %1215 }
 0x359   : > { %2817 = vmatpush3.xpose.msk.msra.mxu0 %vm723_vm3, %v1053_v50  ;;  %2818 = vmatprep.mubr.msk.f32.mxu0 %vm3406_vm2, %v3405_v36 }
 0x35a   : > { %2826 = vmatprep.subr.mxu0 %v3405_v36 }
 0x35c   : > { %v1218_v52 = vpop.permute.xlu1 %1217  ;;  %2819 = vmatmul.mubr.msk.f32.vlgmr.msra.gmra.mrb[6].mxu0 %vm723_vm3, %v1051_v49  ;;  %v1567_v53 = vpop.permute.xlu0 %1566 }
 0x35d   : > { %2827 = vmatpush3.xpose.msk.msra.mxu0 %vm723_vm3, %v1218_v52  ;;  %2828 = vmatprep.mubr.msk.f32.mxu0 %vm3406_vm2, %v3405_v36 }
 0x35e   : > { %2836 = vmatprep.subr.mxu0 %v3405_v36 }
 0x360   : > { %v1402_v54 = vpop.permute.xlu1 %1401  ;;  %2829 = vmatmul.mubr.msk.f32.vlgmr.msra.gmra.mrb[8].mxu0 %vm723_vm3, %v1216_v51  ;;  %v1732_v56 = vpop.permute.xlu0 %1731 }
 0x361   : > { %2837 = vmatpush3.xpose.msk.msra.mxu0 %vm723_vm3, %v1402_v54  ;;  %2838 = vmatprep.mubr.msk.f32.mxu0 %vm3406_vm2, %v3405_v36 }
 0x362   : > { %2846 = vmatprep.subr.mxu0 %v3405_v36 }
 0x364   : > { %v1565_v55 = vpop.permute.xlu1 %1564  ;;  %2839 = vmatmul.mubr.msk.f32.vlgmr.msra.gmra.mrb[10].mxu0 %vm723_vm3, %v3761_v45  ;;  %v1897_v58 = vpop.permute.xlu0 %1896 }
 0x365   : > { %2847 = vmatpush3.xpose.msk.msra.mxu0 %vm723_vm3, %v1567_v53  ;;  %2848 = vmatprep.mubr.msk.f32.mxu0 %vm3406_vm2, %v3405_v36 }
 0x366   : > { %2856 = vmatprep.subr.mxu0 %v3405_v36 }
 0x368   : > { %2849 = vmatmul.mubr.msk.f32.vlgmr.msra.gmra.mrb[12].mxu0 %vm723_vm3, %v1565_v55  ;;  %v1730_v57 = vpop.permute.xlu1 %1729 }
 0x369   : > { %2857 = vmatpush3.xpose.msk.msra.mxu0 %vm723_vm3, %v1732_v56  ;;  %2858 = vmatprep.mubr.msk.f32.mxu0 %vm3406_vm2, %v3405_v36 }
 0x36a   : > { %2866 = vmatprep.subr.mxu0 %v3405_v36 }
 0x36c   : > { %2859 = vmatmul.mubr.msk.f32.vlgmr.msra.gmra.mrb[14].mxu0 %vm723_vm3, %v1730_v57  ;;  %v1895_v59 = vpop.permute.xlu1 %1894 }
 0x36d   : > { %2867 = vmatpush3.xpose.msk.msra.mxu0 %vm723_vm3, %v1897_v58  ;;  %2868 = vmatprep.mubr.msk.f32.mxu0 %vm3406_vm2, %v3405_v36 }
 0x370   : > { %2869 = vmatmul.mubr.msk.f32.vlgmr.msra.gmra.mrb[16].mxu0 %vm723_vm3, %v1895_v59 }
 0x427   : > { %v794_v60 = vpop.f32.mrb[2].mxu0 }
 0x428   : > { %v2800_v61 = vpop.f32.mrb[3].mxu0  ;;  %v798_v62 = vsel %vm723_vm3, %v794_v60, -inf }
 0x429   : > { %799 = vmax.xlane.f32.xlu0 %v798_v62 }
 0x42b   : > { %v959_v63 = vpop.f32.mrb[4].mxu0 }
 0x42c   : > { %v2810_v2 = vpop.f32.mrb[5].mxu0  ;;  %v963_v3 = vsel %vm723_vm3, %v959_v63, -inf }
 0x42d   : > { %964 = vmax.xlane.f32.xlu1 %v963_v3 }
 0x42f   : > { %v1124_v4 = vpop.f32.mrb[6].mxu0 }
 0x430   : > { %v2820_v5 = vpop.f32.mrb[7].mxu0  ;;  %v1128_v6 = vsel %vm723_vm3, %v1124_v4, -inf }
 0x431   : > { %1129 = vmax.xlane.f32.xlu0 %v1128_v6 }
 0x433   : > { %v1289_v7 = vpop.f32.mrb[8].mxu0 }
 0x434   : > { %v2830_v8 = vpop.f32.mrb[9].mxu0  ;;  %v1293_v9 = vsel %vm723_vm3, %v1289_v7, -inf }
 0x435   : > { %1294 = vmax.xlane.f32.xlu0 %v1293_v9 }
 0x437   : > { %v1473_v10 = vpop.f32.mrb[10].mxu0 }
 0x438   : > { %v2840_v11 = vpop.f32.mrb[11].mxu0  ;;  %v1477_v12 = vsel %vm723_vm3, %v1473_v10, -inf }
 0x439   : > { %1478 = vmax.xlane.f32.xlu0 %v1477_v12 }
 0x43b   : > { %v1638_v13 = vpop.f32.mrb[12].mxu0 }
 0x43c   : > { %v2850_v14 = vpop.f32.mrb[13].mxu0  ;;  %v1642_v15 = vsel %vm723_vm3, %v1638_v13, -inf }
 0x43d   : > { %1643 = vmax.xlane.f32.xlu1 %v1642_v15 }
 0x43f   : > { %v1803_v16 = vpop.f32.mrb[14].mxu0 }
 0x440   : > { %v2860_v17 = vpop.f32.mrb[15].mxu0  ;;  %v1807_v18 = vsel %vm723_vm3, %v1803_v16, -inf }
 0x441   : > { %1808 = vmax.xlane.f32.xlu0 %v1807_v18 }
 0x443   : > { %v3817_v19 = vpop.f32.mrb[16].mxu0 }
 0x444   : > { %v2870_v20 = vpop.f32.mrb[17].mxu0  ;;  %v1972_v21 = vsel %vm723_vm3, %v3817_v19, -inf }
 0x44e   : > { %809 = vrot.lane.b32.xlu1 %v3753_v44, %s3414_s18 }
 0x472   : > { %1973 = vmax.xlane.f32.xlu1 %v1972_v21 }
 0x483   : > { %1139 = vrot.lane.b32.xlu1 %v3753_v44, %s3415_s17 }
 0x487   : > { %1304 = vrot.lane.b32.xlu1 %v3753_v44, %s3416_s25 }
 0x48b   : > { %1488 = vrot.lane.b32.xlu1 %v3761_v45, %s3414_s18  ;;  %s2715_s18 = sshll.u32 %s3524_s22, 8  ;;  %s3997_s22 = scalar_lea.sflag [#allocation6], %s562_s30 }
 0x4b6   : > { %v800_v22 = vpop.xlane.xlu0 %799 }
 0x4b7   : > { %v801_v23 = vsub.f32 %v794_v60, %v800_v22 }
 0x4b9   : > { %v802_v24 = vmul.f32 1.442695, %v801_v23 }
 0x4ba   : > { %v965_v25 = vpop.xlane.xlu1 %964 }
 0x4bb   : > { %3107 = vpow2.f32 %v802_v24  ;;  %v966_v26 = vsub.f32 %v959_v63, %v965_v25 }
 0x4bd   : > { %v967_v27 = vmul.f32 1.442695, %v966_v26 }
 0x4be   : > { %v1130_v28 = vpop.xlane.xlu0 %1129 }
 0x4bf   : > { %3109 = vpow2.f32 %v967_v27  ;;  %v1131_v41 = vsub.f32 %v1124_v4, %v1130_v28 }
 0x4c1   : > { %v1132_v43 = vmul.f32 1.442695, %v1131_v41 }
 0x4c2   : > { %v1295_v29 = vpop.xlane.xlu0 %1294 }
 0x4c3   : > { %v1296_v30 = vsub.f32 %v1289_v7, %v1295_v29 }
 0x4c5   : > { %v3108_v31 = vpop.eup %3107  ;;  %v1297_v32 = vmul.f32 1.442695, %v1296_v30 }
 0x4c6   : > { %v804_v33 = vsel %vm723_vm3, %v3108_v31, 0.0  ;;  %v1479_v42 = vpop.xlane.xlu0 %1478 }
 0x4c7   : > { %3111 = vpow2.f32 %v1297_v32  ;;  %805 = vadd.xlane.f32.xlu0 %v804_v33  ;;  %v1480_v46 = vsub.f32 %v1473_v10, %v1479_v42  ;;  %v2079_v42 = vld [vmem:[%s4044_s5 + $0x8] sm:$0xff] }
 0x4c8   : > { %3113 = vpow2.f32 %v1132_v43 }
 0x4c9   : > { %v3110_v34 = vpop.eup %3109  ;;  %v1481_v48 = vmul.f32 1.442695, %v1480_v46 }
 0x4ca   : > { %v1644_v35 = vpop.xlane.xlu1 %1643  ;;  %v969_v37 = vsel %vm723_vm3, %v3110_v34, 0.0 }
 0x4cb   : > { %970 = vadd.xlane.f32.xlu1 %v969_v37  ;;  %3115 = vpow2.f32 %v1481_v48  ;;  %v1645_v50 = vsub.f32 %v1638_v13, %v1644_v35  ;;  %v2080_v48 = vld [vmem:[%s4044_s5 + $0x10] sm:$0xff] }
 0x4cd   : > { %v1646_v52 = vmul.f32 1.442695, %v1645_v50 }
 0x4ce   : > { %v810_v38 = vpop.permute.xlu1 %809  ;;  %v1809_v47 = vpop.xlane.xlu0 %1808 }
 0x4cf   : > { %2802 = vmatpush3.msra.mxu1 %v810_v38  ;;  %v1810_v49 = vsub.f32 %v1803_v16, %v1809_v47 }
 0x4d0   : > { %2811 = vmatprep.subr.mxu1 %v3405_v36 }
 0x4d1   : > { %v3830_v39 = vpop.eup %3111  ;;  %v1811_v51 = vmul.f32 1.442695, %v1810_v49  ;;  %v2081_v49 = vld [vmem:[%s4044_s5 + $0x18] sm:$0xff] }
 0x4d2   : > { %v1299_v40 = vsel %vm723_vm3, %v3830_v39, 0.0  ;;  %v3114_v53 = vpop.eup %3113  ;;  %v2946_v50 = vpack.c.bf16 %v2081_v49, %v2080_v48 }
 0x4d3   : > { %1300 = vadd.xlane.f32.xlu1 %v1299_v40  ;;  %3117 = vpow2.f32 %v1811_v51  ;;  %v1134_v54 = vsel %vm723_vm3, %v3114_v53, 0.0 }
 0x4d4   : > { %3119 = vpow2.f32 %v1646_v52 }
 0x4dd   : > { %974 = vrot.lane.b32.xlu0 %v3753_v44, %s3417_s14  ;;  %v3116_v44 = vpop.eup %3115 }
 0x4de   : > { %v1483_v56 = vsel %vm723_vm3, %v3116_v44, 0.0  ;;  %v3838_v57 = vpop.eup %3117 }
 0x4df   : > { %v1813_v60 = vsel %vm723_vm3, %v3838_v57, 0.0  ;;  %v3120_v61 = vpop.eup %3119 }
 0x4e0   : > { %v1648_v62 = vsel %vm723_vm3, %v3120_v61, 0.0 }
 0x4e4   : > { %1653 = vrot.lane.b32.xlu1 %v3761_v45, %s3417_s14 }
 0x4fc   : > { %1135 = vadd.xlane.f32.xlu0 %v1134_v54 }
 0x4ff   : > { %v1974_v55 = vpop.xlane.xlu1 %1973 }
 0x500   : > { %v1975_v58 = vsub.f32 %v3817_v19, %v1974_v55  ;;  %1484 = vadd.xlane.f32.xlu0 %v1483_v56 }
 0x502   : > { %v1976_v59 = vmul.f32 1.442695, %v1975_v58 }
 0x503   : > { %v1140_v3 = vpop.permute.xlu1 %1139 }
 0x504   : > { %3121 = vpow2.f32 %v1976_v59  ;;  %1814 = vadd.xlane.f32.xlu0 %v1813_v60 }
 0x507   : > { %v1305_v4 = vpop.permute.xlu1 %1304 }
 0x508   : > { %1649 = vadd.xlane.f32.xlu1 %v1648_v62 }
 0x50b   : > { %v1489_v5 = vpop.permute.xlu1 %1488 }
 0x50e   : > { %v3844_v63 = vpop.eup %3121 }
 0x50f   : > { %v1978_v2 = vsel %vm723_vm3, %v3844_v63, 0.0 }
 0x510   : > { %1979 = vadd.xlane.f32.xlu0 %v1978_v2 }
 0x519   : > { %1983 = vrot.lane.b32.xlu1 %v3761_v45, %s3416_s25 }
 0x526   : > { %1818 = vrot.lane.b32.xlu0 %v3761_v45, %s3415_s17  ;;  %s564_s17 = scalar_lea.vmem [#allocation15], %s2664_s26  ;;  %s3323_s26 = sshll.u32 %s3421_s29, 4  ;;  %s3324_s26 = int_to_ptr.vmem [resolvable:$false] %s3323_s26 }
 0x527   : > { %s2526_s25 = sshll.u32 %s564_s17, 4  ;;  %s3325_s23 = scalar_lea.vmem %s3324_s26, 512  ;;  %s3993_s25 = int_to_ptr.vmem [resolvable:$true] %s2526_s25 }
 0x528   : > { %s3319_s21 = scalar_lea.vmem %s3993_s25, 256  ;;  %p3326_p13 = scmp.lt.s32.totalorder %s3993_s25, %s3324_s26 }
 0x529   : > { %p3320_p4 = scmp.ne.s32.totalorder %s3993_s25, %s3319_s21  ;;  %p3327_p1 = scmp.lt.s32.totalorder %s3325_s23, %s3319_s21 }
 0x52b   : > { %p3321_p8 = pnand %p3320_p4, %p4095_p7  ;;  %p3328_p0 = por %p3327_p1, %p3326_p13 }
 0x52d   : > { %p3322_p11 = pneg %p3321_p8 }
 0x52f   : > { %p3329_p6 = pnand %p3328_p0, %p3322_p11 }
 0x554   : > { %v806_v6 = vpop.xlane.xlu0 %805 }
 0x555   : > { %3123 = vrcp.f32 %v806_v6 }
 0x558   : > { %v971_v7 = vpop.xlane.xlu1 %970  ;;  %v975_v10 = vpop.permute.xlu0 %974 }
 0x559   : > { %3125 = vrcp.f32 %v971_v7 }
 0x55f   : > { %v3124_v8 = vpop.eup %3123 }
 0x560   : > { %v808_v9 = vmul.f32 %v3124_v8, %v3108_v31  ;;  %v1301_v45 = vpop.xlane.xlu1 %1300  ;;  %v2696_v8 = vld [vmem:[#allocation9] ss:$0 sm:$0xff] }
 0x562   : > { %2804 = vmatmul.mubr.msk.f32.vlgmr.msra.gmra.mrb[0].mxu1 %vm723_vm3, %v808_v9 }
 0x563   : > { %v3126_v11 = vpop.eup %3125  ;;  %2812 = vmatpush3.msra.mxu1 %v975_v10  ;;  %2813 = vmatprep.mubr.msk.f32.mxu1 %vm3406_vm2, %v3405_v36 }
 0x564   : > { %v973_v12 = vmul.f32 %v3126_v11, %v3110_v34  ;;  %2821 = vmatprep.subr.mxu1 %v3405_v36  ;;  %v1654_v15 = vpop.permute.xlu1 %1653 }
 0x566   : > { %2814 = vmatmul.mubr.msk.f32.vlgmr.msra.gmra.mrb[2].mxu1 %vm723_vm3, %v973_v12 }
 0x567   : > { %2822 = vmatpush3.msra.mxu1 %v1140_v3  ;;  %2823 = vmatprep.mubr.msk.f32.mxu1 %vm3406_vm2, %v3405_v36 }
 0x568   : > { %2831 = vmatprep.subr.mxu1 %v3405_v36 }
 0x589   : > { %v1136_v13 = vpop.xlane.xlu0 %1135 }
 0x58a   : > { %3127 = vrcp.f32 %v1136_v13 }
 0x58b   : > { %3129 = vrcp.f32 %v1301_v45 }
 0x58d   : > { %v1485_v14 = vpop.xlane.xlu0 %1484 }
 0x58e   : > { %3131 = vrcp.f32 %v1485_v14 }
 0x591   : > { %v1815_v18 = vpop.xlane.xlu0 %1814 }
 0x594   : > { %v3128_v16 = vpop.eup %3127 }
 0x595   : > { %v1138_v17 = vmul.f32 %v3128_v16, %v3114_v53  ;;  %v1650_v19 = vpop.xlane.xlu1 %1649  ;;  %v3130_v20 = vpop.eup %3129 }
 0x596   : > { %3133 = vrcp.f32 %v1650_v19  ;;  %v1303_v21 = vmul.f32 %v3130_v20, %v3830_v39 }
 0x597   : > { %2824 = vmatmul.mubr.msk.f32.vlgmr.msra.gmra.mrb[4].mxu1 %vm723_vm3, %v1138_v17  ;;  %3135 = vrcp.f32 %v1815_v18 }
 0x598   : > { %2832 = vmatpush3.msra.mxu1 %v1305_v4  ;;  %2833 = vmatprep.mubr.msk.f32.mxu1 %vm3406_vm2, %v3405_v36  ;;  %v3132_v22 = vpop.eup %3131 }
 0x599   : > { %2841 = vmatprep.subr.mxu1 %v3405_v36  ;;  %v1487_v23 = vmul.f32 %v3132_v22, %v3116_v44  ;;  %v1984_v30 = vpop.permute.xlu1 %1983 }
 0x59b   : > { %2834 = vmatmul.mubr.msk.f32.vlgmr.msra.gmra.mrb[6].mxu1 %vm723_vm3, %v1303_v21 }
 0x59c   : > { %2842 = vmatpush3.msra.mxu1 %v1489_v5  ;;  %2843 = vmatprep.mubr.msk.f32.mxu1 %vm3406_vm2, %v3405_v36 }
 0x59d   : > { %v1980_v24 = vpop.xlane.xlu0 %1979  ;;  %2851 = vmatprep.subr.mxu1 %v3405_v36 }
 0x59e   : > { %3137 = vrcp.f32 %v1980_v24  ;;  %v2216_v24 = vld [vmem:[%s4048_s9] sm:$0xff] }
 0x59f   : > { %2844 = vmatmul.mubr.msk.f32.vlgmr.msra.gmra.mrb[8].mxu1 %vm723_vm3, %v1487_v23 }
 0x5a0   : > { %v3134_v25 = vpop.eup %3133  ;;  %2852 = vmatpush3.msra.mxu1 %v1654_v15  ;;  %2853 = vmatprep.mubr.msk.f32.mxu1 %vm3406_vm2, %v3405_v36 }
 0x5a1   : > { %v1652_v26 = vmul.f32 %v3134_v25, %v3120_v61  ;;  %v1819_v27 = vpop.permute.xlu0 %1818  ;;  %2861 = vmatprep.subr.mxu1 %v3405_v36  ;;  %v3136_v28 = vpop.eup %3135  ;;  %v2217_v25 = vld [vmem:[%s4048_s9 + $0x8] sm:$0xff] }
 0x5a2   : > { %v1817_v29 = vmul.f32 %v3136_v28, %v3838_v57  ;;  %v2309_v28 = vld [vmem:[%s4050_s11 + $0x8] sm:$0xff] }
 0x5a3   : > { %2854 = vmatmul.mubr.msk.f32.vlgmr.msra.gmra.mrb[10].mxu1 %vm723_vm3, %v1652_v26  ;;  %v2308_v26 = vld [vmem:[%s4050_s11] sm:$0xff] }
 0x5a4   : > { %2862 = vmatpush3.msra.mxu1 %v1819_v27  ;;  %2863 = vmatprep.mubr.msk.f32.mxu1 %vm3406_vm2, %v3405_v36  ;;  %v2950_v27 = vpack.c.bf16 %v2217_v25, %v2216_v24 }
 0x5a5   : > { %2871 = vmatprep.subr.mxu1 %v3405_v36 }
 0x5a7   : > { %2864 = vmatmul.mubr.msk.f32.vlgmr.msra.gmra.mrb[12].mxu1 %vm723_vm3, %v1817_v29  ;;  %v2958_v29 = vpack.c.bf16 %v2309_v28, %v2308_v26 }
 0x5a8   : > { %v3138_v31 = vpop.eup %3137  ;;  %2872 = vmatpush3.msra.mxu1 %v1984_v30  ;;  %2873 = vmatprep.mubr.msk.f32.mxu1 %vm3406_vm2, %v3405_v36  ;;  %v2078_v36 = vld [vmem:[%s4044_s5] sm:$0xff]  ;;  %v2218_v30 = vld [vmem:[%s4048_s9 + $0x10] sm:$0xff] }
 0x5a9   : > { %v1982_v32 = vmul.f32 %v3138_v31, %v3844_v63  ;;  %v2942_v46 = vpack.c.bf16 %v2079_v42, %v2078_v36  ;;  %2951 = vmatprep.subr.bf16.mxu1 %v2950_v27  ;;  %v2219_v31 = vld [vmem:[%s4048_s9 + $0x18] sm:$0xff] }
 0x5ab   : > { %2874 = vmatmul.mubr.msk.f32.vlgmr.msra.gmra.mrb[14].mxu1 %vm723_vm3, %v1982_v32  ;;  %2943 = vmatprep.subr.bf16.mxu0 %v2942_v46  ;;  %v2954_v32 = vpack.c.bf16 %v2219_v31, %v2218_v30  ;;  %v2707_v30 = vld [vmem:[%s4092_s4] ss:$0 sm:$0xff] }
 0x5ac   : > { %2945 = vmatpush3.bf16.msra.mxu0 %v2942_v46  ;;  %2953 = vmatpush3.bf16.msra.mxu1 %v2950_v27 }
 0x5ad   : > { %2947 = vmatprep.subr.bf16.mxu0 %v2946_v50  ;;  %2955 = vmatprep.subr.bf16.mxu1 %v2954_v32 }
 0x5b0   : > { %2949 = vmatpush3.bf16.msra.mxu0 %v2946_v50  ;;  %2957 = vmatpush3.bf16.msra.mxu1 %v2954_v32 }
 0x5b1   : > { %2959 = vmatprep.subr.bf16.mxu0 %v2958_v29 }
 0x635   : > { %v881_v33 = vpop.f32.mrb[0].mxu1 }
 0x636   : > { %v2805_v34 = vpop.f32.mrb[1].mxu1 }
 0x637   : > { %v2311_v34 = vld [vmem:[%s4050_s11 + $0x18] sm:$0xff] }
 0x639   : > { %v1046_v35 = vpop.f32.mrb[2].mxu1 }
 0x63a   : > { %1381 = vrot.lane.b32.xlu0 %v1046_v35, %s3418_s28  ;;  %v2815_v37 = vpop.f32.mrb[3].mxu1 }
 0x66a   : > { %v1211_v38 = vpop.f32.mrb[4].mxu1 }
 0x66b   : > { %1385 = vrot.lane.b32.xlu1 %v1211_v38, %s3419_s20  ;;  %v2825_v39 = vpop.f32.mrb[5].mxu1 }
 0x66e   : > { %v1376_v40 = vpop.f32.mrb[6].mxu1 }
 0x66f   : > { %1389 = vrot.lane.b32.xlu1 %v1376_v40, %s3420_s27  ;;  %v2835_v41 = vpop.f32.mrb[7].mxu1 }
 0x672   : > { %v1560_v43 = vpop.f32.mrb[8].mxu1 }
 0x673   : > { %v2845_v47 = vpop.f32.mrb[9].mxu1 }
 0x674   : > { %v2700_v47 = vld [vmem:[#allocation12] ss:$0 sm:$0xff] }
 0x676   : > { %v1725_v51 = vpop.f32.mrb[10].mxu1 }
 0x677   : > { %2060 = vrot.lane.b32.xlu0 %v1725_v51, %s3418_s28  ;;  %v2855_v52 = vpop.f32.mrb[11].mxu1 }
 0x67a   : > { %v1890_v53 = vpop.f32.mrb[12].mxu1 }
 0x67b   : > { %2064 = vrot.lane.b32.xlu0 %v1890_v53, %s3419_s20  ;;  %v2865_v54 = vpop.f32.mrb[13].mxu1 }
 0x67c   : > { %v2408_v54 = vld [vmem:[%s4052_s13] sm:$0xff] }
 0x67e   : > { %v2055_v44 = vpop.f32.mrb[14].mxu1 }
 0x67f   : > { %2068 = vrot.lane.b32.xlu1 %v2055_v44, %s3420_s27  ;;  %v2875_v55 = vpop.f32.mrb[15].mxu1  ;;  %v2409_v44 = vld [vmem:[%s4052_s13 + $0x8] sm:$0xff]  ;;  %s4094_s27 = sld [smem:[#allocation30_spill]] }
 0x680   : > { %v2966_v55 = vpack.c.bf16 %v2409_v44, %v2408_v54 }
 0x682   : > { %2967 = vmatprep.subr.bf16.mxu1 %v2966_v55 }
 0x685   : > { %s3990_s15 = scalar_lea.hbm %s4094_s27, %s2715_s18 }
 0x6ac   : > { %v1382_v56 = vpop.permute.xlu0 %1381 }
 0x6ad   : > { %v1392_v58 = vsel %vm723_vm3, %v881_v33, %v1382_v56  ;;  %v2310_v33 = vld [vmem:[%s4050_s11 + $0x10] sm:$0xff] }
 0x6ae   : > { %v2962_v35 = vpack.c.bf16 %v2311_v34, %v2310_v33  ;;  %v2410_v56 = vld [vmem:[%s4052_s13 + $0x10] sm:$0xff] }
 0x6dd   : > { %v1386_v57 = vpop.permute.xlu1 %1385 }
 0x6de   : > { %v1394_v59 = vsel %vm1393_vm4, %v1392_v58, %v1386_v57  ;;  %v2411_v57 = vld [vmem:[%s4052_s13 + $0x18] sm:$0xff] }
 0x6df   : > { %v2970_v58 = vpack.c.bf16 %v2411_v57, %v2410_v56 }
 0x6e1   : > { %v1390_v60 = vpop.permute.xlu1 %1389 }
 0x6e2   : > { %v1396_v61 = vsel %vm1395_vm5, %v1394_v59, %v1390_v60  ;;  %v2412_v59 = vld [vmem:[%s4052_s13 + $0x20] sm:$0xff]  ;;  %v2413_v60 = vld [vmem:[%s4052_s13 + $0x28] sm:$0xff] }
 0x6e3   : > { %1397 = vst.msk [vmem:[#allocation3] sm:$0xff] %vm576_vm0, %v1396_v61  ;;  %v2974_v61 = vpack.c.bf16 %v2413_v60, %v2412_v59 }
 0x6e9   : > { %v2061_v62 = vpop.permute.xlu0 %2060 }
 0x6ea   : > { %v2076_v63 = vld [vmem:[#allocation3] sm:$0xff]  ;;  %v2071_v3 = vsel %vm723_vm3, %v1560_v43, %v2061_v62  ;;  %v2699_v43 = vld [vmem:[#allocation10] ss:$0 sm:$0xff] }
 0x6eb   : > { %2884 = vmatprep.mubr.msk.f32.mxu0 %vm576_vm0, %v2076_v63  ;;  %v2414_v62 = vld [vmem:[%s4052_s13 + $0x30] sm:$0xff]  ;;  %v2415_v63 = vld [vmem:[%s4052_s13 + $0x38] sm:$0xff] }
 0x6ed   : > { %v2065_v2 = vpop.permute.xlu0 %2064 }
 0x6ee   : > { %v2072_v4 = vsel %vm1393_vm4, %v2071_v3, %v2065_v2  ;;  %v2978_v2 = vpack.c.bf16 %v2415_v63, %v2414_v62  ;;  %v2416_v3 = vld [vmem:[%s4052_s13 + $0x40] sm:$0xff] }
 0x6f1   : > { %v2069_v5 = vpop.permute.xlu1 %2068 }
 0x6f2   : > { %v2073_v6 = vsel %vm1395_vm5, %v2072_v4, %v2069_v5  ;;  %v2417_v4 = vld [vmem:[%s4052_s13 + $0x48] sm:$0xff] }
 0x6f3   : > { %2075 = vst.msk [vmem:[#allocation3 + $0x8] sm:$0xff] %vm576_vm0, %v2073_v6  ;;  %v2982_v5 = vpack.c.bf16 %v2417_v4, %v2416_v3  ;;  %v2418_v6 = vld [vmem:[%s4052_s13 + $0x50] sm:$0xff] }
 0x6fa   : > { %v2077_v7 = vld [vmem:[#allocation3 + $0x8] sm:$0xff] }
 0x6fb   : > { %2885 = vmatmul.mubr.msk.f32.vlgmr.msra.gmra.mrb[18].mxu0 %vm576_vm0, %v2077_v7  ;;  %v2701_v7 = vld [vmem:[#allocation13] ss:$0 sm:$0xff] }
 0x6fc   : > { %2961 = vmatpush3.bf16.msra.mxu0 %v2958_v29 }
 0x6fd   : > { %2963 = vmatprep.subr.bf16.mxu0 %v2962_v35 }
 0x700   : > { %2965 = vmatpush3.bf16.msra.mxu0 %v2962_v35 }
 0x7ce   : > { %v2886_v9 = vpop.f32.mrb[18].mxu0 }
 0x7cf   : > { %v2167_v10 = vadd.f32 %v2886_v9, %v2696_v8  ;;  %v2161_v11 = vpop.f32.mrb[19].mxu0 }
 0x7d0   : > { %v2162_v12 = vadd.f32 %v2696_v8, %v2161_v11 }
 0x7d1   : > { %v3904_v45 = vadd.f32 %v2167_v10, %v3718_v1 }
 0x7d2   : > { %v3907_v13 = vadd.f32 %v2162_v12, %v3716_v0 }
 0x7d3   : > { %v2177_v14 = vsel %vm576_vm0, %v3904_v45, 0.0 }
 0x7d4   : > { %2178 = vadd.xlane.f32.xlu1 %v2177_v14  ;;  %v2174_v15 = vsel %vm576_vm0, %v3907_v13, 0.0 }
 0x7d5   : > { %2175 = vadd.xlane.f32.xlu0 %v2174_v15 }
 0x861   : > { %v2179_v16 = vpop.xlane.xlu1 %2178 }
 0x862   : > { %v2181_v17 = vmul.f32 0.03125, %v2179_v16  ;;  %v2176_v18 = vpop.xlane.xlu0 %2175 }
 0x863   : > { %v2180_v19 = vmul.f32 0.03125, %v2176_v18 }
 0x864   : > { %v2183_v20 = vsub.f32 %v3904_v45, %v2181_v17 }
 0x865   : > { %v2182_v1 = vsub.f32 %v3907_v13, %v2180_v19 }
 0x866   : > { %v2185_v22 = vmul.f32 %v2183_v20, %v2183_v20 }
 0x867   : > { %v2184_v21 = vmul.f32 %v2182_v1, %v2182_v1 }
 0x868   : > { %v2189_v23 = vsel %vm576_vm0, %v2185_v22, 0.0 }
 0x869   : > { %v2186_v0 = vsel %vm576_vm0, %v2184_v21, 0.0 }
 0x86a   : > { %2187 = vadd.xlane.f32.xlu0 %v2186_v0  ;;  %v2704_v0 = vld [vmem:[%s4051_s12] ss:$0 sm:$0xff] }
 0x86e   : > { %2190 = vadd.xlane.f32.xlu0 %v2189_v23 }
 0x8f7   : > { %v2188_v37 = vpop.xlane.xlu0 %2187 }
 0x8f8   : > { %v2192_v38 = vmul.f32 0.03125, %v2188_v37 }
 0x8fa   : > { %v2194_v39 = vadd.f32 1e-05, %v2192_v38 }
 0x8fb   : > { %v2191_v40 = vpop.xlane.xlu0 %2190 }
 0x8fc   : > { %3139 = vrsqrt.f32 %v2194_v39  ;;  %v2193_v41 = vmul.f32 0.03125, %v2191_v40 }
 0x8fe   : > { %v2195_v36 = vadd.f32 1e-05, %v2193_v41 }
 0x900   : > { %3141 = vrsqrt.f32 %v2195_v36 }
 0x906   : > { %v3140_v42 = vpop.eup %3139 }
 0x907   : > { %v2198_v46 = vmul.f32 %v3140_v42, %v2182_v1 }
 0x909   : > { %v2206_v48 = vmul.f32 %v2699_v43, %v2198_v46 }
 0x90a   : > { %v3142_v49 = vpop.eup %3141 }
 0x90b   : > { %v2199_v50 = vmul.f32 %v3142_v49, %v2183_v20  ;;  %v2214_v51 = vadd.f32 %v2700_v47, %v2206_v48 }
 0x90d   : > { %v2207_v52 = vmul.f32 %v2699_v43, %v2199_v50  ;;  %2895 = vmatprep.mubr.msk.f32.mxu1 %vm576_vm0, %v2214_v51  ;;  %2906 = vmatprep.mubr.msk.f32.mxu0 %vm576_vm0, %v2214_v51 }
 0x90f   : > { %v2215_v53 = vadd.f32 %v2700_v47, %v2207_v52 }
 0x911   : > { %2896 = vmatmul.mubr.msk.f32.vlgmr.msra.gmra.mrb[16].mxu1 %vm576_vm0, %v2215_v53  ;;  %2907 = vmatmul.mubr.msk.f32.vlgmr.msra.gmra.mrb[20].mxu0 %vm576_vm0, %v2215_v53 }
 0x912   : > { %2969 = vmatpush3.bf16.msra.mxu1 %v2966_v55 }
 0x913   : > { %2971 = vmatprep.subr.bf16.mxu1 %v2970_v58 }
 0x916   : > { %2973 = vmatpush3.bf16.msra.mxu1 %v2970_v58 }
 0x917   : > { %2975 = vmatprep.subr.bf16.mxu1 %v2974_v61 }
 0x91a   : > { %2977 = vmatpush3.bf16.msra.mxu1 %v2974_v61 }
 0x91b   : > { %2979 = vmatprep.subr.bf16.mxu1 %v2978_v2 }
 0x91e   : > { %2981 = vmatpush3.bf16.msra.mxu1 %v2978_v2 }
 0x91f   : > { %2983 = vmatprep.subr.bf16.mxu1 %v2982_v5 }
 0x922   : > { %2985 = vmatpush3.bf16.msra.mxu1 %v2982_v5 }
 0x923   : > { %2929 = vmatprep.subr.mxu1 %v2418_v6 }
 0x926   : > { %2930 = vmatpush3.msra.mxu1 %v2418_v6 }
 0x9e4   : > { %v2897_v8 = vpop.f32.mrb[16].mxu1  ;;  %v2908_v9 = vpop.f32.mrb[20].mxu0 }
 0x9e5   : > { %v2305_v10 = vadd.f32 %v2897_v8, %v2701_v7  ;;  %v2299_v11 = vpop.f32.mrb[17].mxu1  ;;  %v2385_v12 = vpop.f32.mrb[21].mxu0  ;;  %v2391_v25 = vadd.f32 %v2908_v9, %v2704_v0 }
 0x9e6   : > { %v2300_v14 = vadd.f32 %v2701_v7, %v2299_v11  ;;  %v2386_v27 = vadd.f32 %v2704_v0, %v2385_v12 }
 0x9e7   : > { %v2395_v15 = vsub.f32 0.0, %v2305_v10 }
 0x9e8   : > { %v2394_v16 = vsub.f32 0.0, %v2300_v14 }
 0x9e9   : > { %v2398_v17 = vmul.f32 1.442695, %v2395_v15 }
 0x9ea   : > { %v2396_v18 = vmul.f32 1.442695, %v2394_v16 }
 0x9eb   : > { %3143 = vpow2.f32 %v2398_v17 }
 0x9ec   : > { %3145 = vpow2.f32 %v2396_v18 }
 0x9f5   : > { %v3144_v19 = vpop.eup %3143 }
 0x9f6   : > { %v3146_v20 = vpop.eup %3145  ;;  %v2401_v1 = vadd.f32 1.0, %v3144_v19 }
 0x9f7   : > { %v2400_v21 = vadd.f32 1.0, %v3146_v20 }
 0x9f8   : > { %3147 = vrcp.f32 %v2401_v1 }
 0x9f9   : > { %3149 = vrcp.f32 %v2400_v21 }
 0xa02   : > { %v3148_v22 = vpop.eup %3147 }
 0xa03   : > { %v3150_v23 = vpop.eup %3149  ;;  %v2405_v24 = vmul.f32 %v3148_v22, %v2305_v10 }
 0xa04   : > { %v2404_v26 = vmul.f32 %v3150_v23, %v2300_v14 }
 0xa05   : > { %v2407_v28 = vmul.f32 %v2405_v24, %v2391_v25 }
 0xa06   : > { %v2406_v29 = vmul.f32 %v2404_v26, %v2386_v27 }
 0xa08   : > { %2931 = vmatprep.mubr.msk.f32.mxu1 %vm2426_vm6, %v2406_v29 }
 0xa09   : > { %2932 = vmatmul.mubr.msk.f32.vlgmr.msra.gmra.mrb[18].mxu1 %vm2426_vm6, %v2407_v28 }
 0xadc   : > { %v2933_v31 = vpop.f32.mrb[18].mxu1 }
 0xadd   : > { %v2505_v32 = vadd.f32 %v2933_v31, %v2707_v30  ;;  %v2499_v33 = vpop.f32.mrb[19].mxu1 }
 0xade   : > { %v2500_v34 = vadd.f32 %v2707_v30, %v2499_v33 }
 0xadf   : > { %v2509_v35 = vadd.f32 %v2505_v32, %v3904_v45 }
 0xae0   : > { %v2508_v37 = vadd.f32 %v2500_v34, %v3907_v13 }
 0xae1   : > { %2511 = vst.msk [vmem:[%s564_s17 + $0x8] sm:$0xff] %vm576_vm0, %v2509_v35 }
 0xae2   : > { %2510 = vst.msk [vmem:[%s564_s17] sm:$0xff] %vm576_vm0, %v2508_v37 }
 0xae3   : > { %3332 = shalt.err (!%p3329_p6)
}
 0xae4   : > { %s3333_s30 = scalar_lea.hbm %s3990_s15, 256  ;;  %s3337_s18 = scalar_lea.hbm %s4094_s27, 512 }
 0xae5   : > { %p3334_p5 = scmp.ne.s32.totalorder %s3990_s15, %s3333_s30  ;;  %p3338_p10 = scmp.lt.u32.totalorder %s3990_s15, %s4094_s27 }
 0xae6   : > { %p3339_p2 = scmp.lt.u32.totalorder %s3337_s18, %s3333_s30  ;;  %p3341_p4 = scmp.lt.u32.totalorder %s3333_s30, %s3990_s15 }
 0xae7   : > { %p3335_p9 = pnand %p3334_p5, %p4095_p7 }
 0xae8   : > { %p3340_p3 = por %p3339_p2, %p3338_p10 }
 0xae9   : > { %p3336_p12 = pneg %p3335_p9 }
 0xaea   : > { %p3342_p8 = por %p3341_p4, %p3340_p3 }
 0xaec   : > { %p3343_p11 = pnand %p3342_p8, %p3336_p12 }
 0xaee   : > { %3346 = shalt.err (!%p3343_p11)
}
 0xaef   : > { %s3422_s20 = smov 128  }
 0xaf0   : > { %3010 = dma.vmem_to_hbm [thread:$0]  (%p4095_p7), %s3993_s25, 256, %s3990_s15, %s3997_s22, %s3422_s20, %s3422_s20, %s3418_s28  }
 0xaf1 PF: > { %s4096_s21 = sld [smem:[#allocation23_spill]]  ;;  %s4097_s29 = sld [smem:[#allocation21_spill]] }
 0xaf2   : > { %s4098_s26 = sld [smem:[#allocation27_spill]] }
 0xaf7   : > { %p3047_p13 = scmp.ge.s32.totalorder %s4096_s21, 2  ;;  %s2541_s23 = sand.u32 1, %s4097_s29  }
 0xaf8   : > { %p4099_p1 = scmp.ne.s32.totalorder %s4098_s26, 0  ;;  %s2542_s30 = scalar_lea.sflag [#allocation6], %s2541_s23 }
 0xafa   : > { %p3032_p0 = pnand %p3047_p13, %p4099_p1 }
 0xafc   : > { %3380 = dma.done.wait (!%p3032_p0), %s2542_s30, 256  }
 0xafd   : > { %3382 = vsyncadd (!%p3032_p0), %s2542_s30, 4294967040  ;;  %s4100_s21 = sld [smem:[#allocation24_spill]]  ;;  %s4101_s16 = sld [smem:[#allocation22_spill]] }
 0xafe   : > { %s4102_s20 = sld [smem:[#allocation25_spill]]  ;;  %s4103_s18 = smov %s3389_s19 }
 0xb03   : > { %p29_p6 = scmp.ge.s32.totalorder %s4100_s21, 4   ;;  %s4104_s19 = smov %s4101_s16 }
 0xb05   :  { %31 = sbr.rel (!%p29_p6) target bundleno = 11 (0xb), region = 142 }
 0xb0c   :  { %2547 = vsyncpa [#allocation5], 1 }
 0xb0d   :  { %2549 = vsyncpa [#allocation5 + $0x1], 1 }
 0xb0e   :  { %2550 = vsyncpa [#allocation8], 1 }
 0xb0f   :  { %2551 = vsyncpa [#allocation11], 1 }
 0xb10   :  { %2552 = vsyncpa [#allocation14], 1 }
 0xb11   :  { %2553 = vsyncpa [#allocation6], 1 }
 0xb12   :  { %2555 = vsyncpa [#allocation6 + $0x1], 1 }

// kernel: tpu_custom_call.1
= control target key start
LH: loop header
LB: loop body
LE: loop exit
PB: predicated region body
PF: predicated region fallthrough
CT: control target
= control target key end

     0   :  { %s4039_s0 = inlined_call_operand.vmem [shape: f32[32,32], index: 0, kind: input, shape index: {}]   ;;  %s4040_s1 = inlined_call_operand.vmem [shape: f32[1,32], index: 1, kind: input, shape index: {}]   ;;  %s4041_s2 = inlined_call_operand.hbm [shape: f32[1,32], index: 2, kind: input, shape index: {}]   ;;  %s4042_s3 = inlined_call_operand.vmem [shape: f32[32,96], index: 3, kind: input, shape index: {}]   ;;  %s4043_s4 = inlined_call_operand.hbm [shape: f32[1,96], index: 4, kind: input, shape index: {}]   ;;  %s4044_s5 = inlined_call_operand.vmem [shape: f32[32,32], index: 5, kind: input, shape index: {}]   ;;  %s4045_s6 = inlined_call_operand.hbm [shape: f32[1,32], index: 6, kind: input, shape index: {}]   ;;  %s4046_s7 = inlined_call_operand.hbm [shape: f32[1,32], index: 7, kind: input, shape index: {}]   ;;  %s4047_s8 = inlined_call_operand.hbm [shape: f32[1,32], index: 8, kind: input, shape index: {}]   ;;  %s4048_s9 = inlined_call_operand.vmem [shape: f32[32,88], index: 9, kind: input, shape index: {}]   ;;  %s4049_s10 = inlined_call_operand.hbm [shape: f32[1,88], index: 10, kind: input, shape index: {}]   ;;  %s4050_s11 = inlined_call_operand.vmem [shape: f32[32,88], index: 11, kind: input, shape index: {}]   ;;  %s4051_s12 = inlined_call_operand.vmem [shape: f32[1,88], index: 12, kind: input, shape index: {}]   ;;  %s4052_s13 = inlined_call_operand.vmem [shape: f32[88,32], index: 13, kind: input, shape index: {}]   ;;  %s4053_s14 = inlined_call_operand.vmem [shape: f32[1,32], index: 14, kind: input, shape index: {}]   ;;  %s4054_s15 = inlined_call_operand.hbm [shape: f32[32,32], index: 15, kind: output, shape index: {}]  }
   0x1   :  { %4067 = sst [smem:[#allocation28_spill]] %s4043_s4 }
   0x2   :  { %4068 = sst [smem:[#allocation29_spill]] %s4053_s14 }
   0x3   :  { %4069 = sst [smem:[#allocation30_spill]] %s4054_s15 }
   0x4   :  { %20 = vsyncpa [#allocation5], 0 }
   0x5   :  { %21 = vsyncpa [#allocation8], 0 }
   0x6   :  { %22 = vsyncpa [#allocation11], 0 }
   0x7   :  { %23 = vsyncpa [#allocation14], 0 }
   0x8   :  { %24 = vsyncpa [#allocation6], 0 }
   0x9   :  { %26 = vsyncpa [#allocation6 + $0x1], 0  ;;  %s3503_s18 = smov 0   ;;  %s3505_s19 = smov 0  }
   0xa   :  { %s3507_s20 = smov 0   ;;  %s3509_s21 = smov 0  }
   0xb LB: > { %4070 = sst [smem:[#allocation21_spill]] %s3385_s18  ;;  %s3524_s22 = sadd.s32 4294967295, %s3397_s21   ;;  %s3397_s21 = sphi %s3509_s21, %s4100_s21   ;;  %s3393_s20 = sphi %s3507_s20, %s4102_s20   ;;  %s3389_s19 = sphi %s3505_s19, %s4104_s19   ;;  %s3385_s18 = sphi %s3503_s18, %s4103_s18  }
   0xc   : > { %4071 = sst [smem:[#allocation22_spill]] %s3393_s20  ;;  %s2648_s23 = sadd.s32 4294967294, %s3397_s21  }
   0xd   : > { %4072 = sst [smem:[#allocation23_spill]] %s3397_s21  ;;  %s3528_s24 = sadd.s32 1, %s3397_s21  }
   0xe   : > { %4073 = sst [smem:[#allocation24_spill]] %s3528_s24  ;;  %s359_s25 = sadd.s32 1, %s3393_s20 }
   0xf   : > { %s356_s26 = ssub.s32 %s3397_s21, %s3528_s24  ;;  %p369_p0 = scmp.ne.s32.totalorder %s3393_s20, %s3389_s19 }
  0x10   : > { %p357_p1 = scmp.eq.s32.totalorder %s356_s26, 0  ;;  %p370_p2 = scmp.eq.s32.totalorder %s3524_s22, 1 }
  0x11   : > { %p375_p3 = scmp.ne.s32.totalorder %s3389_s19, %s3385_s18  ;;  %p376_p4 = scmp.eq.s32.totalorder %s2648_s23, 1 }
  0x12   : > { %s3539_s27 = scalar_select %p357_p1, %s3393_s20, %s359_s25  }
  0x13   : > { %p3541_p5 = por %p370_p2, %p369_p0  ;;  %p3545_p6 = por %p376_p4, %p375_p3 }
  0x14   : > { %4074 = sst [smem:[#allocation25_spill]] %s3539_s27  ;;  %p2649_p7 = scmp.ge.s32.totalorder %s3397_s21, 1 }
  0x15   : > { %s4075_s28 = scalar_select %p3541_p5, 1, 0 }
  0x16   : > { %s4077_s29 = scalar_select %p3545_p6, 1, 0 }
  0x17   : > { %4076 = sst [smem:[#allocation26_spill]] %s4075_s28  ;;  %p383_p8 = scmp.lt.s32.totalorder %s3397_s21, 3 }
  0x18   : > { %4078 = sst [smem:[#allocation27_spill]] %s4077_s29  ;;  %p4062_p9 = scmp.eq.s32.totalorder %s3524_s22, 0 }
  0x19   : > { %p3552_p10 = pnand %p2649_p7, %p383_p8  ;;  %s3399_s16 = smov [#allocation7]  }
  0x1a   : > { %s413_s17 = sshll.u32 %s3399_s16, 4  ;;  %s3400_s23 = smov [#allocation10]   ;;  %s414_s17 = int_to_ptr.vmem [resolvable:$true] %s413_s17 }
  0x1b   : > { %s4079_s30 = scalar_select %p3552_p10, 1, 0 }
  0x1c   : > { %p3012_p11 = pneg %p3552_p10  ;;  %s438_s25 = sshll.u32 %s3400_s23, 4  ;;  %s3564_s25 = int_to_ptr.vmem [resolvable:$true] %s438_s25 }
  0x1d   : > { %s3401_s27 = smov [#allocation4]   ;;  %s4081_s4 = sld [smem:[#allocation28_spill]] }
  0x1e   : > { %p3560_p12 = pnand %p4062_p9, %p3012_p11  ;;  %s399_s20 = sshll.u32 %s3401_s27, 4  ;;  %s3566_s20 = int_to_ptr.vmem [resolvable:$true] %s399_s20 }
  0x20   : > { %p3576_p0 = pneg %p3560_p12 }
  0x23   : > { %s3151_s16 = scalar_lea.hbm %s4081_s4, 16 }
  0x24   : > { %p3152_p13 = scmp.ne.s32.totalorder %s4081_s4, %s3151_s16  ;;  %p3158_p3 = scmp.lt.u32.totalorder %s3151_s16, %s4081_s4 }
  0x26   : > { %p3154_p1 = pnand %p3576_p0, %p3152_p13 }
  0x28   : > { %p3155_p2 = pneg %p3154_p1 }
  0x2a   : > { %p3160_p4 = pnand %p3158_p3, %p3155_p2 }
  0x2c   : > { %3163 = shalt.err (!%p3160_p4)
}
  0x2d   : > { %s3164_s24 = scalar_lea.vmem %s414_s17, 16  ;;  %s3171_s18 = scalar_lea.vmem %s414_s17, 32 }
  0x2e   : > { %p3165_p7 = scmp.ne.s32.totalorder %s414_s17, %s3164_s24  ;;  %p3172_p9 = scmp.lt.s32.totalorder %s414_s17, %s414_s17 }
  0x2f   : > { %p3173_p6 = scmp.lt.s32.totalorder %s3171_s18, %s3164_s24 }
  0x30   : > { %p3167_p8 = pnand %p3165_p7, %p3576_p0 }
  0x31   : > { %p3174_p5 = por %p3173_p6, %p3172_p9 }
  0x32   : > { %p3168_p11 = pneg %p3167_p8 }
  0x34   : > { %p3175_p10 = pnand %p3174_p5, %p3168_p11 }
  0x36   : > { %3178 = shalt.err (!%p3175_p10)
}
  0x37   : > { %3018 = dma.hbm_to_vmem [thread:$0]  (!%p3560_p12), %s4081_s4, 16, %s414_s17, [#allocation8]  }
  0x38   : > { %s3179_s27 = scalar_lea.hbm %s4046_s7, 16 }
  0x39   : > { %p3180_p13 = scmp.ne.s32.totalorder %s4046_s7, %s3179_s27  ;;  %p3186_p5 = scmp.lt.u32.totalorder %s3179_s27, %s4046_s7 }
  0x3b   : > { %p3182_p1 = pnand %p3180_p13, %p3576_p0 }
  0x3d   : > { %p3183_p6 = pneg %p3182_p1 }
  0x3f   : > { %p3188_p9 = pnand %p3186_p5, %p3183_p6 }
  0x41   : > { %3191 = shalt.err (!%p3188_p9)
}
  0x42   : > { %s3192_s17 = scalar_lea.vmem %s3564_s25, 16  ;;  %s3199_s14 = scalar_lea.vmem %s3564_s25, 32 }
  0x43   : > { %p3193_p10 = scmp.ne.s32.totalorder %s3564_s25, %s3192_s17  ;;  %p3200_p4 = scmp.lt.s32.totalorder %s3564_s25, %s3564_s25 }
  0x44   : > { %p3201_p7 = scmp.lt.s32.totalorder %s3199_s14, %s3192_s17 }
  0x45   : > { %p3195_p2 = pnand %p3193_p10, %p3576_p0 }
  0x46   : > { %p3202_p8 = por %p3201_p7, %p3200_p4 }
  0x47   : > { %p3196_p3 = pneg %p3195_p2 }
  0x49   : > { %p3203_p11 = pnand %p3202_p8, %p3196_p3 }
  0x4b   : > { %3206 = shalt.err (!%p3203_p11)
}
  0x4c   : > { %3024 = dma.hbm_to_vmem [thread:$0]  (!%p3560_p12), %s4046_s7, 16, %s3564_s25, [#allocation11]  }
  0x4d   : > { %s3207_s16 = scalar_lea.hbm %s4041_s2, 16 }
  0x4e   : > { %p3208_p13 = scmp.ne.s32.totalorder %s4041_s2, %s3207_s16  ;;  %p3214_p5 = scmp.lt.u32.totalorder %s3207_s16, %s4041_s2 }
  0x50   : > { %p3210_p1 = pnand %p3208_p13, %p3576_p0 }
  0x52   : > { %p3211_p6 = pneg %p3210_p1 }
  0x54   : > { %p3216_p9 = pnand %p3214_p5, %p3211_p6 }
  0x56   : > { %3219 = shalt.err (!%p3216_p9)
}
  0x57   : > { %s3220_s25 = scalar_lea.vmem %s3566_s20, 16  ;;  %s3227_s14 = scalar_lea.vmem %s3566_s20, 32 }
  0x58   : > { %p3221_p10 = scmp.ne.s32.totalorder %s3566_s20, %s3220_s25  ;;  %p3228_p4 = scmp.lt.s32.totalorder %s3566_s20, %s3566_s20 }
  0x59   : > { %p3229_p7 = scmp.lt.s32.totalorder %s3227_s14, %s3220_s25 }
  0x5a   : > { %p3223_p2 = pnand %p3221_p10, %p3576_p0 }
  0x5b   : > { %p3230_p8 = por %p3229_p7, %p3228_p4 }
  0x5c   : > { %p3224_p3 = pneg %p3223_p2 }
  0x5e   : > { %p3231_p11 = pnand %p3230_p8, %p3224_p3 }
  0x60   : > { %3234 = shalt.err (!%p3231_p11)
}
  0x61   : > { %3015 = dma.hbm_to_vmem [thread:$0]  (!%p3560_p12), %s4041_s2, 16, %s3566_s20, [#allocation5]  }
  0x62   : > { %s3402_s29 = smov [#allocation9]   ;;  %s3403_s16 = smov [#allocation12]  }
  0x63   : > { %s427_s15 = sshll.u32 %s3402_s29, 4  ;;  %s449_s27 = sshll.u32 %s3403_s16, 4  ;;  %s428_s15 = int_to_ptr.vmem [resolvable:$true] %s427_s15  ;;  %s450_s27 = int_to_ptr.vmem [resolvable:$true] %s449_s27 }
  0x64   : > { %s3235_s17 = scalar_lea.hbm %s4045_s6, 16 }
  0x65   : > { %p3236_p13 = scmp.ne.s32.totalorder %s4045_s6, %s3235_s17  ;;  %p3242_p5 = scmp.lt.u32.totalorder %s3235_s17, %s4045_s6 }
  0x67   : > { %p3238_p1 = pnand %p3236_p13, %p3576_p0 }
  0x69   : > { %p3239_p6 = pneg %p3238_p1 }
  0x6b   : > { %p3244_p9 = pnand %p3242_p5, %p3239_p6 }
  0x6d   : > { %3247 = shalt.err (!%p3244_p9)
}
  0x6e   : > { %s3248_s20 = scalar_lea.vmem %s428_s15, 16  ;;  %s3255_s21 = scalar_lea.vmem %s428_s15, 32 }
  0x6f   : > { %p3249_p10 = scmp.ne.s32.totalorder %s428_s15, %s3248_s20  ;;  %p3256_p4 = scmp.lt.s32.totalorder %s428_s15, %s428_s15 }
  0x70   : > { %p3257_p7 = scmp.lt.s32.totalorder %s3255_s21, %s3248_s20 }
  0x71   : > { %p3251_p2 = pnand %p3249_p10, %p3576_p0 }
  0x72   : > { %p3258_p8 = por %p3257_p7, %p3256_p4 }
  0x73   : > { %p3252_p3 = pneg %p3251_p2 }
  0x75   : > { %p3259_p11 = pnand %p3258_p8, %p3252_p3 }
  0x77   : > { %3262 = shalt.err (!%p3259_p11)
}
  0x78   : > { %3021 = dma.hbm_to_vmem [thread:$0]  (!%p3560_p12), %s4045_s6, 16, %s428_s15, [#allocation8]  }
  0x79   : > { %s3263_s18 = scalar_lea.hbm %s4047_s8, 16 }
  0x7a   : > { %p3264_p13 = scmp.ne.s32.totalorder %s4047_s8, %s3263_s18  ;;  %p3270_p5 = scmp.lt.u32.totalorder %s3263_s18, %s4047_s8 }
  0x7c   : > { %p3266_p1 = pnand %p3264_p13, %p3576_p0 }
  0x7e   : > { %p3267_p6 = pneg %p3266_p1 }
  0x80   : > { %p3272_p9 = pnand %p3270_p5, %p3267_p6 }
  0x82   : > { %3275 = shalt.err (!%p3272_p9)
}
  0x83   : > { %s3276_s20 = scalar_lea.vmem %s450_s27, 16  ;;  %s3283_s15 = scalar_lea.vmem %s450_s27, 32 }
  0x84   : > { %p3277_p10 = scmp.ne.s32.totalorder %s450_s27, %s3276_s20  ;;  %p3284_p4 = scmp.lt.s32.totalorder %s450_s27, %s450_s27 }
  0x85   : > { %p3285_p7 = scmp.lt.s32.totalorder %s3283_s15, %s3276_s20 }
  0x86   : > { %p3279_p2 = pnand %p3277_p10, %p3576_p0 }
  0x87   : > { %p3286_p8 = por %p3285_p7, %p3284_p4 }
  0x88   : > { %p3280_p3 = pneg %p3279_p2 }
  0x8a   : > { %p3287_p11 = pnand %p3286_p8, %p3280_p3 }
  0x8c   : > { %3290 = shalt.err (!%p3287_p11)
}
  0x8d   : > { %3027 = dma.hbm_to_vmem [thread:$0]  (!%p3560_p12), %s4047_s8, 16, %s450_s27, [#allocation11]  }
  0x8e   : > { %s3404_s16 = smov [#allocation13]   ;;  %s3291_s17 = scalar_lea.hbm %s4049_s10, 16 }
  0x8f   : > { %s463_s4 = sshll.u32 %s3404_s16, 4  ;;  %p3292_p13 = scmp.ne.s32.totalorder %s4049_s10, %s3291_s17  ;;  %s464_s4 = int_to_ptr.vmem [resolvable:$true] %s463_s4 }
  0x90   : > { %p3298_p5 = scmp.lt.u32.totalorder %s3291_s17, %s4049_s10 }
  0x91   : > { %p3294_p1 = pnand %p3292_p13, %p3576_p0 }
  0x93   : > { %p3295_p6 = pneg %p3294_p1 }
  0x95   : > { %p3300_p9 = pnand %p3298_p5, %p3295_p6 }
  0x97   : > { %3303 = shalt.err (!%p3300_p9)
}
  0x98   : > { %s3304_s27 = scalar_lea.vmem %s464_s4, 16  ;;  %s3311_s15 = scalar_lea.vmem %s464_s4, 32 }
  0x99   : > { %p3305_p10 = scmp.ne.s32.totalorder %s464_s4, %s3304_s27  ;;  %p3312_p4 = scmp.lt.s32.totalorder %s464_s4, %s464_s4 }
  0x9a   : > { %p3313_p7 = scmp.lt.s32.totalorder %s3311_s15, %s3304_s27 }
  0x9b   : > { %p3307_p2 = pnand %p3305_p10, %p3576_p0 }
  0x9c   : > { %p3314_p8 = por %p3313_p7, %p3312_p4 }
  0x9d   : > { %p3308_p3 = pneg %p3307_p2 }
  0x9f   : > { %p3315_p11 = pnand %p3314_p8, %p3308_p3 }
  0xa1   : > { %3318 = shalt.err (!%p3315_p11)
}
  0xa2   : > { %3030 = dma.hbm_to_vmem [thread:$0]  (!%p3560_p12), %s4049_s10, 16, %s464_s4, [#allocation14]  }
  0xa3   : > { %p4083_p13 = scmp.ne.s32.totalorder %s4079_s30, 0 }
  0xa4   : > { %p4084_p1 = scmp.eq.s32.totalorder (!%p4083_p13), %s3524_s22, 0 }
  0xa5   : > { %497 = sbr.rel (%p4083_p13) target bundleno = 2801 (0xaf1), region = 80 }
  0xac   : > { %3364 = dma.done.wait (%p4084_p1), [#allocation5], 16   ;;  %p4085_p0 = pmov %p4084_p1 }
  0xae   : > { %3366 = vsyncadd (%p4085_p0), [#allocation5], 4294967280  ;;  %p4086_p6 = pmov %p4085_p0 }
  0xaf   : > { %p4087_p5 = pmov %p4085_p0 }
  0xb0   : > { %3368 = dma.done.wait (%p4086_p6), [#allocation8], 32  }
  0xb1   : > { %3370 = vsyncadd (%p4087_p5), [#allocation8], 4294967264  ;;  %p4088_p9 = pmov %p4085_p0 }
  0xb2   : > { %p4089_p12 = pmov %p4085_p0 }
  0xb3   : > { %3372 = dma.done.wait (%p4088_p9), [#allocation11], 32  }
  0xb4   : > { %3374 = vsyncadd (%p4089_p12), [#allocation11], 4294967264  ;;  %p4090_p10 = pmov %p4085_p0 }
  0xb5   : > { %p4091_p2 = pmov %p4085_p0 }
  0xb6   : > { %3376 = dma.done.wait (%p4090_p10), [#allocation14], 16  }
  0xb7   : > { %3378 = vsyncadd (%p4091_p2), [#allocation14], 4294967280  ;;  %s2665_s30 = sshll.u32 %s3524_s22, 1  ;;  %vm576_vm0 = vcmask 261120   ;;  %v620_v14 = vld [vmem:[%s4042_s3] sm:$0xff]  ;;  %v621_v15 = vld [vmem:[%s4042_s3 + $0x8] sm:$0xff] }
  0xb8   : > { %p566_p3 = scmp.lt.s32.totalorder %s2665_s30, 3  ;;  %v622_v16 = vld [vmem:[%s4042_s3 + $0x10] sm:$0xff]  ;;  %v2934_v17 = vpack.c.bf16 %v621_v15, %v620_v14  ;;  %v623_v18 = vld [vmem:[%s4042_s3 + $0x18] sm:$0xff]  ;;  %v2667_v27 = vld [vmem:[%s4040_s1] ss:$0 sm:$0xff]  ;;  %v3405_v36 = vmov 0.0  }
  0xb9   : > { %v2938_v19 = vpack.c.bf16 %v623_v18, %v622_v16  ;;  %v2668_v29 = vld [vmem:[#allocation4] ss:$0 sm:$0xff]  ;;  %2801 = vmatprep.subr.mxu1 %v3405_v36  ;;  %v2669_v37 = vld [vmem:[#allocation7] ss:$0 sm:$0xff]  ;;  %vm716_vm1 = vcmask 785664   ;;  %vm3406_vm2 = vmmov 0  }
  0xba   : > { %s4106_s30 = smov (!%p566_p3, %s2665_s30), 3  ;;  %2935 = vmatprep.subr.bf16.mxu0 %v2934_v17  ;;  %2803 = vmatprep.mubr.msk.f32.mxu1 %vm3406_vm2, %v3405_v36  ;;  %s3407_s29 = smov 88   ;;  %vm723_vm3 = vcmask 64512   ;;  %vm1393_vm4 = vcmask 130048   ;;  %vm1395_vm5 = vcmask 195584   ;;  %vm2426_vm6 = vcmask 719872  }
  0xbb   : > { %s2666_s26 = sshll.u32 %s4106_s30, 3  ;;  %2937 = vmatpush3.bf16.msra.mxu0 %v2934_v17  ;;  %s3408_s30 = smov 96  }
  0xbc   : > { %s569_s4 = scalar_lea.vmem %s4039_s0, %s2666_s26  ;;  %2939 = vmatprep.subr.bf16.mxu0 %v2938_v19  ;;  %s3409_s26 = smov 120  }
  0xbd   : > { %v3716_v0 = vld [vmem:[%s569_s4] sm:$0xff]  ;;  %v3718_v1 = vld [vmem:[%s569_s4 + $0x8] sm:$0xff]  ;;  %s3410_s23 = smov 112   ;;  %s3411_s16 = smov 80  }
  0xbe   : > { %v577_v2 = vsel %vm576_vm0, %v3716_v0, 0.0  ;;  %v580_v3 = vsel %vm576_vm0, %v3718_v1, 0.0  ;;  %s3412_s4 = smov 104   ;;  %s3413_s24 = smov 72  }
  0xbf   : > { %578 = vadd.xlane.f32.xlu0 %v577_v2  ;;  %2941 = vmatpush3.bf16.msra.mxu0 %v2938_v19  ;;  %s3414_s18 = smov 64   ;;  %s3415_s17 = smov 48  }
  0xc0   : > { %2796 = vmatprep.subr.mxu0 %v3405_v36  ;;  %s3416_s25 = smov 40   ;;  %s3417_s14 = smov 56  }
  0xc1   : > { %s3418_s28 = smov 8   ;;  %s3419_s20 = smov 16  }
  0xc2   : > { %s3420_s27 = smov 24  }
  0xc3   : > { %581 = vadd.xlane.f32.xlu0 %v580_v3 }
 0x14c   : > { %v579_v4 = vpop.xlane.xlu0 %578 }
 0x14d   : > { %v584_v5 = vmul.f32 0.03125, %v579_v4 }
 0x14f   : > { %v586_v6 = vsub.f32 %v3716_v0, %v584_v5 }
 0x150   : > { %v582_v7 = vpop.xlane.xlu0 %581 }
 0x151   : > { %v585_v8 = vmul.f32 0.03125, %v582_v7  ;;  %v588_v9 = vmul.f32 %v586_v6, %v586_v6 }
 0x153   : > { %v587_v10 = vsub.f32 %v3718_v1, %v585_v8  ;;  %v590_v11 = vsel %vm576_vm0, %v588_v9, 0.0 }
 0x154   : > { %591 = vadd.xlane.f32.xlu1 %v590_v11 }
 0x155   : > { %v589_v12 = vmul.f32 %v587_v10, %v587_v10 }
 0x157   : > { %v593_v13 = vsel %vm576_vm0, %v589_v12, 0.0 }
 0x158   : > { %594 = vadd.xlane.f32.xlu1 %v593_v13 }
 0x1e1   : > { %v592_v20 = vpop.xlane.xlu1 %591 }
 0x1e2   : > { %v596_v21 = vmul.f32 0.03125, %v592_v20 }
 0x1e4   : > { %v598_v22 = vadd.f32 1e-05, %v596_v21 }
 0x1e5   : > { %v595_v23 = vpop.xlane.xlu1 %594 }
 0x1e6   : > { %3103 = vrsqrt.f32 %v598_v22  ;;  %v597_v24 = vmul.f32 0.03125, %v595_v23 }
 0x1e8   : > { %v599_v25 = vadd.f32 1e-05, %v597_v24 }
 0x1ea   : > { %3105 = vrsqrt.f32 %v599_v25 }
 0x1f0   : > { %v3104_v26 = vpop.eup %3103 }
 0x1f1   : > { %v602_v28 = vmul.f32 %v3104_v26, %v586_v6 }
 0x1f3   : > { %v610_v30 = vmul.f32 %v2667_v27, %v602_v28 }
 0x1f4   : > { %v3106_v31 = vpop.eup %3105 }
 0x1f5   : > { %v603_v32 = vmul.f32 %v3106_v31, %v587_v10  ;;  %v618_v33 = vadd.f32 %v2668_v29, %v610_v30 }
 0x1f7   : > { %v611_v34 = vmul.f32 %v2667_v27, %v603_v32  ;;  %2793 = vmatprep.mubr.msk.f32.mxu0 %vm576_vm0, %v618_v33 }
 0x1f9   : > { %v619_v35 = vadd.f32 %v2668_v29, %v611_v34 }
 0x1fb   : > { %2794 = vmatmul.mubr.msk.f32.vlgmr.msra.gmra.mrb[0].mxu0 %vm576_vm0, %v619_v35 }
 0x1fc   : > { %2798 = vmatprep.mubr.msk.f32.mxu0 %vm3406_vm2, %v3405_v36 }
 0x2ce   : > { %v2795_v38 = vpop.f32.mrb[0].mxu0 }
 0x2cf   : > { %v709_v39 = vadd.f32 %v2795_v38, %v2669_v37  ;;  %v703_v40 = vpop.f32.mrb[1].mxu0 }
 0x2d0   : > { %v704_v41 = vadd.f32 %v2669_v37, %v703_v40 }
 0x2d1   : > { %v713_v42 = vmul.f32 0.35355338, %v709_v39 }
 0x2d2   : > { %v712_v43 = vmul.f32 0.35355338, %v704_v41 }
 0x2d3   : > { %715 = vst.msk [vmem:[#allocation2 + $0x8] sm:$0xff] %vm576_vm0, %v713_v42 }
 0x2d4   : > { %718 = vst.msk [vmem:[#allocation2 + $0x8] sm:$0xff] %vm716_vm1, %v709_v39 }
 0x2d5   : > { %714 = vst.msk [vmem:[#allocation2] sm:$0xff] %vm576_vm0, %v712_v43 }
 0x2d6   : > { %717 = vst.msk [vmem:[#allocation2] sm:$0xff] %vm716_vm1, %v704_v41 }
 0x2db   : > { %v3761_v45 = vld [vmem:[#allocation2 + $0x8] sm:$0xff] }
 0x2dd   : > { %v3753_v44 = vld [vmem:[#allocation2] sm:$0xff] }
 0x2de   : > { %887 = vrot.lane.b32.xlu1 %v3753_v44, %s3407_s29  ;;  %721 = vrot.lane.b32.xlu0 %v3753_v44, %s3408_s30 }
 0x2e2   : > { %885 = vrot.lane.b32.xlu1 %v3753_v44, %s3409_s26  ;;  %1050 = vrot.lane.b32.xlu0 %v3753_v44, %s3410_s23 }
 0x2e6   : > { %1052 = vrot.lane.b32.xlu1 %v3753_v44, %s3411_s16  ;;  %1215 = vrot.lane.b32.xlu0 %v3753_v44, %s3412_s4 }
 0x2ea   : > { %1217 = vrot.lane.b32.xlu1 %v3753_v44, %s3413_s24  ;;  %1566 = vrot.lane.b32.xlu0 %v3761_v45, %s3407_s29  ;;  %s3421_s29 = smov [#allocation15]  }
 0x2ee   : > { %1401 = vrot.lane.b32.xlu1 %v3761_v45, %s3408_s30  ;;  %1731 = vrot.lane.b32.xlu0 %v3761_v45, %s3411_s16  ;;  %s562_s30 = sand.u32 1, %s3389_s19  }
 0x2f2   : > { %1564 = vrot.lane.b32.xlu1 %v3761_v45, %s3409_s26  ;;  %1896 = vrot.lane.b32.xlu0 %v3761_v45, %s3413_s24  ;;  %s2664_s26 = sshll.u32 %s562_s30, 4  ;;  %s4093_s24 = sld [smem:[#allocation26_spill]] }
 0x2f6   : > { %1729 = vrot.lane.b32.xlu1 %v3761_v45, %s3410_s23 }
 0x2f8   : > { %p4095_p7 = scmp.ne.s32.totalorder %s4093_s24, 0 }
 0x2fa   : > { %1894 = vrot.lane.b32.xlu1 %v3761_v45, %s3412_s4  ;;  %s4092_s4 = sld [smem:[#allocation29_spill]] }
 0x350   : > { %v888_v46 = vpop.permute.xlu1 %887  ;;  %v722_v47 = vpop.permute.xlu0 %721 }
 0x351   : > { %2797 = vmatpush3.xpose.msk.msra.mxu0 %vm723_vm3, %v722_v47 }
 0x352   : > { %2806 = vmatprep.subr.mxu0 %v3405_v36 }
 0x354   : > { %v886_v48 = vpop.permute.xlu1 %885  ;;  %2799 = vmatmul.mubr.msk.f32.vlgmr.msra.gmra.mrb[2].mxu0 %vm723_vm3, %v3753_v44  ;;  %v1051_v49 = vpop.permute.xlu0 %1050 }
 0x355   : > { %2807 = vmatpush3.xpose.msk.msra.mxu0 %vm723_vm3, %v888_v46  ;;  %2808 = vmatprep.mubr.msk.f32.mxu0 %vm3406_vm2, %v3405_v36 }
 0x356   : > { %2816 = vmatprep.subr.mxu0 %v3405_v36 }
 0x358   : > { %v1053_v50 = vpop.permute.xlu1 %1052  ;;  %2809 = vmatmul.mubr.msk.f32.vlgmr.msra.gmra.mrb[4].mxu0 %vm723_vm3, %v886_v48  ;;  %v1216_v51 = vpop.permute.xlu0 %1215 }
 0x359   : > { %2817 = vmatpush3.xpose.msk.msra.mxu0 %vm723_vm3, %v1053_v50  ;;  %2818 = vmatprep.mubr.msk.f32.mxu0 %vm3406_vm2, %v3405_v36 }
 0x35a   : > { %2826 = vmatprep.subr.mxu0 %v3405_v36 }
 0x35c   : > { %v1218_v52 = vpop.permute.xlu1 %1217  ;;  %2819 = vmatmul.mubr.msk.f32.vlgmr.msra.gmra.mrb[6].mxu0 %vm723_vm3, %v1051_v49  ;;  %v1567_v53 = vpop.permute.xlu0 %1566 }
 0x35d   : > { %2827 = vmatpush3.xpose.msk.msra.mxu0 %vm723_vm3, %v1218_v52  ;;  %2828 = vmatprep.mubr.msk.f32.mxu0 %vm3406_vm2, %v3405_v36 }
 0x35e   : > { %2836 = vmatprep.subr.mxu0 %v3405_v36 }
 0x360   : > { %v1402_v54 = vpop.permute.xlu1 %1401  ;;  %2829 = vmatmul.mubr.msk.f32.vlgmr.msra.gmra.mrb[8].mxu0 %vm723_vm3, %v1216_v51  ;;  %v1732_v56 = vpop.permute.xlu0 %1731 }
 0x361   : > { %2837 = vmatpush3.xpose.msk.msra.mxu0 %vm723_vm3, %v1402_v54  ;;  %2838 = vmatprep.mubr.msk.f32.mxu0 %vm3406_vm2, %v3405_v36 }
 0x362   : > { %2846 = vmatprep.subr.mxu0 %v3405_v36 }
 0x364   : > { %v1565_v55 = vpop.permute.xlu1 %1564  ;;  %2839 = vmatmul.mubr.msk.f32.vlgmr.msra.gmra.mrb[10].mxu0 %vm723_vm3, %v3761_v45  ;;  %v1897_v58 = vpop.permute.xlu0 %1896 }
 0x365   : > { %2847 = vmatpush3.xpose.msk.msra.mxu0 %vm723_vm3, %v1567_v53  ;;  %2848 = vmatprep.mubr.msk.f32.mxu0 %vm3406_vm2, %v3405_v36 }
 0x366   : > { %2856 = vmatprep.subr.mxu0 %v3405_v36 }
 0x368   : > { %2849 = vmatmul.mubr.msk.f32.vlgmr.msra.gmra.mrb[12].mxu0 %vm723_vm3, %v1565_v55  ;;  %v1730_v57 = vpop.permute.xlu1 %1729 }
 0x369   : > { %2857 = vmatpush3.xpose.msk.msra.mxu0 %vm723_vm3, %v1732_v56  ;;  %2858 = vmatprep.mubr.msk.f32.mxu0 %vm3406_vm2, %v3405_v36 }
 0x36a   : > { %2866 = vmatprep.subr.mxu0 %v3405_v36 }
 0x36c   : > { %2859 = vmatmul.mubr.msk.f32.vlgmr.msra.gmra.mrb[14].mxu0 %vm723_vm3, %v1730_v57  ;;  %v1895_v59 = vpop.permute.xlu1 %1894 }
 0x36d   : > { %2867 = vmatpush3.xpose.msk.msra.mxu0 %vm723_vm3, %v1897_v58  ;;  %2868 = vmatprep.mubr.msk.f32.mxu0 %vm3406_vm2, %v3405_v36 }
 0x370   : > { %2869 = vmatmul.mubr.msk.f32.vlgmr.msra.gmra.mrb[16].mxu0 %vm723_vm3, %v1895_v59 }
 0x427   : > { %v794_v60 = vpop.f32.mrb[2].mxu0 }
 0x428   : > { %v2800_v61 = vpop.f32.mrb[3].mxu0  ;;  %v798_v62 = vsel %vm723_vm3, %v794_v60, -inf }
 0x429   : > { %799 = vmax.xlane.f32.xlu0 %v798_v62 }
 0x42b   : > { %v959_v63 = vpop.f32.mrb[4].mxu0 }
 0x42c   : > { %v2810_v2 = vpop.f32.mrb[5].mxu0  ;;  %v963_v3 = vsel %vm723_vm3, %v959_v63, -inf }
 0x42d   : > { %964 = vmax.xlane.f32.xlu1 %v963_v3 }
 0x42f   : > { %v1124_v4 = vpop.f32.mrb[6].mxu0 }
 0x430   : > { %v2820_v5 = vpop.f32.mrb[7].mxu0  ;;  %v1128_v6 = vsel %vm723_vm3, %v1124_v4, -inf }
 0x431   : > { %1129 = vmax.xlane.f32.xlu0 %v1128_v6 }
 0x433   : > { %v1289_v7 = vpop.f32.mrb[8].mxu0 }
 0x434   : > { %v2830_v8 = vpop.f32.mrb[9].mxu0  ;;  %v1293_v9 = vsel %vm723_vm3, %v1289_v7, -inf }
 0x435   : > { %1294 = vmax.xlane.f32.xlu0 %v1293_v9 }
 0x437   : > { %v1473_v10 = vpop.f32.mrb[10].mxu0 }
 0x438   : > { %v2840_v11 = vpop.f32.mrb[11].mxu0  ;;  %v1477_v12 = vsel %vm723_vm3, %v1473_v10, -inf }
 0x439   : > { %1478 = vmax.xlane.f32.xlu0 %v1477_v12 }
 0x43b   : > { %v1638_v13 = vpop.f32.mrb[12].mxu0 }
 0x43c   : > { %v2850_v14 = vpop.f32.mrb[13].mxu0  ;;  %v1642_v15 = vsel %vm723_vm3, %v1638_v13, -inf }
 0x43d   : > { %1643 = vmax.xlane.f32.xlu1 %v1642_v15 }
 0x43f   : > { %v1803_v16 = vpop.f32.mrb[14].mxu0 }
 0x440   : > { %v2860_v17 = vpop.f32.mrb[15].mxu0  ;;  %v1807_v18 = vsel %vm723_vm3, %v1803_v16, -inf }
 0x441   : > { %1808 = vmax.xlane.f32.xlu0 %v1807_v18 }
 0x443   : > { %v3817_v19 = vpop.f32.mrb[16].mxu0 }
 0x444   : > { %v2870_v20 = vpop.f32.mrb[17].mxu0  ;;  %v1972_v21 = vsel %vm723_vm3, %v3817_v19, -inf }
 0x44e   : > { %809 = vrot.lane.b32.xlu1 %v3753_v44, %s3414_s18 }
 0x472   : > { %1973 = vmax.xlane.f32.xlu1 %v1972_v21 }
 0x483   : > { %1139 = vrot.lane.b32.xlu1 %v3753_v44, %s3415_s17 }
 0x487   : > { %1304 = vrot.lane.b32.xlu1 %v3753_v44, %s3416_s25 }
 0x48b   : > { %1488 = vrot.lane.b32.xlu1 %v3761_v45, %s3414_s18  ;;  %s2715_s18 = sshll.u32 %s3524_s22, 8  ;;  %s3997_s22 = scalar_lea.sflag [#allocation6], %s562_s30 }
 0x4b6   : > { %v800_v22 = vpop.xlane.xlu0 %799 }
 0x4b7   : > { %v801_v23 = vsub.f32 %v794_v60, %v800_v22 }
 0x4b9   : > { %v802_v24 = vmul.f32 1.442695, %v801_v23 }
 0x4ba   : > { %v965_v25 = vpop.xlane.xlu1 %964 }
 0x4bb   : > { %3107 = vpow2.f32 %v802_v24  ;;  %v966_v26 = vsub.f32 %v959_v63, %v965_v25 }
 0x4bd   : > { %v967_v27 = vmul.f32 1.442695, %v966_v26 }
 0x4be   : > { %v1130_v28 = vpop.xlane.xlu0 %1129 }
 0x4bf   : > { %3109 = vpow2.f32 %v967_v27  ;;  %v1131_v41 = vsub.f32 %v1124_v4, %v1130_v28 }
 0x4c1   : > { %v1132_v43 = vmul.f32 1.442695, %v1131_v41 }
 0x4c2   : > { %v1295_v29 = vpop.xlane.xlu0 %1294 }
 0x4c3   : > { %v1296_v30 = vsub.f32 %v1289_v7, %v1295_v29 }
 0x4c5   : > { %v3108_v31 = vpop.eup %3107  ;;  %v1297_v32 = vmul.f32 1.442695, %v1296_v30 }
 0x4c6   : > { %v804_v33 = vsel %vm723_vm3, %v3108_v31, 0.0  ;;  %v1479_v42 = vpop.xlane.xlu0 %1478 }
 0x4c7   : > { %3111 = vpow2.f32 %v1297_v32  ;;  %805 = vadd.xlane.f32.xlu0 %v804_v33  ;;  %v1480_v46 = vsub.f32 %v1473_v10, %v1479_v42  ;;  %v2079_v42 = vld [vmem:[%s4044_s5 + $0x8] sm:$0xff] }
 0x4c8   : > { %3113 = vpow2.f32 %v1132_v43 }
 0x4c9   : > { %v3110_v34 = vpop.eup %3109  ;;  %v1481_v48 = vmul.f32 1.442695, %v1480_v46 }
 0x4ca   : > { %v1644_v35 = vpop.xlane.xlu1 %1643  ;;  %v969_v37 = vsel %vm723_vm3, %v3110_v34, 0.0 }
 0x4cb   : > { %970 = vadd.xlane.f32.xlu1 %v969_v37  ;;  %3115 = vpow2.f32 %v1481_v48  ;;  %v1645_v50 = vsub.f32 %v1638_v13, %v1644_v35  ;;  %v2080_v48 = vld [vmem:[%s4044_s5 + $0x10] sm:$0xff] }
 0x4cd   : > { %v1646_v52 = vmul.f32 1.442695, %v1645_v50 }
 0x4ce   : > { %v810_v38 = vpop.permute.xlu1 %809  ;;  %v1809_v47 = vpop.xlane.xlu0 %1808 }
 0x4cf   : > { %2802 = vmatpush3.msra.mxu1 %v810_v38  ;;  %v1810_v49 = vsub.f32 %v1803_v16, %v1809_v47 }
 0x4d0   : > { %2811 = vmatprep.subr.mxu1 %v3405_v36 }
 0x4d1   : > { %v3830_v39 = vpop.eup %3111  ;;  %v1811_v51 = vmul.f32 1.442695, %v1810_v49  ;;  %v2081_v49 = vld [vmem:[%s4044_s5 + $0x18] sm:$0xff] }
 0x4d2   : > { %v1299_v40 = vsel %vm723_vm3, %v3830_v39, 0.0  ;;  %v3114_v53 = vpop.eup %3113  ;;  %v2946_v50 = vpack.c.bf16 %v2081_v49, %v2080_v48 }
 0x4d3   : > { %1300 = vadd.xlane.f32.xlu1 %v1299_v40  ;;  %3117 = vpow2.f32 %v1811_v51  ;;  %v1134_v54 = vsel %vm723_vm3, %v3114_v53, 0.0 }
 0x4d4   : > { %3119 = vpow2.f32 %v1646_v52 }
 0x4dd   : > { %974 = vrot.lane.b32.xlu0 %v3753_v44, %s3417_s14  ;;  %v3116_v44 = vpop.eup %3115 }
 0x4de   : > { %v1483_v56 = vsel %vm723_vm3, %v3116_v44, 0.0  ;;  %v3838_v57 = vpop.eup %3117 }
 0x4df   : > { %v1813_v60 = vsel %vm723_vm3, %v3838_v57, 0.0  ;;  %v3120_v61 = vpop.eup %3119 }
 0x4e0   : > { %v1648_v62 = vsel %vm723_vm3, %v3120_v61, 0.0 }
 0x4e4   : > { %1653 = vrot.lane.b32.xlu1 %v3761_v45, %s3417_s14 }
 0x4fc   : > { %1135 = vadd.xlane.f32.xlu0 %v1134_v54 }
 0x4ff   : > { %v1974_v55 = vpop.xlane.xlu1 %1973 }
 0x500   : > { %v1975_v58 = vsub.f32 %v3817_v19, %v1974_v55  ;;  %1484 = vadd.xlane.f32.xlu0 %v1483_v56 }
 0x502   : > { %v1976_v59 = vmul.f32 1.442695, %v1975_v58 }
 0x503   : > { %v1140_v3 = vpop.permute.xlu1 %1139 }
 0x504   : > { %3121 = vpow2.f32 %v1976_v59  ;;  %1814 = vadd.xlane.f32.xlu0 %v1813_v60 }
 0x507   : > { %v1305_v4 = vpop.permute.xlu1 %1304 }
 0x508   : > { %1649 = vadd.xlane.f32.xlu1 %v1648_v62 }
 0x50b   : > { %v1489_v5 = vpop.permute.xlu1 %1488 }
 0x50e   : > { %v3844_v63 = vpop.eup %3121 }
 0x50f   : > { %v1978_v2 = vsel %vm723_vm3, %v3844_v63, 0.0 }
 0x510   : > { %1979 = vadd.xlane.f32.xlu0 %v1978_v2 }
 0x519   : > { %1983 = vrot.lane.b32.xlu1 %v3761_v45, %s3416_s25 }
 0x526   : > { %1818 = vrot.lane.b32.xlu0 %v3761_v45, %s3415_s17  ;;  %s564_s17 = scalar_lea.vmem [#allocation15], %s2664_s26  ;;  %s3323_s26 = sshll.u32 %s3421_s29, 4  ;;  %s3324_s26 = int_to_ptr.vmem [resolvable:$false] %s3323_s26 }
 0x527   : > { %s2526_s25 = sshll.u32 %s564_s17, 4  ;;  %s3325_s23 = scalar_lea.vmem %s3324_s26, 512  ;;  %s3993_s25 = int_to_ptr.vmem [resolvable:$true] %s2526_s25 }
 0x528   : > { %s3319_s21 = scalar_lea.vmem %s3993_s25, 256  ;;  %p3326_p13 = scmp.lt.s32.totalorder %s3993_s25, %s3324_s26 }
 0x529   : > { %p3320_p4 = scmp.ne.s32.totalorder %s3993_s25, %s3319_s21  ;;  %p3327_p1 = scmp.lt.s32.totalorder %s3325_s23, %s3319_s21 }
 0x52b   : > { %p3321_p8 = pnand %p3320_p4, %p4095_p7  ;;  %p3328_p0 = por %p3327_p1, %p3326_p13 }
 0x52d   : > { %p3322_p11 = pneg %p3321_p8 }
 0x52f   : > { %p3329_p6 = pnand %p3328_p0, %p3322_p11 }
 0x554   : > { %v806_v6 = vpop.xlane.xlu0 %805 }
 0x555   : > { %3123 = vrcp.f32 %v806_v6 }
 0x558   : > { %v971_v7 = vpop.xlane.xlu1 %970  ;;  %v975_v10 = vpop.permute.xlu0 %974 }
 0x559   : > { %3125 = vrcp.f32 %v971_v7 }
 0x55f   : > { %v3124_v8 = vpop.eup %3123 }
 0x560   : > { %v808_v9 = vmul.f32 %v3124_v8, %v3108_v31  ;;  %v1301_v45 = vpop.xlane.xlu1 %1300  ;;  %v2696_v8 = vld [vmem:[#allocation9] ss:$0 sm:$0xff] }
 0x562   : > { %2804 = vmatmul.mubr.msk.f32.vlgmr.msra.gmra.mrb[0].mxu1 %vm723_vm3, %v808_v9 }
 0x563   : > { %v3126_v11 = vpop.eup %3125  ;;  %2812 = vmatpush3.msra.mxu1 %v975_v10  ;;  %2813 = vmatprep.mubr.msk.f32.mxu1 %vm3406_vm2, %v3405_v36 }
 0x564   : > { %v973_v12 = vmul.f32 %v3126_v11, %v3110_v34  ;;  %2821 = vmatprep.subr.mxu1 %v3405_v36  ;;  %v1654_v15 = vpop.permute.xlu1 %1653 }
 0x566   : > { %2814 = vmatmul.mubr.msk.f32.vlgmr.msra.gmra.mrb[2].mxu1 %vm723_vm3, %v973_v12 }
 0x567   : > { %2822 = vmatpush3.msra.mxu1 %v1140_v3  ;;  %2823 = vmatprep.mubr.msk.f32.mxu1 %vm3406_vm2, %v3405_v36 }
 0x568   : > { %2831 = vmatprep.subr.mxu1 %v3405_v36 }
 0x589   : > { %v1136_v13 = vpop.xlane.xlu0 %1135 }
 0x58a   : > { %3127 = vrcp.f32 %v1136_v13 }
 0x58b   : > { %3129 = vrcp.f32 %v1301_v45 }
 0x58d   : > { %v1485_v14 = vpop.xlane.xlu0 %1484 }
 0x58e   : > { %3131 = vrcp.f32 %v1485_v14 }
 0x591   : > { %v1815_v18 = vpop.xlane.xlu0 %1814 }
 0x594   : > { %v3128_v16 = vpop.eup %3127 }
 0x595   : > { %v1138_v17 = vmul.f32 %v3128_v16, %v3114_v53  ;;  %v1650_v19 = vpop.xlane.xlu1 %1649  ;;  %v3130_v20 = vpop.eup %3129 }
 0x596   : > { %3133 = vrcp.f32 %v1650_v19  ;;  %v1303_v21 = vmul.f32 %v3130_v20, %v3830_v39 }
 0x597   : > { %2824 = vmatmul.mubr.msk.f32.vlgmr.msra.gmra.mrb[4].mxu1 %vm723_vm3, %v1138_v17  ;;  %3135 = vrcp.f32 %v1815_v18 }
 0x598   : > { %2832 = vmatpush3.msra.mxu1 %v1305_v4  ;;  %2833 = vmatprep.mubr.msk.f32.mxu1 %vm3406_vm2, %v3405_v36  ;;  %v3132_v22 = vpop.eup %3131 }
 0x599   : > { %2841 = vmatprep.subr.mxu1 %v3405_v36  ;;  %v1487_v23 = vmul.f32 %v3132_v22, %v3116_v44  ;;  %v1984_v30 = vpop.permute.xlu1 %1983 }
 0x59b   : > { %2834 = vmatmul.mubr.msk.f32.vlgmr.msra.gmra.mrb[6].mxu1 %vm723_vm3, %v1303_v21 }
 0x59c   : > { %2842 = vmatpush3.msra.mxu1 %v1489_v5  ;;  %2843 = vmatprep.mubr.msk.f32.mxu1 %vm3406_vm2, %v3405_v36 }
 0x59d   : > { %v1980_v24 = vpop.xlane.xlu0 %1979  ;;  %2851 = vmatprep.subr.mxu1 %v3405_v36 }
 0x59e   : > { %3137 = vrcp.f32 %v1980_v24  ;;  %v2216_v24 = vld [vmem:[%s4048_s9] sm:$0xff] }
 0x59f   : > { %2844 = vmatmul.mubr.msk.f32.vlgmr.msra.gmra.mrb[8].mxu1 %vm723_vm3, %v1487_v23 }
 0x5a0   : > { %v3134_v25 = vpop.eup %3133  ;;  %2852 = vmatpush3.msra.mxu1 %v1654_v15  ;;  %2853 = vmatprep.mubr.msk.f32.mxu1 %vm3406_vm2, %v3405_v36 }
 0x5a1   : > { %v1652_v26 = vmul.f32 %v3134_v25, %v3120_v61  ;;  %v1819_v27 = vpop.permute.xlu0 %1818  ;;  %2861 = vmatprep.subr.mxu1 %v3405_v36  ;;  %v3136_v28 = vpop.eup %3135  ;;  %v2217_v25 = vld [vmem:[%s4048_s9 + $0x8] sm:$0xff] }
 0x5a2   : > { %v1817_v29 = vmul.f32 %v3136_v28, %v3838_v57  ;;  %v2309_v28 = vld [vmem:[%s4050_s11 + $0x8] sm:$0xff] }
 0x5a3   : > { %2854 = vmatmul.mubr.msk.f32.vlgmr.msra.gmra.mrb[10].mxu1 %vm723_vm3, %v1652_v26  ;;  %v2308_v26 = vld [vmem:[%s4050_s11] sm:$0xff] }
 0x5a4   : > { %2862 = vmatpush3.msra.mxu1 %v1819_v27  ;;  %2863 = vmatprep.mubr.msk.f32.mxu1 %vm3406_vm2, %v3405_v36  ;;  %v2950_v27 = vpack.c.bf16 %v2217_v25, %v2216_v24 }
 0x5a5   : > { %2871 = vmatprep.subr.mxu1 %v3405_v36 }
 0x5a7   : > { %2864 = vmatmul.mubr.msk.f32.vlgmr.msra.gmra.mrb[12].mxu1 %vm723_vm3, %v1817_v29  ;;  %v2958_v29 = vpack.c.bf16 %v2309_v28, %v2308_v26 }
 0x5a8   : > { %v3138_v31 = vpop.eup %3137  ;;  %2872 = vmatpush3.msra.mxu1 %v1984_v30  ;;  %2873 = vmatprep.mubr.msk.f32.mxu1 %vm3406_vm2, %v3405_v36  ;;  %v2078_v36 = vld [vmem:[%s4044_s5] sm:$0xff]  ;;  %v2218_v30 = vld [vmem:[%s4048_s9 + $0x10] sm:$0xff] }
 0x5a9   : > { %v1982_v32 = vmul.f32 %v3138_v31, %v3844_v63  ;;  %v2942_v46 = vpack.c.bf16 %v2079_v42, %v2078_v36  ;;  %2951 = vmatprep.subr.bf16.mxu1 %v2950_v27  ;;  %v2219_v31 = vld [vmem:[%s4048_s9 + $0x18] sm:$0xff] }
 0x5ab   : > { %2874 = vmatmul.mubr.msk.f32.vlgmr.msra.gmra.mrb[14].mxu1 %vm723_vm3, %v1982_v32  ;;  %2943 = vmatprep.subr.bf16.mxu0 %v2942_v46  ;;  %v2954_v32 = vpack.c.bf16 %v2219_v31, %v2218_v30  ;;  %v2707_v30 = vld [vmem:[%s4092_s4] ss:$0 sm:$0xff] }
 0x5ac   : > { %2945 = vmatpush3.bf16.msra.mxu0 %v2942_v46  ;;  %2953 = vmatpush3.bf16.msra.mxu1 %v2950_v27 }
 0x5ad   : > { %2947 = vmatprep.subr.bf16.mxu0 %v2946_v50  ;;  %2955 = vmatprep.subr.bf16.mxu1 %v2954_v32 }
 0x5b0   : > { %2949 = vmatpush3.bf16.msra.mxu0 %v2946_v50  ;;  %2957 = vmatpush3.bf16.msra.mxu1 %v2954_v32 }
 0x5b1   : > { %2959 = vmatprep.subr.bf16.mxu0 %v2958_v29 }
 0x635   : > { %v881_v33 = vpop.f32.mrb[0].mxu1 }
 0x636   : > { %v2805_v34 = vpop.f32.mrb[1].mxu1 }
 0x637   : > { %v2311_v34 = vld [vmem:[%s4050_s11 + $0x18] sm:$0xff] }
 0x639   : > { %v1046_v35 = vpop.f32.mrb[2].mxu1 }
 0x63a   : > { %1381 = vrot.lane.b32.xlu0 %v1046_v35, %s3418_s28  ;;  %v2815_v37 = vpop.f32.mrb[3].mxu1 }
 0x66a   : > { %v1211_v38 = vpop.f32.mrb[4].mxu1 }
 0x66b   : > { %1385 = vrot.lane.b32.xlu1 %v1211_v38, %s3419_s20  ;;  %v2825_v39 = vpop.f32.mrb[5].mxu1 }
 0x66e   : > { %v1376_v40 = vpop.f32.mrb[6].mxu1 }
 0x66f   : > { %1389 = vrot.lane.b32.xlu1 %v1376_v40, %s3420_s27  ;;  %v2835_v41 = vpop.f32.mrb[7].mxu1 }
 0x672   : > { %v1560_v43 = vpop.f32.mrb[8].mxu1 }
 0x673   : > { %v2845_v47 = vpop.f32.mrb[9].mxu1 }
 0x674   : > { %v2700_v47 = vld [vmem:[#allocation12] ss:$0 sm:$0xff] }
 0x676   : > { %v1725_v51 = vpop.f32.mrb[10].mxu1 }
 0x677   : > { %2060 = vrot.lane.b32.xlu0 %v1725_v51, %s3418_s28  ;;  %v2855_v52 = vpop.f32.mrb[11].mxu1 }
 0x67a   : > { %v1890_v53 = vpop.f32.mrb[12].mxu1 }
 0x67b   : > { %2064 = vrot.lane.b32.xlu0 %v1890_v53, %s3419_s20  ;;  %v2865_v54 = vpop.f32.mrb[13].mxu1 }
 0x67c   : > { %v2408_v54 = vld [vmem:[%s4052_s13] sm:$0xff] }
 0x67e   : > { %v2055_v44 = vpop.f32.mrb[14].mxu1 }
 0x67f   : > { %2068 = vrot.lane.b32.xlu1 %v2055_v44, %s3420_s27  ;;  %v2875_v55 = vpop.f32.mrb[15].mxu1  ;;  %v2409_v44 = vld [vmem:[%s4052_s13 + $0x8] sm:$0xff]  ;;  %s4094_s27 = sld [smem:[#allocation30_spill]] }
 0x680   : > { %v2966_v55 = vpack.c.bf16 %v2409_v44, %v2408_v54 }
 0x682   : > { %2967 = vmatprep.subr.bf16.mxu1 %v2966_v55 }
 0x685   : > { %s3990_s15 = scalar_lea.hbm %s4094_s27, %s2715_s18 }
 0x6ac   : > { %v1382_v56 = vpop.permute.xlu0 %1381 }
 0x6ad   : > { %v1392_v58 = vsel %vm723_vm3, %v881_v33, %v1382_v56  ;;  %v2310_v33 = vld [vmem:[%s4050_s11 + $0x10] sm:$0xff] }
 0x6ae   : > { %v2962_v35 = vpack.c.bf16 %v2311_v34, %v2310_v33  ;;  %v2410_v56 = vld [vmem:[%s4052_s13 + $0x10] sm:$0xff] }
 0x6dd   : > { %v1386_v57 = vpop.permute.xlu1 %1385 }
 0x6de   : > { %v1394_v59 = vsel %vm1393_vm4, %v1392_v58, %v1386_v57  ;;  %v2411_v57 = vld [vmem:[%s4052_s13 + $0x18] sm:$0xff] }
 0x6df   : > { %v2970_v58 = vpack.c.bf16 %v2411_v57, %v2410_v56 }
 0x6e1   : > { %v1390_v60 = vpop.permute.xlu1 %1389 }
 0x6e2   : > { %v1396_v61 = vsel %vm1395_vm5, %v1394_v59, %v1390_v60  ;;  %v2412_v59 = vld [vmem:[%s4052_s13 + $0x20] sm:$0xff]  ;;  %v2413_v60 = vld [vmem:[%s4052_s13 + $0x28] sm:$0xff] }
 0x6e3   : > { %1397 = vst.msk [vmem:[#allocation3] sm:$0xff] %vm576_vm0, %v1396_v61  ;;  %v2974_v61 = vpack.c.bf16 %v2413_v60, %v2412_v59 }
 0x6e9   : > { %v2061_v62 = vpop.permute.xlu0 %2060 }
 0x6ea   : > { %v2076_v63 = vld [vmem:[#allocation3] sm:$0xff]  ;;  %v2071_v3 = vsel %vm723_vm3, %v1560_v43, %v2061_v62  ;;  %v2699_v43 = vld [vmem:[#allocation10] ss:$0 sm:$0xff] }
 0x6eb   : > { %2884 = vmatprep.mubr.msk.f32.mxu0 %vm576_vm0, %v2076_v63  ;;  %v2414_v62 = vld [vmem:[%s4052_s13 + $0x30] sm:$0xff]  ;;  %v2415_v63 = vld [vmem:[%s4052_s13 + $0x38] sm:$0xff] }
 0x6ed   : > { %v2065_v2 = vpop.permute.xlu0 %2064 }
 0x6ee   : > { %v2072_v4 = vsel %vm1393_vm4, %v2071_v3, %v2065_v2  ;;  %v2978_v2 = vpack.c.bf16 %v2415_v63, %v2414_v62  ;;  %v2416_v3 = vld [vmem:[%s4052_s13 + $0x40] sm:$0xff] }
 0x6f1   : > { %v2069_v5 = vpop.permute.xlu1 %2068 }
 0x6f2   : > { %v2073_v6 = vsel %vm1395_vm5, %v2072_v4, %v2069_v5  ;;  %v2417_v4 = vld [vmem:[%s4052_s13 + $0x48] sm:$0xff] }
 0x6f3   : > { %2075 = vst.msk [vmem:[#allocation3 + $0x8] sm:$0xff] %vm576_vm0, %v2073_v6  ;;  %v2982_v5 = vpack.c.bf16 %v2417_v4, %v2416_v3  ;;  %v2418_v6 = vld [vmem:[%s4052_s13 + $0x50] sm:$0xff] }
 0x6fa   : > { %v2077_v7 = vld [vmem:[#allocation3 + $0x8] sm:$0xff] }
 0x6fb   : > { %2885 = vmatmul.mubr.msk.f32.vlgmr.msra.gmra.mrb[18].mxu0 %vm576_vm0, %v2077_v7  ;;  %v2701_v7 = vld [vmem:[#allocation13] ss:$0 sm:$0xff] }
 0x6fc   : > { %2961 = vmatpush3.bf16.msra.mxu0 %v2958_v29 }
 0x6fd   : > { %2963 = vmatprep.subr.bf16.mxu0 %v2962_v35 }
 0x700   : > { %2965 = vmatpush3.bf16.msra.mxu0 %v2962_v35 }
 0x7ce   : > { %v2886_v9 = vpop.f32.mrb[18].mxu0 }
 0x7cf   : > { %v2167_v10 = vadd.f32 %v2886_v9, %v2696_v8  ;;  %v2161_v11 = vpop.f32.mrb[19].mxu0 }
 0x7d0   : > { %v2162_v12 = vadd.f32 %v2696_v8, %v2161_v11 }
 0x7d1   : > { %v3904_v45 = vadd.f32 %v2167_v10, %v3718_v1 }
 0x7d2   : > { %v3907_v13 = vadd.f32 %v2162_v12, %v3716_v0 }
 0x7d3   : > { %v2177_v14 = vsel %vm576_vm0, %v3904_v45, 0.0 }
 0x7d4   : > { %2178 = vadd.xlane.f32.xlu1 %v2177_v14  ;;  %v2174_v15 = vsel %vm576_vm0, %v3907_v13, 0.0 }
 0x7d5   : > { %2175 = vadd.xlane.f32.xlu0 %v2174_v15 }
 0x861   : > { %v2179_v16 = vpop.xlane.xlu1 %2178 }
 0x862   : > { %v2181_v17 = vmul.f32 0.03125, %v2179_v16  ;;  %v2176_v18 = vpop.xlane.xlu0 %2175 }
 0x863   : > { %v2180_v19 = vmul.f32 0.03125, %v2176_v18 }
 0x864   : > { %v2183_v20 = vsub.f32 %v3904_v45, %v2181_v17 }
 0x865   : > { %v2182_v1 = vsub.f32 %v3907_v13, %v2180_v19 }
 0x866   : > { %v2185_v22 = vmul.f32 %v2183_v20, %v2183_v20 }
 0x867   : > { %v2184_v21 = vmul.f32 %v2182_v1, %v2182_v1 }
 0x868   : > { %v2189_v23 = vsel %vm576_vm0, %v2185_v22, 0.0 }
 0x869   : > { %v2186_v0 = vsel %vm576_vm0, %v2184_v21, 0.0 }
 0x86a   : > { %2187 = vadd.xlane.f32.xlu0 %v2186_v0  ;;  %v2704_v0 = vld [vmem:[%s4051_s12] ss:$0 sm:$0xff] }
 0x86e   : > { %2190 = vadd.xlane.f32.xlu0 %v2189_v23 }
 0x8f7   : > { %v2188_v37 = vpop.xlane.xlu0 %2187 }
 0x8f8   : > { %v2192_v38 = vmul.f32 0.03125, %v2188_v37 }
 0x8fa   : > { %v2194_v39 = vadd.f32 1e-05, %v2192_v38 }
 0x8fb   : > { %v2191_v40 = vpop.xlane.xlu0 %2190 }
 0x8fc   : > { %3139 = vrsqrt.f32 %v2194_v39  ;;  %v2193_v41 = vmul.f32 0.03125, %v2191_v40 }
 0x8fe   : > { %v2195_v36 = vadd.f32 1e-05, %v2193_v41 }
 0x900   : > { %3141 = vrsqrt.f32 %v2195_v36 }
 0x906   : > { %v3140_v42 = vpop.eup %3139 }
 0x907   : > { %v2198_v46 = vmul.f32 %v3140_v42, %v2182_v1 }
 0x909   : > { %v2206_v48 = vmul.f32 %v2699_v43, %v2198_v46 }
 0x90a   : > { %v3142_v49 = vpop.eup %3141 }
 0x90b   : > { %v2199_v50 = vmul.f32 %v3142_v49, %v2183_v20  ;;  %v2214_v51 = vadd.f32 %v2700_v47, %v2206_v48 }
 0x90d   : > { %v2207_v52 = vmul.f32 %v2699_v43, %v2199_v50  ;;  %2895 = vmatprep.mubr.msk.f32.mxu1 %vm576_vm0, %v2214_v51  ;;  %2906 = vmatprep.mubr.msk.f32.mxu0 %vm576_vm0, %v2214_v51 }
 0x90f   : > { %v2215_v53 = vadd.f32 %v2700_v47, %v2207_v52 }
 0x911   : > { %2896 = vmatmul.mubr.msk.f32.vlgmr.msra.gmra.mrb[16].mxu1 %vm576_vm0, %v2215_v53  ;;  %2907 = vmatmul.mubr.msk.f32.vlgmr.msra.gmra.mrb[20].mxu0 %vm576_vm0, %v2215_v53 }
 0x912   : > { %2969 = vmatpush3.bf16.msra.mxu1 %v2966_v55 }
 0x913   : > { %2971 = vmatprep.subr.bf16.mxu1 %v2970_v58 }
 0x916   : > { %2973 = vmatpush3.bf16.msra.mxu1 %v2970_v58 }
 0x917   : > { %2975 = vmatprep.subr.bf16.mxu1 %v2974_v61 }
 0x91a   : > { %2977 = vmatpush3.bf16.msra.mxu1 %v2974_v61 }
 0x91b   : > { %2979 = vmatprep.subr.bf16.mxu1 %v2978_v2 }
 0x91e   : > { %2981 = vmatpush3.bf16.msra.mxu1 %v2978_v2 }
 0x91f   : > { %2983 = vmatprep.subr.bf16.mxu1 %v2982_v5 }
 0x922   : > { %2985 = vmatpush3.bf16.msra.mxu1 %v2982_v5 }
 0x923   : > { %2929 = vmatprep.subr.mxu1 %v2418_v6 }
 0x926   : > { %2930 = vmatpush3.msra.mxu1 %v2418_v6 }
 0x9e4   : > { %v2897_v8 = vpop.f32.mrb[16].mxu1  ;;  %v2908_v9 = vpop.f32.mrb[20].mxu0 }
 0x9e5   : > { %v2305_v10 = vadd.f32 %v2897_v8, %v2701_v7  ;;  %v2299_v11 = vpop.f32.mrb[17].mxu1  ;;  %v2385_v12 = vpop.f32.mrb[21].mxu0  ;;  %v2391_v25 = vadd.f32 %v2908_v9, %v2704_v0 }
 0x9e6   : > { %v2300_v14 = vadd.f32 %v2701_v7, %v2299_v11  ;;  %v2386_v27 = vadd.f32 %v2704_v0, %v2385_v12 }
 0x9e7   : > { %v2395_v15 = vsub.f32 0.0, %v2305_v10 }
 0x9e8   : > { %v2394_v16 = vsub.f32 0.0, %v2300_v14 }
 0x9e9   : > { %v2398_v17 = vmul.f32 1.442695, %v2395_v15 }
 0x9ea   : > { %v2396_v18 = vmul.f32 1.442695, %v2394_v16 }
 0x9eb   : > { %3143 = vpow2.f32 %v2398_v17 }
 0x9ec   : > { %3145 = vpow2.f32 %v2396_v18 }
 0x9f5   : > { %v3144_v19 = vpop.eup %3143 }
 0x9f6   : > { %v3146_v20 = vpop.eup %3145  ;;  %v2401_v1 = vadd.f32 1.0, %v3144_v19 }
 0x9f7   : > { %v2400_v21 = vadd.f32 1.0, %v3146_v20 }
 0x9f8   : > { %3147 = vrcp.f32 %v2401_v1 }
 0x9f9   : > { %3149 = vrcp.f32 %v2400_v21 }
 0xa02   : > { %v3148_v22 = vpop.eup %3147 }
 0xa03   : > { %v3150_v23 = vpop.eup %3149  ;;  %v2405_v24 = vmul.f32 %v3148_v22, %v2305_v10 }
 0xa04   : > { %v2404_v26 = vmul.f32 %v3150_v23, %v2300_v14 }
 0xa05   : > { %v2407_v28 = vmul.f32 %v2405_v24, %v2391_v25 }
 0xa06   : > { %v2406_v29 = vmul.f32 %v2404_v26, %v2386_v27 }
 0xa08   : > { %2931 = vmatprep.mubr.msk.f32.mxu1 %vm2426_vm6, %v2406_v29 }
 0xa09   : > { %2932 = vmatmul.mubr.msk.f32.vlgmr.msra.gmra.mrb[18].mxu1 %vm2426_vm6, %v2407_v28 }
 0xadc   : > { %v2933_v31 = vpop.f32.mrb[18].mxu1 }
 0xadd   : > { %v2505_v32 = vadd.f32 %v2933_v31, %v2707_v30  ;;  %v2499_v33 = vpop.f32.mrb[19].mxu1 }
 0xade   : > { %v2500_v34 = vadd.f32 %v2707_v30, %v2499_v33 }
 0xadf   : > { %v2509_v35 = vadd.f32 %v2505_v32, %v3904_v45 }
 0xae0   : > { %v2508_v37 = vadd.f32 %v2500_v34, %v3907_v13 }
 0xae1   : > { %2511 = vst.msk [vmem:[%s564_s17 + $0x8] sm:$0xff] %vm576_vm0, %v2509_v35 }
 0xae2   : > { %2510 = vst.msk [vmem:[%s564_s17] sm:$0xff] %vm576_vm0, %v2508_v37 }
 0xae3   : > { %3332 = shalt.err (!%p3329_p6)
}
 0xae4   : > { %s3333_s30 = scalar_lea.hbm %s3990_s15, 256  ;;  %s3337_s18 = scalar_lea.hbm %s4094_s27, 512 }
 0xae5   : > { %p3334_p5 = scmp.ne.s32.totalorder %s3990_s15, %s3333_s30  ;;  %p3338_p10 = scmp.lt.u32.totalorder %s3990_s15, %s4094_s27 }
 0xae6   : > { %p3339_p2 = scmp.lt.u32.totalorder %s3337_s18, %s3333_s30  ;;  %p3341_p4 = scmp.lt.u32.totalorder %s3333_s30, %s3990_s15 }
 0xae7   : > { %p3335_p9 = pnand %p3334_p5, %p4095_p7 }
 0xae8   : > { %p3340_p3 = por %p3339_p2, %p3338_p10 }
 0xae9   : > { %p3336_p12 = pneg %p3335_p9 }
 0xaea   : > { %p3342_p8 = por %p3341_p4, %p3340_p3 }
 0xaec   : > { %p3343_p11 = pnand %p3342_p8, %p3336_p12 }
 0xaee   : > { %3346 = shalt.err (!%p3343_p11)
}
 0xaef   : > { %s3422_s20 = smov 128  }
 0xaf0   : > { %3010 = dma.vmem_to_hbm [thread:$0]  (%p4095_p7), %s3993_s25, 256, %s3990_s15, %s3997_s22, %s3422_s20, %s3422_s20, %s3418_s28  }
 0xaf1 PF: > { %s4096_s21 = sld [smem:[#allocation23_spill]]  ;;  %s4097_s29 = sld [smem:[#allocation21_spill]] }
 0xaf2   : > { %s4098_s26 = sld [smem:[#allocation27_spill]] }
 0xaf7   : > { %p3047_p13 = scmp.ge.s32.totalorder %s4096_s21, 2  ;;  %s2541_s23 = sand.u32 1, %s4097_s29  }
 0xaf8   : > { %p4099_p1 = scmp.ne.s32.totalorder %s4098_s26, 0  ;;  %s2542_s30 = scalar_lea.sflag [#allocation6], %s2541_s23 }
 0xafa   : > { %p3032_p0 = pnand %p3047_p13, %p4099_p1 }
 0xafc   : > { %3380 = dma.done.wait (!%p3032_p0), %s2542_s30, 256  }
 0xafd   : > { %3382 = vsyncadd (!%p3032_p0), %s2542_s30, 4294967040  ;;  %s4100_s21 = sld [smem:[#allocation24_spill]]  ;;  %s4101_s16 = sld [smem:[#allocation22_spill]] }
 0xafe   : > { %s4102_s20 = sld [smem:[#allocation25_spill]]  ;;  %s4103_s18 = smov %s3389_s19 }
 0xb03   : > { %p29_p6 = scmp.ge.s32.totalorder %s4100_s21, 4   ;;  %s4104_s19 = smov %s4101_s16 }
 0xb05   :  { %31 = sbr.rel (!%p29_p6) target bundleno = 11 (0xb), region = 142 }
 0xb0c   :  { %2547 = vsyncpa [#allocation5], 1 }
 0xb0d   :  { %2549 = vsyncpa [#allocation5 + $0x1], 1 }
 0xb0e   :  { %2550 = vsyncpa [#allocation8], 1 }
 0xb0f   :  { %2551 = vsyncpa [#allocation11], 1 }
 0xb10   :  { %2552 = vsyncpa [#allocation14], 1 }
 0xb11   :  { %2553 = vsyncpa [#allocation6], 1 }
 0xb12   :  { %2555 = vsyncpa [#allocation6 + $0x1], 1 }

</bundles_post_ra>
